<compile_context>
chip_gen: v7x
topology: tpu7x:2x2x1
jax: 0.10.0
libtpu: 0.0.40
codegen_flags: <defaults>
</compile_context>

<pallas_src>
import functools
import math

import jax
import jax.numpy as jnp
from jax.experimental import pallas as pl
from jax.experimental.pallas import tpu as pltpu

OUT_H = 299
OUT_W = 299


def _interp_matrix(in_size: int, out_size: int) -> jnp.ndarray:
    """Bilinear interpolation matrix matching PyTorch F.interpolate
    (mode='bilinear', align_corners=False, antialias=False). Shape (out, in)."""
    scale = in_size / out_size
    src = (jnp.arange(out_size, dtype=jnp.float32) + 0.5) * scale - 0.5
    src = jnp.maximum(src, 0.0)                      # PyTorch clamps negatives to 0
    i0 = jnp.floor(src).astype(jnp.int32)
    i0 = jnp.clip(i0, 0, in_size - 1)
    i1 = jnp.minimum(i0 + 1, in_size - 1)
    w1 = src - i0.astype(jnp.float32)
    w0 = 1.0 - w1
    oh0 = jax.nn.one_hot(i0, in_size, dtype=jnp.float32)
    oh1 = jax.nn.one_hot(i1, in_size, dtype=jnp.float32)
    return w0[:, None] * oh0 + w1[:, None] * oh1


def _preprocess_kernel(ah2_ref, awt_ref, x_ref, o_ref, *, batch, h_in):
    # x_ref  : (batch * h_in, w_in)   -- `batch` stacked input planes (rows merged)
    # awt_ref: (w_in, OUT_W)          -- column-interp matrix, transposed
    # ah2_ref: (OUT_H, h_in)          -- row-interp matrix, pre-scaled by 2
    # o_ref  : (batch, OUT_H, OUT_W)
    #
    # W-pass: one large MXU matmul covering all planes; result is lane-dense
    # (last dim = 299) instead of per-plane K=N=16 matmuls.
    tmp = jnp.dot(x_ref[...], awt_ref[...],
                  preferred_element_type=jnp.float32)        # (batch*h_in, OUT_W)
    ah2 = ah2_ref[...]
    for b in range(batch):                                   # static unroll
        t_b = tmp[b * h_in:(b + 1) * h_in, :]                # (h_in, OUT_W), 8-aligned rows
        out_b = jnp.dot(ah2, t_b, preferred_element_type=jnp.float32)  # (OUT_H, OUT_W)
        o_ref[b] = (out_b - 1.0).astype(o_ref.dtype)         # 2x already folded into ah2


def preprocess_layer(images: jnp.ndarray, block_planes: int | None = None) -> jnp.ndarray:
    """images: (N, C, H, W). Returns (N, C, 299, 299) = 2*resize(images) - 1."""
    n, c, h_in, w_in = images.shape
    nc = n * c

    out_dtype = images.dtype
    if not jnp.issubdtype(out_dtype, jnp.floating):
        # Guard: integer inputs would silently truncate the [-1, 1] result.
        images = images.astype(jnp.float32)
        out_dtype = jnp.float32

    if block_planes is None:
        # ~8 planes per step, but keep >= 2 grid steps so both v7x TCs get work.
        block_planes = max(1, min(8, pl.cdiv(nc, 2)))
    # Keep the stacked (block_planes*h_in, w_in) block 8-sublane aligned.
    align = 8 // math.gcd(h_in, 8)
    block_planes = pl.cdiv(block_planes, align) * align

    nc_pad = pl.cdiv(nc, block_planes) * block_planes
    x_flat = images.reshape(nc, h_in, w_in)
    if nc_pad != nc:
        x_flat = jnp.pad(x_flat, ((0, nc_pad - nc), (0, 0), (0, 0)))
    x2d = x_flat.reshape(nc_pad * h_in, w_in)

    a_h2 = 2.0 * _interp_matrix(h_in, OUT_H)     # fold 2x scale into the MXU pass
    a_w_t = _interp_matrix(w_in, OUT_W).T        # (W_in, 299)

    kernel = functools.partial(_preprocess_kernel, batch=block_planes, h_in=h_in)

    out = pl.pallas_call(
        kernel,
        out_shape=jax.ShapeDtypeStruct((nc_pad, OUT_H, OUT_W), out_dtype),
        grid_spec=pltpu.PrefetchScalarGridSpec(
            num_scalar_prefetch=0,
            grid=(nc_pad // block_planes,),
            in_specs=[
                pl.BlockSpec((OUT_H, h_in), lambda i: (0, 0)),
                pl.BlockSpec((w_in, OUT_W), lambda i: (0, 0)),
                pl.BlockSpec((block_planes * h_in, w_in), lambda i: (i, 0)),
            ],
            out_specs=pl.BlockSpec((block_planes, OUT_H, OUT_W), lambda i: (i, 0, 0)),
        ),
        compiler_params=pltpu.CompilerParams(
            dimension_semantics=("parallel",),
            # Explicit limit: well above v5e's 16 MiB scoped default, with
            # headroom vs v7x's 64 MiB physical VMEM (B<=8: ~6 MiB of
            # double-buffered output blocks).
            vmem_limit_bytes=32 * 1024 * 1024,
        ),
    )(a_h2, a_w_t, x2d)

    return out[:nc].reshape(n, c, OUT_H, OUT_W)


if __name__ == "__main__":
    key = jax.random.PRNGKey(0)
    # Small input consistent with the module's forward: NCHW image batch.
    x = jax.random.uniform(key, (2, 4, 16, 16), dtype=jnp.float32)

    out = preprocess_layer(x)
    jax.block_until_ready(out)

    assert out.shape == (2, 4, OUT_H, OUT_W), out.shape
    assert out.dtype == x.dtype

    # Pure-JAX reference (separable bilinear + affine).
    a_h = _interp_matrix(16, OUT_H)
    a_w = _interp_matrix(16, OUT_W)
    ref = 2.0 * jnp.einsum("oh,nchw,pw->ncop", a_h, x, a_w) - 1.0
    if not jnp.allclose(out, ref, atol=1e-4, rtol=1e-4):
        raise AssertionError("mismatch vs reference")

    # Second shape: exercises the plane-count padding path (NC not a multiple
    # of the per-step plane block) and non-square, non-multiple-of-8 rows.
    x2 = jax.random.uniform(jax.random.PRNGKey(1), (1, 3, 20, 24), dtype=jnp.float32)
    out2 = preprocess_layer(x2)
    jax.block_until_ready(out2)
    a_h2 = _interp_matrix(20, OUT_H)
    a_w2 = _interp_matrix(24, OUT_W)
    ref2 = 2.0 * jnp.einsum("oh,nchw,pw->ncop", a_h2, x2, a_w2) - 1.0
    if not jnp.allclose(out2, ref2, atol=1e-4, rtol=1e-4):
        raise AssertionError("mismatch vs reference (ragged case)")

    print("KERNEL_OK")
</pallas_src>

<mosaic_0001>
module attributes {stable_mosaic.version = 11 : i64} {
  func.func @_preprocess_kernel(%arg0: i32, %arg1: memref<299x16xf32, #tpu.memory_space<vmem>>, %arg2: memref<16x299xf32, #tpu.memory_space<vmem>>, %arg3: memref<64x16xf32, #tpu.memory_space<vmem>>, %arg4: memref<4x299x299xf32, #tpu.memory_space<vmem>>) attributes {dimension_semantics = [#tpu.dimension_semantics<parallel>], iteration_bounds = array<i64: 2>, scalar_prefetch = 0 : i64, scratch_operands = 0 : i64, tpu.core_type = #tpu.core_type<tc>, window_params = [{pipeline_mode = #tpu.pipeline_mode<synchronous>, transform_indices = @transform_0, window_bounds = array<i64: 299, 16>}, {pipeline_mode = #tpu.pipeline_mode<synchronous>, transform_indices = @transform_1, window_bounds = array<i64: 16, 299>}, {transform_indices = @transform_2, window_bounds = array<i64: 64, 16>}, {transform_indices = @transform_3, window_bounds = array<i64: 4, 299, 299>}]} {
    %c0 = arith.constant 0 : index
    %c0_0 = arith.constant 0 : index
    %0 = vector.load %arg3[%c0, %c0_0] : memref<64x16xf32, #tpu.memory_space<vmem>>, vector<64x16xf32>
    %c0_1 = arith.constant 0 : index
    %c0_2 = arith.constant 0 : index
    %1 = vector.load %arg2[%c0_1, %c0_2] : memref<16x299xf32, #tpu.memory_space<vmem>>, vector<16x299xf32>
    %cst = arith.constant dense<0.000000e+00> : vector<64x299xf32>
    %2 = tpu.matmul %0, %1, %cst {dimension_numbers = #tpu.dot_dimension_numbers<[1], [0], [0], [1], [0, 0, 1, 1], [], []>} : vector<64x16xf32>, vector<16x299xf32>, vector<64x299xf32> -> vector<64x299xf32>
    %c0_3 = arith.constant 0 : index
    %c0_4 = arith.constant 0 : index
    %3 = vector.load %arg1[%c0_3, %c0_4] : memref<299x16xf32, #tpu.memory_space<vmem>>, vector<299x16xf32>
    %4 = vector.extract_strided_slice %2 {offsets = [0, 0], sizes = [16, 299], strides = [1, 1]} : vector<64x299xf32> to vector<16x299xf32>
    %cst_5 = arith.constant dense<0.000000e+00> : vector<299x299xf32>
    %5 = tpu.matmul %3, %4, %cst_5 {dimension_numbers = #tpu.dot_dimension_numbers<[1], [0], [0], [1], [0, 0, 1, 1], [], []>} : vector<299x16xf32>, vector<16x299xf32>, vector<299x299xf32> -> vector<299x299xf32>
    %cst_6 = arith.constant 1.000000e+00 : f32
    %6 = vector.broadcast %cst_6 : f32 to vector<299x299xf32>
    %7 = arith.subf %5, %6 : vector<299x299xf32>
    %c0_7 = arith.constant 0 : index
    %c0_8 = arith.constant 0 : index
    %c0_9 = arith.constant 0 : index
    %8 = vector.load %arg4[%c0_7, %c0_8, %c0_9] : memref<4x299x299xf32, #tpu.memory_space<vmem>>, vector<1x299x299xf32>
    %9 = vector.shape_cast %8 : vector<1x299x299xf32> to vector<299x299xf32>
    %10 = vector.shape_cast %7 : vector<299x299xf32> to vector<1x299x299xf32>
    tpu.vector_store %arg4[%c0_7, %c0_8, %c0_9], %10 {strides = array<i32>} : memref<4x299x299xf32, #tpu.memory_space<vmem>>, vector<1x299x299xf32>,
    %11 = vector.extract_strided_slice %2 {offsets = [16, 0], sizes = [16, 299], strides = [1, 1]} : vector<64x299xf32> to vector<16x299xf32>
    %cst_10 = arith.constant dense<0.000000e+00> : vector<299x299xf32>
    %12 = tpu.matmul %3, %11, %cst_10 {dimension_numbers = #tpu.dot_dimension_numbers<[1], [0], [0], [1], [0, 0, 1, 1], [], []>} : vector<299x16xf32>, vector<16x299xf32>, vector<299x299xf32> -> vector<299x299xf32>
    %cst_11 = arith.constant 1.000000e+00 : f32
    %13 = vector.broadcast %cst_11 : f32 to vector<299x299xf32>
    %14 = arith.subf %12, %13 : vector<299x299xf32>
    %c1 = arith.constant 1 : index
    %c0_12 = arith.constant 0 : index
    %c0_13 = arith.constant 0 : index
    %15 = vector.load %arg4[%c1, %c0_12, %c0_13] : memref<4x299x299xf32, #tpu.memory_space<vmem>>, vector<1x299x299xf32>
    %16 = vector.shape_cast %15 : vector<1x299x299xf32> to vector<299x299xf32>
    %17 = vector.shape_cast %14 : vector<299x299xf32> to vector<1x299x299xf32>
    tpu.vector_store %arg4[%c1, %c0_12, %c0_13], %17 {strides = array<i32>} : memref<4x299x299xf32, #tpu.memory_space<vmem>>, vector<1x299x299xf32>,
    %18 = vector.extract_strided_slice %2 {offsets = [32, 0], sizes = [16, 299], strides = [1, 1]} : vector<64x299xf32> to vector<16x299xf32>
    %cst_14 = arith.constant dense<0.000000e+00> : vector<299x299xf32>
    %19 = tpu.matmul %3, %18, %cst_14 {dimension_numbers = #tpu.dot_dimension_numbers<[1], [0], [0], [1], [0, 0, 1, 1], [], []>} : vector<299x16xf32>, vector<16x299xf32>, vector<299x299xf32> -> vector<299x299xf32>
    %cst_15 = arith.constant 1.000000e+00 : f32
    %20 = vector.broadcast %cst_15 : f32 to vector<299x299xf32>
    %21 = arith.subf %19, %20 : vector<299x299xf32>
    %c2 = arith.constant 2 : index
    %c0_16 = arith.constant 0 : index
    %c0_17 = arith.constant 0 : index
    %22 = vector.load %arg4[%c2, %c0_16, %c0_17] : memref<4x299x299xf32, #tpu.memory_space<vmem>>, vector<1x299x299xf32>
    %23 = vector.shape_cast %22 : vector<1x299x299xf32> to vector<299x299xf32>
    %24 = vector.shape_cast %21 : vector<299x299xf32> to vector<1x299x299xf32>
    tpu.vector_store %arg4[%c2, %c0_16, %c0_17], %24 {strides = array<i32>} : memref<4x299x299xf32, #tpu.memory_space<vmem>>, vector<1x299x299xf32>,
    %25 = vector.extract_strided_slice %2 {offsets = [48, 0], sizes = [16, 299], strides = [1, 1]} : vector<64x299xf32> to vector<16x299xf32>
    %cst_18 = arith.constant dense<0.000000e+00> : vector<299x299xf32>
    %26 = tpu.matmul %3, %25, %cst_18 {dimension_numbers = #tpu.dot_dimension_numbers<[1], [0], [0], [1], [0, 0, 1, 1], [], []>} : vector<299x16xf32>, vector<16x299xf32>, vector<299x299xf32> -> vector<299x299xf32>
    %cst_19 = arith.constant 1.000000e+00 : f32
    %27 = vector.broadcast %cst_19 : f32 to vector<299x299xf32>
    %28 = arith.subf %26, %27 : vector<299x299xf32>
    %c3 = arith.constant 3 : index
    %c0_20 = arith.constant 0 : index
    %c0_21 = arith.constant 0 : index
    %29 = vector.load %arg4[%c3, %c0_20, %c0_21] : memref<4x299x299xf32, #tpu.memory_space<vmem>>, vector<1x299x299xf32>
    %30 = vector.shape_cast %29 : vector<1x299x299xf32> to vector<299x299xf32>
    %31 = vector.shape_cast %28 : vector<299x299xf32> to vector<1x299x299xf32>
    tpu.vector_store %arg4[%c3, %c0_20, %c0_21], %31 {strides = array<i32>} : memref<4x299x299xf32, #tpu.memory_space<vmem>>, vector<1x299x299xf32>,
    return
  }
  func.func @transform_0(%arg0: i32) -> (i32, i32) {
    %c0_i32 = arith.constant 0 : i32
    %c0_i32_0 = arith.constant 0 : i32
    %c0_i32_1 = arith.constant 0 : i32
    return %c0_i32, %c0_i32_0 : i32, i32
  }
  func.func @transform_1(%arg0: i32) -> (i32, i32) {
    %c0_i32 = arith.constant 0 : i32
    %c0_i32_0 = arith.constant 0 : i32
    %c0_i32_1 = arith.constant 0 : i32
    return %c0_i32, %c0_i32_0 : i32, i32
  }
  func.func @transform_2(%arg0: i32) -> (i32, i32) {
    %c0_i32 = arith.constant 0 : i32
    %c0_i32_0 = arith.constant 0 : i32
    return %arg0, %c0_i32 : i32, i32
  }
  func.func @transform_3(%arg0: i32) -> (i32, i32, i32) {
    %c0_i32 = arith.constant 0 : i32
    %c0_i32_0 = arith.constant 0 : i32
    %c0_i32_1 = arith.constant 0 : i32
    return %arg0, %c0_i32, %c0_i32_0 : i32, i32, i32
  }
}

</mosaic_0001>

<bundles_post_ra>
// kernel: tpu_custom_call.1
= control target key start
LH: loop header
LB: loop body
LE: loop exit
PB: predicated region body
PF: predicated region fallthrough
CT: control target
= control target key end

     0   :  { %8 = vsyncpa [#allocation3], 0  ;;  %s5509_s12 = smov 0   ;;  %s7386_s0 = inlined_call_operand.vmem [shape: f32[299,16], index: 0, kind: input, shape index: {}]   ;;  %s7387_s1 = inlined_call_operand.hbm [shape: f32[16,299], index: 1, kind: input, shape index: {}]   ;;  %s7388_s2 = inlined_call_operand.vmem [shape: f32[128,16], index: 2, kind: input, shape index: {}]   ;;  %s7389_s3 = inlined_call_operand.vmem [shape: f32[8,299,299], index: 3, kind: output, shape index: {}]  }
   0x1 LB: > { %s5515_s13 = sadd.s32 4294967295, %s5483_s12   ;;  %p3781_p0 = scmp.ge.s32.totalorder %s5483_s12, 1  ;;  %s5483_s12 = sphi %s5509_s12, %s14_s12  }
   0x2   : > { %p113_p1 = scmp.lt.s32.totalorder %s5483_s12, 3  ;;  %s5485_s14 = smov [#allocation2]  }
   0x3   : > { %s128_s15 = sshll.u32 %s5485_s14, 4  ;;  %p7390_p3 = scmp.eq.s32.totalorder %s5515_s13, 0  ;;  %s129_s15 = int_to_ptr.vmem [resolvable:$true] %s128_s15 }
   0x4   : > { %p5519_p2 = pnand %p3781_p0, %p113_p1  ;;  %s5445_s20 = scalar_lea.hbm %s7387_s1, 768 }
   0x5   : > { %p5446_p6 = scmp.ne.s32.totalorder %s7387_s1, %s5445_s20  ;;  %p5452_p10 = scmp.lt.u32.totalorder %s5445_s20, %s7387_s1 }
   0x6   : > { %s7392_s16 = scalar_select %p5519_p2, 1, 0 }
   0x7   : > { %p5387_p4 = pneg %p5519_p2 }
   0x9   : > { %p5528_p5 = pnand %p7390_p3, %p5387_p4 }
   0xb   : > { %p5447_p7 = pneg %p5528_p5 }
   0xd   : > { %p5448_p8 = pnand %p5447_p7, %p5446_p6 }
   0xf   : > { %p5449_p9 = pneg %p5448_p8 }
  0x11   : > { %p5454_p11 = pnand %p5452_p10, %p5449_p9 }
  0x13   : > { %5457 = shalt.err (!%p5454_p11)
}
  0x14   : > { %s5458_s25 = scalar_lea.vmem %s129_s15, 768  ;;  %p5466_p1 = scmp.lt.s32.totalorder %s129_s15, %s129_s15 }
  0x15   : > { %p5459_p12 = scmp.ne.s32.totalorder %s129_s15, %s5458_s25  ;;  %p5467_p4 = scmp.lt.s32.totalorder %s5458_s25, %s5458_s25 }
  0x17   : > { %p5461_p13 = pnand %p5459_p12, %p5447_p7  ;;  %p5468_p3 = por %p5467_p4, %p5466_p1 }
  0x19   : > { %p5462_p0 = pneg %p5461_p13 }
  0x1b   : > { %p5469_p2 = pnand %p5468_p3, %p5462_p0 }
  0x1d   : > { %5472 = shalt.err (!%p5469_p2)
}
  0x1e   : > { %s5486_s26 = smov 384   ;;  %s5487_s27 = smov 24  }
  0x1f   : > { %5390 = dma.hbm_to_vmem [thread:$0]  (!%p5528_p5), %s7387_s1, 768, %s129_s15, [#allocation3], %s5486_s26, %s5486_s26, %s5487_s27  }
  0x20   : > { %p7394_p6 = scmp.ne.s32.totalorder %s7392_s16, 0 }
  0x21   : > { %p7395_p8 = scmp.eq.s32.totalorder (!%p7394_p6), %s5515_s13, 0 }
  0x22   : > { %153 = sbr.rel (%p7394_p6) target bundleno = 944 (0x3b0), region = 32 }
  0x29   : > { %5478 = dma.done.wait (%p7395_p8), [#allocation3], 768   ;;  %p7396_p7 = pmov %p7395_p8 }
  0x2a   : > { %s3786_s30 = sshll.u32 %s5515_s13, 3  ;;  %v5488_v0 = vmov 0.0   ;;  %v200_v1 = vld [vmem:[#allocation2 + $0x8] sm:$0xff]  ;;  %v203_v2 = vld [vmem:[#allocation2 + $0x20] sm:$0xff]  ;;  %v202_v5 = vld [vmem:[#allocation2 + $0x18] sm:$0xff]  ;;  %vm205_vm0 = vcmask 130048  }
  0x2b   : > { %5480 = vsyncadd (%p7396_p7), [#allocation3], 4294966528  ;;  %330 = vmatprep.mubr.f32.mxu1 %v5488_v0  ;;  %p179_p2 = scmp.lt.s32.totalorder %s3786_s30, 15  ;;  %294 = vmatprep.mubr.f32.mxu0 %v5488_v0  ;;  %v199_v3 = vld [vmem:[#allocation2] sm:$0xff]  ;;  %v5340_v4 = vpack.c.bf16 %v203_v2, %v200_v1  ;;  %v201_v7 = vld [vmem:[#allocation2 + $0x10] sm:$0xff]  ;;  %s3788_s9 = sshll.u32 %s5515_s13, 2 }
  0x2c   : > { %v5342_v6 = vpack.c.bf16 %v202_v5, %v199_v3  ;;  %v204_v8 = vld [vmem:[#allocation2 + $0x28] sm:$0xff]  ;;  %v5596_v18 = vld [vmem:[%s7386_s0] sm:$0xff]  ;;  %v5623_v42 = vld [vmem:[%s7386_s0 + $0x10] sm:$0xff]  ;;  %p185_p3 = scmp.lt.s32.totalorder %s3788_s9, 7  ;;  %vm1264_vm1 = vcmask 351232   ;;  %vm1376_vm2 = vcmask 346112  }
  0x2d   : > { %s7398_s30 = smov (!%p179_p2, %s3786_s30), 15  ;;  %5380 = vmatprep.subr.bf16.mxu1 %v5340_v4  ;;  %5341 = vmatprep.subr.bf16.mxu0 %v5340_v4  ;;  %v5344_v9 = vpack.c.bf16 %v204_v8, %v201_v7  ;;  %v5617_v38 = vld [vmem:[%s7386_s0 + $0x8] sm:$0xff]  ;;  %v5634_v46 = vld [vmem:[%s7386_s0 + $0x18] sm:$0xff]  ;;  %v5640_v48 = vld [vmem:[%s7386_s0 + $0x20] sm:$0xff] }
  0x2e   : > { %s3787_s4 = sshll.u32 %s7398_s30, 3  ;;  %5381 = vmatpush1.bf16.msra.mxu1 %v5342_v6  ;;  %5343 = vmatpush1.bf16.msra.mxu0 %v5342_v6  ;;  %v5653_v50 = vld [vmem:[%s7386_s0 + $0x28] sm:$0xff]  ;;  %v5659_v51 = vld [vmem:[%s7386_s0 + $0x30] sm:$0xff]  ;;  %v5671_v52 = vld [vmem:[%s7386_s0 + $0x38] sm:$0xff]  ;;  %s7400_s9 = smov (!%p185_p3, %s3788_s9), 7 }
  0x2f   : > { %s5560_s7 = scalar_lea.vmem %s7388_s2, %s3787_s4  ;;  %5345 = vmatprep.subr.bf16.mxu1 %v5344_v9  ;;  %v5677_v53 = vld [vmem:[%s7386_s0 + $0x40] sm:$0xff]  ;;  %v5688_v54 = vld [vmem:[%s7386_s0 + $0x48] sm:$0xff]  ;;  %v5694_v55 = vld [vmem:[%s7386_s0 + $0x50] sm:$0xff]  ;;  %s5382_s13 = smul.u32 912, %s7400_s9 }
  0x30   : > { %v197_v10 = vld [vmem:[%s5560_s7 + $0x30] sm:$0xff]  ;;  %v191_v11 = vld [vmem:[%s5560_s7] sm:$0xff]  ;;  %v198_v12 = vld [vmem:[%s5560_s7 + $0x38] sm:$0xff] }
  0x31   : > { %3796 = vmatmul.mubr.msk.f32.vlgmr.msra.gmra.mrb[0].mxu1 %vm205_vm0, %v197_v10  ;;  %3790 = vmatmul.mubr.msk.f32.vlgmr.msra.gmra.mrb[0].mxu0 %vm205_vm0, %v191_v11  ;;  %v192_v13 = vld [vmem:[%s5560_s7 + $0x8] sm:$0xff]  ;;  %v193_v14 = vld [vmem:[%s5560_s7 + $0x10] sm:$0xff]  ;;  %v194_v15 = vld [vmem:[%s5560_s7 + $0x18] sm:$0xff]  ;;  %s6169_s14 = scalar_lea.vmem %s7389_s3, %s5382_s13 }
  0x32   : > { %336 = vmatprep.mubr.f32.mxu1 %v5488_v0  ;;  %5347 = vmatpush3.bf16.msra.mxu1 %v5344_v9  ;;  %v195_v16 = vld [vmem:[%s5560_s7 + $0x20] sm:$0xff]  ;;  %v196_v17 = vld [vmem:[%s5560_s7 + $0x28] sm:$0xff]  ;;  %v5705_v56 = vld [vmem:[%s7386_s0 + $0x58] sm:$0xff] }
  0x33   : > { %300 = vmatprep.mubr.f32.mxu0 %v5488_v0  ;;  %v5711_v57 = vld [vmem:[%s7386_s0 + $0x60] sm:$0xff]  ;;  %v5722_v58 = vld [vmem:[%s7386_s0 + $0x68] sm:$0xff]  ;;  %v5728_v59 = vld [vmem:[%s7386_s0 + $0x70] sm:$0xff] }
  0x34   : > { %v5739_v60 = vld [vmem:[%s7386_s0 + $0x78] sm:$0xff]  ;;  %v5745_v61 = vld [vmem:[%s7386_s0 + $0x80] sm:$0xff]  ;;  %v5756_v62 = vld [vmem:[%s7386_s0 + $0x88] sm:$0xff] }
  0x35   : > { %3797 = vmatmul.mubr.msk.f32.gmra.mrb[2].mxu1 %vm205_vm0, %v198_v12  ;;  %3791 = vmatmul.mubr.msk.f32.gmra.mrb[2].mxu0 %vm205_vm0, %v192_v13  ;;  %v5764_v1 = vld [vmem:[%s7386_s0 + $0x90] sm:$0xff]  ;;  %v5775_v3 = vld [vmem:[%s7386_s0 + $0x98] sm:$0xff]  ;;  %v5783_v5 = vld [vmem:[%s7386_s0 + $0xa0] sm:$0xff] }
  0x36   : > { %5084 = vmatprep.mubr.msk.f32.mxu1 %vm205_vm0, %v191_v11  ;;  %306 = vmatprep.mubr.f32.mxu0 %v5488_v0  ;;  %v5796_v9 = vld [vmem:[%s7386_s0 + $0xa8] sm:$0xff]  ;;  %v5813_v11 = vld [vmem:[%s7386_s0 + $0xb8] sm:$0xff] }
  0x39   : > { %5085 = vmatmul.mubr.msk.f32.vlgmr.msra.gmra.mrb[4].mxu1 %vm205_vm0, %v192_v13  ;;  %3792 = vmatmul.mubr.msk.f32.gmra.mrb[4].mxu0 %vm205_vm0, %v193_v14  ;;  %v5830_v13 = vld [vmem:[%s7386_s0 + $0xc8] sm:$0xff] }
  0x3a   : > { %312 = vmatprep.mubr.f32.mxu0 %v5488_v0  ;;  %5087 = vmatprep.mubr.msk.f32.mxu1 %vm205_vm0, %v193_v14  ;;  %v5836_v14 = vld [vmem:[%s7386_s0 + $0xd0] sm:$0xff] }
  0x3d   : > { %3793 = vmatmul.mubr.msk.f32.gmra.mrb[6].mxu0 %vm205_vm0, %v194_v15  ;;  %5088 = vmatmul.mubr.msk.f32.gmra.mrb[6].mxu1 %vm205_vm0, %v194_v15  ;;  %v5847_v15 = vld [vmem:[%s7386_s0 + $0xd8] sm:$0xff] }
  0x3e   : > { %5090 = vmatprep.mubr.msk.f32.mxu1 %vm205_vm0, %v195_v16  ;;  %318 = vmatprep.mubr.f32.mxu0 %v5488_v0 }
  0x41   : > { %5091 = vmatmul.mubr.msk.f32.gmra.mrb[8].mxu1 %vm205_vm0, %v196_v17  ;;  %3794 = vmatmul.mubr.msk.f32.gmra.mrb[8].mxu0 %vm205_vm0, %v195_v16  ;;  %v5853_v16 = vld [vmem:[%s7386_s0 + $0xe0] sm:$0xff] }
  0x42   : > { %324 = vmatprep.mubr.f32.mxu0 %v5488_v0  ;;  %5093 = vmatprep.mubr.msk.f32.mxu1 %vm205_vm0, %v197_v10  ;;  %v5802_v10 = vld [vmem:[%s7386_s0 + $0xb0] sm:$0xff] }
  0x45   : > { %3795 = vmatmul.mubr.msk.f32.gmra.mrb[10].mxu0 %vm205_vm0, %v196_v17  ;;  %5094 = vmatmul.mubr.msk.f32.gmra.mrb[10].mxu1 %vm205_vm0, %v198_v12  ;;  %v5819_v12 = vld [vmem:[%s7386_s0 + $0xc0] sm:$0xff]  ;;  %v5864_v17 = vld [vmem:[%s7386_s0 + $0xe8] sm:$0xff] }
  0x46   : > { %664 = vmatprep.mubr.f32.mxu1 %v5488_v0  ;;  %5100 = vmatprep.mubr.msk.f32.mxu0 %vm205_vm0, %v5596_v18 }
 0x104   : > { %v5600_v19 = vpop.f32.mrb[0].mxu1  ;;  %v296_v20 = vpop.f32.mrb[0].mxu0 }
 0x105   : > { %v5602_v21 = vpop.f32.mrb[1].mxu1  ;;  %v298_v22 = vpop.f32.mrb[1].mxu0 }
 0x108   : > { %v5604_v23 = vpop.f32.mrb[2].mxu1  ;;  %v302_v24 = vpop.f32.mrb[2].mxu0 }
 0x109   : > { %v5374_v25 = vpack.c.bf16 %v5604_v23, %v5600_v19  ;;  %v5608_v26 = vpop.f32.mrb[3].mxu1  ;;  %v5350_v27 = vpack.c.bf16 %v302_v24, %v296_v20  ;;  %v304_v28 = vpop.f32.mrb[3].mxu0  ;;  %v5870_v20 = vld [vmem:[%s7386_s0 + $0xf0] sm:$0xff]  ;;  %v5887_v24 = vld [vmem:[%s7386_s0 + $0x100] sm:$0xff] }
 0x10a   : > { %v5372_v29 = vpack.c.bf16 %v5608_v26, %v5602_v21  ;;  %v5348_v30 = vpack.c.bf16 %v304_v28, %v298_v22  ;;  %v5881_v22 = vld [vmem:[%s7386_s0 + $0xf8] sm:$0xff]  ;;  %v5904_v28 = vld [vmem:[%s7386_s0 + $0x110] sm:$0xff] }
 0x10c   : > { %v5086_v31 = vpop.f32.mrb[4].mxu1  ;;  %5349 = vmatprep.subr.bf16.mxu1 %v5348_v30  ;;  %v308_v32 = vpop.f32.mrb[4].mxu0  ;;  %v5915_v30 = vld [vmem:[%s7386_s0 + $0x118] sm:$0xff] }
 0x10d   : > { %v409_v33 = vpop.f32.mrb[5].mxu1  ;;  %5351 = vmatpush1.bf16.msra.mxu1 %v5350_v27  ;;  %v310_v34 = vpop.f32.mrb[5].mxu0  ;;  %v5898_v27 = vld [vmem:[%s7386_s0 + $0x108] sm:$0xff] }
 0x10e   : > { %v5352_v35 = vpack.c.bf16 %v5086_v31, %v409_v33  ;;  %v5921_v31 = vld [vmem:[%s7386_s0 + $0x120] sm:$0xff] }
 0x110   : > { %5353 = vmatprep.subr.bf16.mxu0 %v5352_v35  ;;  %3806 = vmatmul.mubr.msk.f32.vlgmr.msra.gmra.mrb[12].mxu1 %vm205_vm0, %v5596_v18  ;;  %v314_v36 = vpop.f32.mrb[6].mxu0  ;;  %v5089_v37 = vpop.f32.mrb[6].mxu1 }
 0x111   : > { %5355 = vmatpush3.bf16.msra.mxu0 %v5352_v35  ;;  %670 = vmatprep.mubr.f32.mxu1 %v5488_v0  ;;  %v5358_v39 = vpack.c.bf16 %v314_v36, %v308_v32  ;;  %v316_v40 = vpop.f32.mrb[7].mxu0  ;;  %v419_v41 = vpop.f32.mrb[7].mxu1  ;;  %v5932_v32 = vld [vmem:[%s7386_s0 + $0x128] sm:$0x7] }
 0x112   : > { %v5356_v43 = vpack.c.bf16 %v316_v40, %v310_v34  ;;  %v5360_v44 = vpack.c.bf16 %v5089_v37, %v419_v41 }
 0x114   : > { %5101 = vmatmul.mubr.msk.f32.vlgmr.msra.gmra.mrb[12].mxu0 %vm205_vm0, %v5617_v38  ;;  %3807 = vmatmul.mubr.msk.f32.gmra.mrb[14].mxu1 %vm205_vm0, %v5617_v38  ;;  %v5092_v45 = vpop.f32.mrb[8].mxu1  ;;  %v5759_v63 = vpop.f32.mrb[8].mxu0 }
 0x115   : > { %5103 = vmatprep.mubr.msk.f32.mxu0 %vm205_vm0, %v5623_v42  ;;  %676 = vmatprep.mubr.f32.mxu1 %v5488_v0  ;;  %v429_v47 = vpop.f32.mrb[9].mxu1  ;;  %v322_v2 = vpop.f32.mrb[9].mxu0 }
 0x116   : > { %5357 = vmatprep.subr.bf16.mxu0 %v5356_v43  ;;  %5361 = vmatprep.subr.bf16.mxu1 %v5360_v44  ;;  %v5642_v49 = vpack.c.bf16 %v5092_v45, %v429_v47 }
 0x117   : > { %5359 = vmatpush1.bf16.msra.mxu0 %v5358_v39  ;;  %5363 = vmatpush3.bf16.msra.mxu1 %v5360_v44 }
 0x118   : > { %5104 = vmatmul.mubr.msk.f32.gmra.mrb[14].mxu0 %vm205_vm0, %v5634_v46  ;;  %3808 = vmatmul.mubr.msk.f32.gmra.mrb[16].mxu1 %vm205_vm0, %v5623_v42  ;;  %v5778_v4 = vpop.f32.mrb[10].mxu0  ;;  %v5095_v33 = vpop.f32.mrb[10].mxu1 }
 0x119   : > { %5106 = vmatprep.mubr.msk.f32.mxu0 %vm205_vm0, %v5640_v48  ;;  %682 = vmatprep.mubr.f32.mxu1 %v5488_v0  ;;  %v5366_v6 = vpack.c.bf16 %v5778_v4, %v5759_v63  ;;  %v328_v7 = vpop.f32.mrb[11].mxu0  ;;  %v439_v34 = vpop.f32.mrb[11].mxu1 }
 0x11a   : > { %5369 = vmatprep.subr.bf16.mxu0 %v5642_v49  ;;  %v5364_v8 = vpack.c.bf16 %v328_v7, %v322_v2  ;;  %v5957_v35 = vpack.c.bf16 %v5095_v33, %v439_v34 }
 0x11c   : > { %5107 = vmatmul.mubr.msk.f32.gmra.mrb[16].mxu0 %vm205_vm0, %v5653_v50  ;;  %3809 = vmatmul.mubr.msk.f32.gmra.mrb[18].mxu1 %vm205_vm0, %v5634_v46 }
 0x11d   : > { %5109 = vmatprep.mubr.msk.f32.mxu0 %vm205_vm0, %v5659_v51  ;;  %688 = vmatprep.mubr.f32.mxu1 %v5488_v0 }
 0x11e   : > { %5365 = vmatprep.subr.bf16.mxu1 %v5364_v8 }
 0x120   : > { %5110 = vmatmul.mubr.msk.f32.gmra.mrb[18].mxu0 %vm205_vm0, %v5671_v52  ;;  %3810 = vmatmul.mubr.msk.f32.gmra.mrb[20].mxu1 %vm205_vm0, %v5640_v48 }
 0x121   : > { %5112 = vmatprep.mubr.msk.f32.mxu0 %vm205_vm0, %v5677_v53  ;;  %694 = vmatprep.mubr.f32.mxu1 %v5488_v0 }
 0x124   : > { %5113 = vmatmul.mubr.msk.f32.gmra.mrb[20].mxu0 %vm205_vm0, %v5688_v54  ;;  %3811 = vmatmul.mubr.msk.f32.gmra.mrb[22].mxu1 %vm205_vm0, %v5653_v50 }
 0x125   : > { %5115 = vmatprep.mubr.msk.f32.mxu0 %vm205_vm0, %v5694_v55  ;;  %700 = vmatprep.mubr.f32.mxu1 %v5488_v0 }
 0x128   : > { %5116 = vmatmul.mubr.msk.f32.gmra.mrb[22].mxu0 %vm205_vm0, %v5705_v56  ;;  %3812 = vmatmul.mubr.msk.f32.gmra.mrb[24].mxu1 %vm205_vm0, %v5659_v51 }
 0x129   : > { %5118 = vmatprep.mubr.msk.f32.mxu0 %vm205_vm0, %v5711_v57  ;;  %706 = vmatprep.mubr.f32.mxu1 %v5488_v0 }
 0x12c   : > { %5119 = vmatmul.mubr.msk.f32.gmra.mrb[24].mxu0 %vm205_vm0, %v5722_v58  ;;  %3813 = vmatmul.mubr.msk.f32.gmra.mrb[26].mxu1 %vm205_vm0, %v5671_v52 }
 0x12d   : > { %5121 = vmatprep.mubr.msk.f32.mxu0 %vm205_vm0, %v5728_v59  ;;  %712 = vmatprep.mubr.f32.mxu1 %v5488_v0 }
 0x130   : > { %5122 = vmatmul.mubr.msk.f32.gmra.mrb[26].mxu0 %vm205_vm0, %v5739_v60  ;;  %3814 = vmatmul.mubr.msk.f32.gmra.mrb[28].mxu1 %vm205_vm0, %v5677_v53 }
 0x131   : > { %5124 = vmatprep.mubr.msk.f32.mxu0 %vm205_vm0, %v5745_v61  ;;  %718 = vmatprep.mubr.f32.mxu1 %v5488_v0 }
 0x134   : > { %5125 = vmatmul.mubr.msk.f32.gmra.mrb[28].mxu0 %vm205_vm0, %v5756_v62  ;;  %3815 = vmatmul.mubr.msk.f32.gmra.mrb[30].mxu1 %vm205_vm0, %v5688_v54 }
 0x135   : > { %5127 = vmatprep.mubr.msk.f32.mxu0 %vm205_vm0, %v5764_v1  ;;  %724 = vmatprep.mubr.f32.mxu1 %v5488_v0 }
 0x138   : > { %5128 = vmatmul.mubr.msk.f32.gmra.mrb[30].mxu0 %vm205_vm0, %v5775_v3  ;;  %3816 = vmatmul.mubr.msk.f32.gmra.mrb[32].mxu1 %vm205_vm0, %v5694_v55 }
 0x139   : > { %5130 = vmatprep.mubr.msk.f32.mxu0 %vm205_vm0, %v5783_v5  ;;  %730 = vmatprep.mubr.f32.mxu1 %v5488_v0 }
 0x13c   : > { %5131 = vmatmul.mubr.msk.f32.gmra.mrb[32].mxu0 %vm205_vm0, %v5796_v9  ;;  %3817 = vmatmul.mubr.msk.f32.gmra.mrb[34].mxu1 %vm205_vm0, %v5705_v56 }
 0x13d   : > { %5133 = vmatprep.mubr.msk.f32.mxu0 %vm205_vm0, %v5802_v10  ;;  %736 = vmatprep.mubr.f32.mxu1 %v5488_v0 }
 0x140   : > { %5134 = vmatmul.mubr.msk.f32.gmra.mrb[34].mxu0 %vm205_vm0, %v5813_v11  ;;  %3818 = vmatmul.mubr.msk.f32.gmra.mrb[36].mxu1 %vm205_vm0, %v5711_v57 }
 0x141   : > { %5136 = vmatprep.mubr.msk.f32.mxu0 %vm205_vm0, %v5819_v12  ;;  %742 = vmatprep.mubr.f32.mxu1 %v5488_v0 }
 0x144   : > { %5137 = vmatmul.mubr.msk.f32.gmra.mrb[36].mxu0 %vm205_vm0, %v5830_v13  ;;  %3819 = vmatmul.mubr.msk.f32.gmra.mrb[38].mxu1 %vm205_vm0, %v5722_v58 }
 0x145   : > { %5139 = vmatprep.mubr.msk.f32.mxu0 %vm205_vm0, %v5836_v14  ;;  %748 = vmatprep.mubr.f32.mxu1 %v5488_v0 }
 0x148   : > { %5140 = vmatmul.mubr.msk.f32.gmra.mrb[38].mxu0 %vm205_vm0, %v5847_v15  ;;  %3820 = vmatmul.mubr.msk.f32.gmra.mrb[40].mxu1 %vm205_vm0, %v5728_v59 }
 0x149   : > { %5142 = vmatprep.mubr.msk.f32.mxu0 %vm205_vm0, %v5853_v16  ;;  %754 = vmatprep.mubr.f32.mxu1 %v5488_v0 }
 0x14c   : > { %5143 = vmatmul.mubr.msk.f32.gmra.mrb[40].mxu0 %vm205_vm0, %v5864_v17  ;;  %3821 = vmatmul.mubr.msk.f32.gmra.mrb[42].mxu1 %vm205_vm0, %v5739_v60 }
 0x14d   : > { %5145 = vmatprep.mubr.msk.f32.mxu0 %vm205_vm0, %v5870_v20  ;;  %760 = vmatprep.mubr.f32.mxu1 %v5488_v0 }
 0x150   : > { %5146 = vmatmul.mubr.msk.f32.gmra.mrb[42].mxu0 %vm205_vm0, %v5881_v22  ;;  %3822 = vmatmul.mubr.msk.f32.gmra.mrb[44].mxu1 %vm205_vm0, %v5745_v61 }
 0x151   : > { %5148 = vmatprep.mubr.msk.f32.mxu0 %vm205_vm0, %v5887_v24  ;;  %766 = vmatprep.mubr.f32.mxu1 %v5488_v0 }
 0x154   : > { %5149 = vmatmul.mubr.msk.f32.gmra.mrb[44].mxu0 %vm205_vm0, %v5898_v27  ;;  %3823 = vmatmul.mubr.msk.f32.gmra.mrb[46].mxu1 %vm205_vm0, %v5756_v62 }
 0x155   : > { %5151 = vmatprep.mubr.msk.f32.mxu0 %vm205_vm0, %v5904_v28  ;;  %772 = vmatprep.mubr.f32.mxu1 %v5488_v0 }
 0x158   : > { %5152 = vmatmul.mubr.msk.f32.gmra.mrb[46].mxu0 %vm205_vm0, %v5915_v30  ;;  %3824 = vmatmul.mubr.msk.f32.gmra.mrb[48].mxu1 %vm205_vm0, %v5764_v1 }
 0x159   : > { %5154 = vmatprep.mubr.msk.f32.mxu0 %vm205_vm0, %v5921_v31  ;;  %778 = vmatprep.mubr.f32.mxu1 %v5488_v0 }
 0x15c   : > { %5155 = vmatmul.mubr.msk.f32.gmra.mrb[48].mxu0 %vm205_vm0, %v5932_v32  ;;  %3825 = vmatmul.mubr.msk.f32.gmra.mrb[50].mxu1 %vm205_vm0, %v5775_v3 }
 0x15d   : > { %1442 = vmatprep.mubr.f32.mxu0 %v5488_v0  ;;  %784 = vmatprep.mubr.f32.mxu1 %v5488_v0 }
 0x160   : > { %3996 = vmatmul.mubr.msk.f32.vlgmr.msra.gmra.mrb[50].mxu0 %vm205_vm0, %v5596_v18  ;;  %3826 = vmatmul.mubr.msk.f32.gmra.mrb[52].mxu1 %vm205_vm0, %v5783_v5 }
 0x161   : > { %5371 = vmatpush3.bf16.msra.mxu0 %v5642_v49  ;;  %1448 = vmatprep.mubr.f32.mxu0 %v5488_v0 }
 0x162   : > { %5373 = vmatprep.subr.bf16.mxu0 %v5372_v29  ;;  %790 = vmatprep.mubr.f32.mxu1 %v5488_v0 }
 0x164   : > { %3997 = vmatmul.mubr.msk.f32.gmra.mrb[52].mxu0 %vm205_vm0, %v5617_v38  ;;  %3827 = vmatmul.mubr.msk.f32.gmra.mrb[54].mxu1 %vm205_vm0, %v5796_v9 }
 0x165   : > { %1454 = vmatprep.mubr.f32.mxu0 %v5488_v0  ;;  %796 = vmatprep.mubr.f32.mxu1 %v5488_v0 }
 0x168   : > { %3998 = vmatmul.mubr.msk.f32.gmra.mrb[54].mxu0 %vm205_vm0, %v5623_v42  ;;  %3828 = vmatmul.mubr.msk.f32.gmra.mrb[56].mxu1 %vm205_vm0, %v5802_v10 }
 0x169   : > { %1460 = vmatprep.mubr.f32.mxu0 %v5488_v0  ;;  %802 = vmatprep.mubr.f32.mxu1 %v5488_v0 }
 0x16c   : > { %3999 = vmatmul.mubr.msk.f32.gmra.mrb[56].mxu0 %vm205_vm0, %v5634_v46  ;;  %3829 = vmatmul.mubr.msk.f32.gmra.mrb[58].mxu1 %vm205_vm0, %v5813_v11 }
 0x16d   : > { %1466 = vmatprep.mubr.f32.mxu0 %v5488_v0  ;;  %808 = vmatprep.mubr.f32.mxu1 %v5488_v0 }
 0x170   : > { %4000 = vmatmul.mubr.msk.f32.gmra.mrb[58].mxu0 %vm205_vm0, %v5640_v48  ;;  %3830 = vmatmul.mubr.msk.f32.gmra.mrb[60].mxu1 %vm205_vm0, %v5819_v12 }
 0x171   : > { %1472 = vmatprep.mubr.f32.mxu0 %v5488_v0  ;;  %814 = vmatprep.mubr.f32.mxu1 %v5488_v0 }
 0x174   : > { %4001 = vmatmul.mubr.msk.f32.gmra.mrb[60].mxu0 %vm205_vm0, %v5653_v50  ;;  %3831 = vmatmul.mubr.msk.f32.gmra.mrb[62].mxu1 %vm205_vm0, %v5830_v13 }
 0x175   : > { %1478 = vmatprep.mubr.f32.mxu0 %v5488_v0  ;;  %820 = vmatprep.mubr.f32.mxu1 %v5488_v0 }
 0x178   : > { %4002 = vmatmul.mubr.msk.f32.gmra.mrb[62].mxu0 %vm205_vm0, %v5659_v51  ;;  %3832 = vmatmul.mubr.msk.f32.gmra.mrb[64].mxu1 %vm205_vm0, %v5836_v14 }
 0x179   : > { %1484 = vmatprep.mubr.f32.mxu0 %v5488_v0  ;;  %826 = vmatprep.mubr.f32.mxu1 %v5488_v0 }
 0x17c   : > { %4003 = vmatmul.mubr.msk.f32.gmra.mrb[64].mxu0 %vm205_vm0, %v5671_v52  ;;  %3833 = vmatmul.mubr.msk.f32.gmra.mrb[66].mxu1 %vm205_vm0, %v5847_v15 }
 0x17d   : > { %1490 = vmatprep.mubr.f32.mxu0 %v5488_v0  ;;  %832 = vmatprep.mubr.f32.mxu1 %v5488_v0 }
 0x180   : > { %4004 = vmatmul.mubr.msk.f32.gmra.mrb[66].mxu0 %vm205_vm0, %v5677_v53  ;;  %3834 = vmatmul.mubr.msk.f32.gmra.mrb[68].mxu1 %vm205_vm0, %v5853_v16 }
 0x181   : > { %1496 = vmatprep.mubr.f32.mxu0 %v5488_v0  ;;  %838 = vmatprep.mubr.f32.mxu1 %v5488_v0 }
 0x184   : > { %4005 = vmatmul.mubr.msk.f32.gmra.mrb[68].mxu0 %vm205_vm0, %v5688_v54  ;;  %3835 = vmatmul.mubr.msk.f32.gmra.mrb[70].mxu1 %vm205_vm0, %v5864_v17 }
 0x185   : > { %1502 = vmatprep.mubr.f32.mxu0 %v5488_v0  ;;  %844 = vmatprep.mubr.f32.mxu1 %v5488_v0 }
 0x188   : > { %4006 = vmatmul.mubr.msk.f32.gmra.mrb[70].mxu0 %vm205_vm0, %v5694_v55  ;;  %3836 = vmatmul.mubr.msk.f32.gmra.mrb[72].mxu1 %vm205_vm0, %v5870_v20 }
 0x189   : > { %1508 = vmatprep.mubr.f32.mxu0 %v5488_v0  ;;  %850 = vmatprep.mubr.f32.mxu1 %v5488_v0 }
 0x18c   : > { %4007 = vmatmul.mubr.msk.f32.gmra.mrb[72].mxu0 %vm205_vm0, %v5705_v56  ;;  %3837 = vmatmul.mubr.msk.f32.gmra.mrb[74].mxu1 %vm205_vm0, %v5881_v22 }
 0x18d   : > { %1514 = vmatprep.mubr.f32.mxu0 %v5488_v0  ;;  %856 = vmatprep.mubr.f32.mxu1 %v5488_v0 }
 0x190   : > { %4008 = vmatmul.mubr.msk.f32.gmra.mrb[74].mxu0 %vm205_vm0, %v5711_v57  ;;  %3838 = vmatmul.mubr.msk.f32.gmra.mrb[76].mxu1 %vm205_vm0, %v5887_v24 }
 0x191   : > { %1520 = vmatprep.mubr.f32.mxu0 %v5488_v0  ;;  %862 = vmatprep.mubr.f32.mxu1 %v5488_v0 }
 0x194   : > { %4009 = vmatmul.mubr.msk.f32.gmra.mrb[76].mxu0 %vm205_vm0, %v5722_v58  ;;  %3839 = vmatmul.mubr.msk.f32.gmra.mrb[78].mxu1 %vm205_vm0, %v5898_v27 }
 0x195   : > { %1526 = vmatprep.mubr.f32.mxu0 %v5488_v0  ;;  %868 = vmatprep.mubr.f32.mxu1 %v5488_v0 }
 0x198   : > { %4010 = vmatmul.mubr.msk.f32.gmra.mrb[78].mxu0 %vm205_vm0, %v5728_v59  ;;  %3840 = vmatmul.mubr.msk.f32.gmra.mrb[80].mxu1 %vm205_vm0, %v5904_v28 }
 0x199   : > { %1532 = vmatprep.mubr.f32.mxu0 %v5488_v0  ;;  %874 = vmatprep.mubr.f32.mxu1 %v5488_v0 }
 0x19c   : > { %4011 = vmatmul.mubr.msk.f32.gmra.mrb[80].mxu0 %vm205_vm0, %v5739_v60  ;;  %3841 = vmatmul.mubr.msk.f32.gmra.mrb[82].mxu1 %vm205_vm0, %v5915_v30 }
 0x19d   : > { %1538 = vmatprep.mubr.f32.mxu0 %v5488_v0  ;;  %880 = vmatprep.mubr.f32.mxu1 %v5488_v0 }
 0x1a0   : > { %4012 = vmatmul.mubr.msk.f32.gmra.mrb[82].mxu0 %vm205_vm0, %v5745_v61  ;;  %3842 = vmatmul.mubr.msk.f32.gmra.mrb[84].mxu1 %vm205_vm0, %v5921_v31 }
 0x1a1   : > { %1544 = vmatprep.mubr.f32.mxu0 %v5488_v0  ;;  %886 = vmatprep.mubr.f32.mxu1 %v5488_v0 }
 0x1a4   : > { %4013 = vmatmul.mubr.msk.f32.gmra.mrb[84].mxu0 %vm205_vm0, %v5756_v62  ;;  %3843 = vmatmul.mubr.msk.f32.gmra.mrb[86].mxu1 %vm205_vm0, %v5932_v32 }
 0x1a5   : > { %1550 = vmatprep.mubr.f32.mxu0 %v5488_v0  ;;  %5161 = vmatprep.mubr.msk.f32.mxu1 %vm205_vm0, %v5596_v18 }
 0x1a8   : > { %4014 = vmatmul.mubr.msk.f32.gmra.mrb[86].mxu0 %vm205_vm0, %v5764_v1  ;;  %5162 = vmatmul.mubr.msk.f32.vlgmr.msra.gmra.mrb[88].mxu1 %vm205_vm0, %v5617_v38 }
 0x1a9   : > { %1556 = vmatprep.mubr.f32.mxu0 %v5488_v0  ;;  %5164 = vmatprep.mubr.msk.f32.mxu1 %vm205_vm0, %v5623_v42 }
 0x1aa   : > { %5367 = vmatpush1.bf16.msra.mxu1 %v5366_v6 }
 0x1ab   : > { %5377 = vmatprep.subr.bf16.mxu1 %v5957_v35 }
 0x1ac   : > { %4015 = vmatmul.mubr.msk.f32.gmra.mrb[88].mxu0 %vm205_vm0, %v5775_v3  ;;  %5165 = vmatmul.mubr.msk.f32.gmra.mrb[90].mxu1 %vm205_vm0, %v5634_v46 }
 0x1ad   : > { %1562 = vmatprep.mubr.f32.mxu0 %v5488_v0  ;;  %5167 = vmatprep.mubr.msk.f32.mxu1 %vm205_vm0, %v5640_v48 }
 0x1b0   : > { %4016 = vmatmul.mubr.msk.f32.gmra.mrb[90].mxu0 %vm205_vm0, %v5783_v5  ;;  %5168 = vmatmul.mubr.msk.f32.gmra.mrb[92].mxu1 %vm205_vm0, %v5653_v50 }
 0x1b1   : > { %1568 = vmatprep.mubr.f32.mxu0 %v5488_v0  ;;  %5170 = vmatprep.mubr.msk.f32.mxu1 %vm205_vm0, %v5659_v51 }
 0x1b4   : > { %4017 = vmatmul.mubr.msk.f32.gmra.mrb[92].mxu0 %vm205_vm0, %v5796_v9  ;;  %5171 = vmatmul.mubr.msk.f32.gmra.mrb[94].mxu1 %vm205_vm0, %v5671_v52 }
 0x1b5   : > { %1574 = vmatprep.mubr.f32.mxu0 %v5488_v0  ;;  %5173 = vmatprep.mubr.msk.f32.mxu1 %vm205_vm0, %v5677_v53 }
 0x1b8   : > { %4018 = vmatmul.mubr.msk.f32.gmra.mrb[94].mxu0 %vm205_vm0, %v5802_v10  ;;  %5174 = vmatmul.mubr.msk.f32.gmra.mrb[96].mxu1 %vm205_vm0, %v5688_v54 }
 0x1b9   : > { %1580 = vmatprep.mubr.f32.mxu0 %v5488_v0  ;;  %5176 = vmatprep.mubr.msk.f32.mxu1 %vm205_vm0, %v5694_v55 }
 0x1bc   : > { %4019 = vmatmul.mubr.msk.f32.gmra.mrb[96].mxu0 %vm205_vm0, %v5813_v11  ;;  %5177 = vmatmul.mubr.msk.f32.gmra.mrb[98].mxu1 %vm205_vm0, %v5705_v56 }
 0x1bd   : > { %1586 = vmatprep.mubr.f32.mxu0 %v5488_v0  ;;  %5179 = vmatprep.mubr.msk.f32.mxu1 %vm205_vm0, %v5711_v57 }
 0x1c0   : > { %4020 = vmatmul.mubr.msk.f32.gmra.mrb[98].mxu0 %vm205_vm0, %v5819_v12  ;;  %5180 = vmatmul.mubr.msk.f32.gmra.mrb[100].mxu1 %vm205_vm0, %v5722_v58 }
 0x1c1   : > { %1592 = vmatprep.mubr.f32.mxu0 %v5488_v0  ;;  %5182 = vmatprep.mubr.msk.f32.mxu1 %vm205_vm0, %v5728_v59 }
 0x1c4   : > { %4021 = vmatmul.mubr.msk.f32.gmra.mrb[100].mxu0 %vm205_vm0, %v5830_v13  ;;  %5183 = vmatmul.mubr.msk.f32.gmra.mrb[102].mxu1 %vm205_vm0, %v5739_v60 }
 0x1c5   : > { %1598 = vmatprep.mubr.f32.mxu0 %v5488_v0  ;;  %5185 = vmatprep.mubr.msk.f32.mxu1 %vm205_vm0, %v5745_v61 }
 0x1c8   : > { %4022 = vmatmul.mubr.msk.f32.gmra.mrb[102].mxu0 %vm205_vm0, %v5836_v14  ;;  %5186 = vmatmul.mubr.msk.f32.gmra.mrb[104].mxu1 %vm205_vm0, %v5756_v62 }
 0x1c9   : > { %1604 = vmatprep.mubr.f32.mxu0 %v5488_v0  ;;  %5188 = vmatprep.mubr.msk.f32.mxu1 %vm205_vm0, %v5764_v1 }
 0x1cc   : > { %4023 = vmatmul.mubr.msk.f32.gmra.mrb[104].mxu0 %vm205_vm0, %v5847_v15  ;;  %5189 = vmatmul.mubr.msk.f32.gmra.mrb[106].mxu1 %vm205_vm0, %v5775_v3 }
 0x1cd   : > { %1610 = vmatprep.mubr.f32.mxu0 %v5488_v0  ;;  %5191 = vmatprep.mubr.msk.f32.mxu1 %vm205_vm0, %v5783_v5 }
 0x1d0   : > { %4024 = vmatmul.mubr.msk.f32.gmra.mrb[106].mxu0 %vm205_vm0, %v5853_v16  ;;  %5192 = vmatmul.mubr.msk.f32.gmra.mrb[108].mxu1 %vm205_vm0, %v5796_v9 }
 0x1d1   : > { %1616 = vmatprep.mubr.f32.mxu0 %v5488_v0  ;;  %5194 = vmatprep.mubr.msk.f32.mxu1 %vm205_vm0, %v5802_v10 }
 0x1d4   : > { %4025 = vmatmul.mubr.msk.f32.gmra.mrb[108].mxu0 %vm205_vm0, %v5864_v17  ;;  %5195 = vmatmul.mubr.msk.f32.gmra.mrb[110].mxu1 %vm205_vm0, %v5813_v11 }
 0x1d5   : > { %1622 = vmatprep.mubr.f32.mxu0 %v5488_v0  ;;  %5197 = vmatprep.mubr.msk.f32.mxu1 %vm205_vm0, %v5819_v12 }
 0x1d8   : > { %4026 = vmatmul.mubr.msk.f32.gmra.mrb[110].mxu0 %vm205_vm0, %v5870_v20  ;;  %5198 = vmatmul.mubr.msk.f32.gmra.mrb[112].mxu1 %vm205_vm0, %v5830_v13 }
 0x1d9   : > { %1628 = vmatprep.mubr.f32.mxu0 %v5488_v0  ;;  %5200 = vmatprep.mubr.msk.f32.mxu1 %vm205_vm0, %v5836_v14 }
 0x1dc   : > { %4027 = vmatmul.mubr.msk.f32.gmra.mrb[112].mxu0 %vm205_vm0, %v5881_v22  ;;  %5201 = vmatmul.mubr.msk.f32.gmra.mrb[114].mxu1 %vm205_vm0, %v5847_v15 }
 0x1dd   : > { %1634 = vmatprep.mubr.f32.mxu0 %v5488_v0  ;;  %5203 = vmatprep.mubr.msk.f32.mxu1 %vm205_vm0, %v5853_v16 }
 0x1e0   : > { %4028 = vmatmul.mubr.msk.f32.gmra.mrb[114].mxu0 %vm205_vm0, %v5887_v24  ;;  %5204 = vmatmul.mubr.msk.f32.gmra.mrb[116].mxu1 %vm205_vm0, %v5864_v17 }
 0x1e1   : > { %1640 = vmatprep.mubr.f32.mxu0 %v5488_v0  ;;  %5206 = vmatprep.mubr.msk.f32.mxu1 %vm205_vm0, %v5870_v20 }
 0x1e3   : > { %v666_v21 = vpop.f32.mrb[12].mxu1 }
 0x1e4   : > { %4029 = vmatmul.mubr.msk.f32.gmra.mrb[116].mxu0 %vm205_vm0, %v5898_v27  ;;  %5207 = vmatmul.mubr.msk.f32.gmra.mrb[118].mxu1 %vm205_vm0, %v5881_v22  ;;  %v3882_v26 = vadd.f32 -1.0, %v666_v21  ;;  %v668_v29 = vpop.f32.mrb[13].mxu1 }
 0x1e5   : > { %1646 = vmatprep.mubr.f32.mxu0 %v5488_v0  ;;  %5209 = vmatprep.mubr.msk.f32.mxu1 %vm205_vm0, %v5887_v24  ;;  %v3883_v36 = vadd.f32 -1.0, %v668_v29 }
 0x1e6   : > { %1262 = vst [vmem:[%s6169_s14] sm:$0xff] %v3882_v26 }
 0x1e7   : > { %v5102_v37 = vpop.f32.mrb[12].mxu0  ;;  %1263 = vst [vmem:[%s6169_s14 + $0x8] sm:$0xff] %v3883_v36  ;;  %v672_v39 = vpop.f32.mrb[14].mxu1 }
 0x1e8   : > { %4030 = vmatmul.mubr.msk.f32.gmra.mrb[118].mxu0 %vm205_vm0, %v5904_v28  ;;  %5210 = vmatmul.mubr.msk.f32.gmra.mrb[120].mxu1 %vm205_vm0, %v5898_v27  ;;  %v3887_v40 = vadd.f32 -1.0, %v5102_v37  ;;  %v959_v41 = vpop.f32.mrb[13].mxu0  ;;  %v3885_v43 = vadd.f32 -1.0, %v672_v39  ;;  %v674_v44 = vpop.f32.mrb[15].mxu1 }
 0x1e9   : > { %1652 = vmatprep.mubr.f32.mxu0 %v5488_v0  ;;  %5212 = vmatprep.mubr.msk.f32.mxu1 %vm205_vm0, %v5904_v28  ;;  %v3884_v45 = vadd.f32 -1.0, %v959_v41  ;;  %v3886_v47 = vadd.f32 -1.0, %v674_v44 }
 0x1ea   : > { %1268 = vst.msk [vmem:[%s6169_s14 + $0x28] sm:$0xff] %vm1264_vm1, %v3887_v40  ;;  %1266 = vst [vmem:[%s6169_s14 + $0x18] sm:$0xff] %v3885_v43 }
 0x1eb   : > { %1265 = vst.msk [vmem:[%s6169_s14 + $0x10] sm:$0xff] %vm1264_vm1, %v3884_v45  ;;  %v5105_v49 = vpop.f32.mrb[14].mxu0  ;;  %1267 = vst [vmem:[%s6169_s14 + $0x20] sm:$0xff] %v3886_v47  ;;  %v678_v63 = vpop.f32.mrb[16].mxu1 }
 0x1ec   : > { %4031 = vmatmul.mubr.msk.f32.gmra.mrb[120].mxu0 %vm205_vm0, %v5915_v30  ;;  %5213 = vmatmul.mubr.msk.f32.gmra.mrb[122].mxu1 %vm205_vm0, %v5915_v30  ;;  %v3893_v2 = vadd.f32 -1.0, %v5105_v49  ;;  %v969_v4 = vpop.f32.mrb[15].mxu0  ;;  %v3888_v6 = vadd.f32 -1.0, %v678_v63  ;;  %v680_v7 = vpop.f32.mrb[17].mxu1 }
 0x1ed   : > { %1658 = vmatprep.mubr.f32.mxu0 %v5488_v0  ;;  %5215 = vmatprep.mubr.msk.f32.mxu1 %vm205_vm0, %v5921_v31  ;;  %v3890_v8 = vadd.f32 -1.0, %v969_v4  ;;  %v3889_v33 = vadd.f32 -1.0, %v680_v7 }
 0x1ee   : > { %1274 = vst.msk [vmem:[%s6169_s14 + $0x58] sm:$0xff] %vm1264_vm1, %v3893_v2  ;;  %1269 = vst [vmem:[%s6169_s14 + $0x30] sm:$0xff] %v3888_v6 }
 0x1ef   : > { %1271 = vst.msk [vmem:[%s6169_s14 + $0x40] sm:$0xff] %vm1264_vm1, %v3890_v8  ;;  %v5108_v34 = vpop.f32.mrb[16].mxu0  ;;  %1270 = vst [vmem:[%s6169_s14 + $0x38] sm:$0xff] %v3889_v33  ;;  %v684_v21 = vpop.f32.mrb[18].mxu1 }
 0x1f0   : > { %4032 = vmatmul.mubr.msk.f32.gmra.mrb[122].mxu0 %vm205_vm0, %v5921_v31  ;;  %5216 = vmatmul.mubr.msk.f32.gmra.mrb[124].mxu1 %vm205_vm0, %v5932_v32  ;;  %v3899_v26 = vadd.f32 -1.0, %v5108_v34  ;;  %v979_v29 = vpop.f32.mrb[17].mxu0  ;;  %v3891_v36 = vadd.f32 -1.0, %v684_v21  ;;  %v686_v37 = vpop.f32.mrb[19].mxu1 }
 0x1f1   : > { %1664 = vmatprep.mubr.f32.mxu0 %v5488_v0  ;;  %2219 = vmatprep.mubr.f32.mxu1 %v5488_v0  ;;  %v3896_v39 = vadd.f32 -1.0, %v979_v29  ;;  %v3892_v40 = vadd.f32 -1.0, %v686_v37 }
 0x1f2   : > { %1280 = vst.msk [vmem:[%s6169_s14 + $0x88] sm:$0xff] %vm1264_vm1, %v3899_v26  ;;  %1272 = vst [vmem:[%s6169_s14 + $0x48] sm:$0xff] %v3891_v36 }
 0x1f3   : > { %1277 = vst.msk [vmem:[%s6169_s14 + $0x70] sm:$0xff] %vm1264_vm1, %v3896_v39  ;;  %v5111_v31 = vpop.f32.mrb[18].mxu0  ;;  %1273 = vst [vmem:[%s6169_s14 + $0x50] sm:$0xff] %v3892_v40  ;;  %v690_v41 = vpop.f32.mrb[20].mxu1 }
 0x1f4   : > { %4033 = vmatmul.mubr.msk.f32.gmra.mrb[124].mxu0 %vm205_vm0, %v5932_v32  ;;  %4300 = vmatmul.mubr.msk.f32.vlgmr.msra.gmra.mrb[126].mxu1 %vm205_vm0, %v5596_v18  ;;  %v3905_v43 = vadd.f32 -1.0, %v5111_v31  ;;  %v989_v44 = vpop.f32.mrb[19].mxu0  ;;  %v3894_v45 = vadd.f32 -1.0, %v690_v41  ;;  %v692_v47 = vpop.f32.mrb[21].mxu1 }
 0x1f5   : > { %5222 = vmatprep.mubr.msk.f32.mxu0 %vm205_vm0, %v5596_v18  ;;  %5379 = vmatpush3.bf16.msra.mxu1 %v5957_v35  ;;  %v3902_v49 = vadd.f32 -1.0, %v989_v44  ;;  %v3895_v63 = vadd.f32 -1.0, %v692_v47 }
 0x1f6   : > { %1286 = vst.msk [vmem:[%s6169_s14 + $0xb8] sm:$0xff] %vm1264_vm1, %v3905_v43  ;;  %1275 = vst [vmem:[%s6169_s14 + $0x60] sm:$0xff] %v3894_v45  ;;  %2225 = vmatprep.mubr.f32.mxu1 %v5488_v0 }
 0x1f7   : > { %1283 = vst.msk [vmem:[%s6169_s14 + $0xa0] sm:$0xff] %vm1264_vm1, %v3902_v49  ;;  %v5114_v32 = vpop.f32.mrb[20].mxu0  ;;  %1276 = vst [vmem:[%s6169_s14 + $0x68] sm:$0xff] %v3895_v63  ;;  %v696_v2 = vpop.f32.mrb[22].mxu1 }
 0x1f8   : > { %5223 = vmatmul.mubr.msk.f32.vlgmr.msra.gmra.mrb[126].mxu0 %vm205_vm0, %v5617_v38  ;;  %v3911_v18 = vadd.f32 -1.0, %v5114_v32  ;;  %v999_v35 = vpop.f32.mrb[21].mxu0  ;;  %v3897_v4 = vadd.f32 -1.0, %v696_v2  ;;  %v698_v6 = vpop.f32.mrb[23].mxu1  ;;  %4301 = vmatmul.mubr.msk.f32.gmra.mrb[128].mxu1 %vm205_vm0, %v5617_v38 }
 0x1f9   : > { %5375 = vmatpush1.bf16.msra.mxu0 %v5374_v25  ;;  %v3908_v7 = vadd.f32 -1.0, %v999_v35  ;;  %5225 = vmatprep.mubr.msk.f32.mxu0 %vm205_vm0, %v5623_v42  ;;  %v3898_v8 = vadd.f32 -1.0, %v698_v6 }
 0x1fa   : > { %1292 = vst.msk [vmem:[%s6169_s14 + $0xe8] sm:$0xff] %vm1264_vm1, %v3911_v18  ;;  %1278 = vst [vmem:[%s6169_s14 + $0x78] sm:$0xff] %v3897_v4  ;;  %2231 = vmatprep.mubr.f32.mxu1 %v5488_v0 }
 0x1fb   : > { %1289 = vst.msk [vmem:[%s6169_s14 + $0xd0] sm:$0xff] %vm1264_vm1, %v3908_v7  ;;  %v5117_v38 = vpop.f32.mrb[22].mxu0  ;;  %1279 = vst [vmem:[%s6169_s14 + $0x80] sm:$0xff] %v3898_v8  ;;  %v702_v19 = vpop.f32.mrb[24].mxu1 }
 0x1fc   : > { %v3917_v23 = vadd.f32 -1.0, %v5117_v38  ;;  %v1009_v25 = vpop.f32.mrb[23].mxu0  ;;  %5226 = vmatmul.mubr.msk.f32.gmra.mrb[128].mxu0 %vm205_vm0, %v5634_v46  ;;  %v3900_v33 = vadd.f32 -1.0, %v702_v19  ;;  %v704_v34 = vpop.f32.mrb[25].mxu1  ;;  %4302 = vmatmul.mubr.msk.f32.gmra.mrb[130].mxu1 %vm205_vm0, %v5623_v42 }
 0x1fd   : > { %v3914_v21 = vadd.f32 -1.0, %v1009_v25  ;;  %5228 = vmatprep.mubr.msk.f32.mxu0 %vm205_vm0, %v5640_v48  ;;  %v3901_v26 = vadd.f32 -1.0, %v704_v34  ;;  %2237 = vmatprep.mubr.f32.mxu1 %v5488_v0 }
 0x1fe   : > { %1298 = vst.msk [vmem:[%s6169_s14 + $0x118] sm:$0xff] %vm1264_vm1, %v3917_v23  ;;  %1281 = vst [vmem:[%s6169_s14 + $0x90] sm:$0xff] %v3900_v33 }
 0x1ff   : > { %1295 = vst.msk [vmem:[%s6169_s14 + $0x100] sm:$0xff] %vm1264_vm1, %v3914_v21  ;;  %v5120_v29 = vpop.f32.mrb[24].mxu0  ;;  %1282 = vst [vmem:[%s6169_s14 + $0x98] sm:$0xff] %v3901_v26  ;;  %v708_v36 = vpop.f32.mrb[26].mxu1 }
 0x200   : > { %v3923_v42 = vadd.f32 -1.0, %v5120_v29  ;;  %v1019_v37 = vpop.f32.mrb[25].mxu0  ;;  %5229 = vmatmul.mubr.msk.f32.gmra.mrb[130].mxu0 %vm205_vm0, %v5653_v50  ;;  %v3903_v39 = vadd.f32 -1.0, %v708_v36  ;;  %v710_v40 = vpop.f32.mrb[27].mxu1  ;;  %4303 = vmatmul.mubr.msk.f32.gmra.mrb[132].mxu1 %vm205_vm0, %v5634_v46 }
 0x201   : > { %v3920_v31 = vadd.f32 -1.0, %v1019_v37  ;;  %5231 = vmatprep.mubr.msk.f32.mxu0 %vm205_vm0, %v5659_v51  ;;  %v3904_v41 = vadd.f32 -1.0, %v710_v40  ;;  %2243 = vmatprep.mubr.f32.mxu1 %v5488_v0 }
 0x202   : > { %1304 = vst.msk [vmem:[%s6169_s14 + $0x148] sm:$0xff] %vm1264_vm1, %v3923_v42  ;;  %1284 = vst [vmem:[%s6169_s14 + $0xa8] sm:$0xff] %v3903_v39 }
 0x203   : > { %1301 = vst.msk [vmem:[%s6169_s14 + $0x130] sm:$0xff] %vm1264_vm1, %v3920_v31  ;;  %v5123_v43 = vpop.f32.mrb[26].mxu0  ;;  %1285 = vst [vmem:[%s6169_s14 + $0xb0] sm:$0xff] %v3904_v41  ;;  %v714_v44 = vpop.f32.mrb[28].mxu1 }
 0x204   : > { %v3929_v46 = vadd.f32 -1.0, %v5123_v43  ;;  %v1029_v45 = vpop.f32.mrb[27].mxu0  ;;  %5232 = vmatmul.mubr.msk.f32.gmra.mrb[132].mxu0 %vm205_vm0, %v5671_v52  ;;  %v3906_v47 = vadd.f32 -1.0, %v714_v44  ;;  %v716_v49 = vpop.f32.mrb[29].mxu1  ;;  %4304 = vmatmul.mubr.msk.f32.gmra.mrb[134].mxu1 %vm205_vm0, %v5640_v48 }
 0x205   : > { %v3926_v63 = vadd.f32 -1.0, %v1029_v45  ;;  %5234 = vmatprep.mubr.msk.f32.mxu0 %vm205_vm0, %v5677_v53  ;;  %v3907_v32 = vadd.f32 -1.0, %v716_v49  ;;  %2249 = vmatprep.mubr.f32.mxu1 %v5488_v0 }
 0x206   : > { %1310 = vst.msk [vmem:[%s6169_s14 + $0x178] sm:$0xff] %vm1264_vm1, %v3929_v46  ;;  %1287 = vst [vmem:[%s6169_s14 + $0xc0] sm:$0xff] %v3906_v47 }
 0x207   : > { %1307 = vst.msk [vmem:[%s6169_s14 + $0x160] sm:$0xff] %vm1264_vm1, %v3926_v63  ;;  %v5126_v2 = vpop.f32.mrb[28].mxu0  ;;  %1288 = vst [vmem:[%s6169_s14 + $0xc8] sm:$0xff] %v3907_v32  ;;  %v720_v18 = vpop.f32.mrb[30].mxu1 }
 0x208   : > { %v3935_v48 = vadd.f32 -1.0, %v5126_v2  ;;  %v1039_v35 = vpop.f32.mrb[29].mxu0  ;;  %5235 = vmatmul.mubr.msk.f32.gmra.mrb[134].mxu0 %vm205_vm0, %v5688_v54  ;;  %v3909_v4 = vadd.f32 -1.0, %v720_v18  ;;  %v722_v6 = vpop.f32.mrb[31].mxu1  ;;  %4305 = vmatmul.mubr.msk.f32.gmra.mrb[136].mxu1 %vm205_vm0, %v5653_v50 }
 0x209   : > { %v3932_v7 = vadd.f32 -1.0, %v1039_v35  ;;  %5237 = vmatprep.mubr.msk.f32.mxu0 %vm205_vm0, %v5694_v55  ;;  %v3910_v8 = vadd.f32 -1.0, %v722_v6  ;;  %2255 = vmatprep.mubr.f32.mxu1 %v5488_v0 }
 0x20a   : > { %1316 = vst.msk [vmem:[%s6169_s14 + $0x1a8] sm:$0xff] %vm1264_vm1, %v3935_v48  ;;  %1290 = vst [vmem:[%s6169_s14 + $0xd8] sm:$0xff] %v3909_v4 }
 0x20b   : > { %1313 = vst.msk [vmem:[%s6169_s14 + $0x190] sm:$0xff] %vm1264_vm1, %v3932_v7  ;;  %v5129_v38 = vpop.f32.mrb[30].mxu0  ;;  %1291 = vst [vmem:[%s6169_s14 + $0xe0] sm:$0xff] %v3910_v8  ;;  %v726_v19 = vpop.f32.mrb[32].mxu1 }
 0x20c   : > { %v3941_v50 = vadd.f32 -1.0, %v5129_v38  ;;  %v1049_v23 = vpop.f32.mrb[31].mxu0  ;;  %5238 = vmatmul.mubr.msk.f32.gmra.mrb[136].mxu0 %vm205_vm0, %v5705_v56  ;;  %v3912_v25 = vadd.f32 -1.0, %v726_v19  ;;  %v728_v33 = vpop.f32.mrb[33].mxu1  ;;  %4306 = vmatmul.mubr.msk.f32.gmra.mrb[138].mxu1 %vm205_vm0, %v5659_v51 }
 0x20d   : > { %v3938_v34 = vadd.f32 -1.0, %v1049_v23  ;;  %5240 = vmatprep.mubr.msk.f32.mxu0 %vm205_vm0, %v5711_v57  ;;  %v3913_v21 = vadd.f32 -1.0, %v728_v33  ;;  %2261 = vmatprep.mubr.f32.mxu1 %v5488_v0 }
 0x20e   : > { %1322 = vst.msk [vmem:[%s6169_s14 + $0x1d8] sm:$0xff] %vm1264_vm1, %v3941_v50  ;;  %1293 = vst [vmem:[%s6169_s14 + $0xf0] sm:$0xff] %v3912_v25 }
 0x20f   : > { %1319 = vst.msk [vmem:[%s6169_s14 + $0x1c0] sm:$0xff] %vm1264_vm1, %v3938_v34  ;;  %v5132_v26 = vpop.f32.mrb[32].mxu0  ;;  %1294 = vst [vmem:[%s6169_s14 + $0xf8] sm:$0xff] %v3913_v21  ;;  %v732_v29 = vpop.f32.mrb[34].mxu1 }
 0x210   : > { %v3947_v51 = vadd.f32 -1.0, %v5132_v26  ;;  %v1059_v36 = vpop.f32.mrb[33].mxu0  ;;  %5241 = vmatmul.mubr.msk.f32.gmra.mrb[138].mxu0 %vm205_vm0, %v5722_v58  ;;  %v3915_v42 = vadd.f32 -1.0, %v732_v29  ;;  %v734_v37 = vpop.f32.mrb[35].mxu1  ;;  %4307 = vmatmul.mubr.msk.f32.gmra.mrb[140].mxu1 %vm205_vm0, %v5671_v52 }
 0x211   : > { %v3944_v39 = vadd.f32 -1.0, %v1059_v36  ;;  %5243 = vmatprep.mubr.msk.f32.mxu0 %vm205_vm0, %v5728_v59  ;;  %v3916_v40 = vadd.f32 -1.0, %v734_v37  ;;  %2267 = vmatprep.mubr.f32.mxu1 %v5488_v0 }
 0x212   : > { %1328 = vst.msk [vmem:[%s6169_s14 + $0x208] sm:$0xff] %vm1264_vm1, %v3947_v51  ;;  %1296 = vst [vmem:[%s6169_s14 + $0x108] sm:$0xff] %v3915_v42 }
 0x213   : > { %1325 = vst.msk [vmem:[%s6169_s14 + $0x1f0] sm:$0xff] %vm1264_vm1, %v3944_v39  ;;  %v5135_v31 = vpop.f32.mrb[34].mxu0  ;;  %1297 = vst [vmem:[%s6169_s14 + $0x110] sm:$0xff] %v3916_v40  ;;  %v738_v41 = vpop.f32.mrb[36].mxu1 }
 0x214   : > { %v3953_v52 = vadd.f32 -1.0, %v5135_v31  ;;  %v1069_v43 = vpop.f32.mrb[35].mxu0  ;;  %5244 = vmatmul.mubr.msk.f32.gmra.mrb[140].mxu0 %vm205_vm0, %v5739_v60  ;;  %v3918_v59 = vadd.f32 -1.0, %v738_v41  ;;  %v740_v44 = vpop.f32.mrb[37].mxu1  ;;  %4308 = vmatmul.mubr.msk.f32.gmra.mrb[142].mxu1 %vm205_vm0, %v5677_v53  ;;  %v6409_v31 = vld [vmem:[%s7386_s0 + $0x70] sm:$0xff] }
 0x215   : > { %v3950_v46 = vadd.f32 -1.0, %v1069_v43  ;;  %5246 = vmatprep.mubr.msk.f32.mxu0 %vm205_vm0, %v5745_v61  ;;  %v3919_v45 = vadd.f32 -1.0, %v740_v44  ;;  %2273 = vmatprep.mubr.f32.mxu1 %v5488_v0 }
 0x216   : > { %1334 = vst.msk [vmem:[%s6169_s14 + $0x238] sm:$0xff] %vm1264_vm1, %v3953_v52  ;;  %1299 = vst [vmem:[%s6169_s14 + $0x120] sm:$0xff] %v3918_v59 }
 0x217   : > { %1331 = vst.msk [vmem:[%s6169_s14 + $0x220] sm:$0xff] %vm1264_vm1, %v3950_v46  ;;  %v5138_v60 = vpop.f32.mrb[36].mxu0  ;;  %1300 = vst [vmem:[%s6169_s14 + $0x128] sm:$0xff] %v3919_v45  ;;  %v744_v47 = vpop.f32.mrb[38].mxu1  ;;  %v6427_v45 = vld [vmem:[%s7386_s0 + $0x78] sm:$0xff] }
 0x218   : > { %v3959_v53 = vadd.f32 -1.0, %v5138_v60  ;;  %v1079_v49 = vpop.f32.mrb[37].mxu0  ;;  %5247 = vmatmul.mubr.msk.f32.gmra.mrb[142].mxu0 %vm205_vm0, %v5756_v62  ;;  %v3921_v61 = vadd.f32 -1.0, %v744_v47  ;;  %v746_v63 = vpop.f32.mrb[39].mxu1  ;;  %4309 = vmatmul.mubr.msk.f32.gmra.mrb[144].mxu1 %vm205_vm0, %v5688_v54 }
 0x219   : > { %v3956_v32 = vadd.f32 -1.0, %v1079_v49  ;;  %5249 = vmatprep.mubr.msk.f32.mxu0 %vm205_vm0, %v5764_v1  ;;  %v3922_v2 = vadd.f32 -1.0, %v746_v63  ;;  %2279 = vmatprep.mubr.f32.mxu1 %v5488_v0 }
 0x21a   : > { %1340 = vst.msk [vmem:[%s6169_s14 + $0x268] sm:$0xff] %vm1264_vm1, %v3959_v53  ;;  %1302 = vst [vmem:[%s6169_s14 + $0x138] sm:$0xff] %v3921_v61 }
 0x21b   : > { %1337 = vst.msk [vmem:[%s6169_s14 + $0x250] sm:$0xff] %vm1264_vm1, %v3956_v32  ;;  %v5141_v62 = vpop.f32.mrb[38].mxu0  ;;  %1303 = vst [vmem:[%s6169_s14 + $0x140] sm:$0xff] %v3922_v2  ;;  %v750_v18 = vpop.f32.mrb[40].mxu1  ;;  %v6445_v32 = vld [vmem:[%s7386_s0 + $0x80] sm:$0xff] }
 0x21c   : > { %v3965_v54 = vadd.f32 -1.0, %v5141_v62  ;;  %v1089_v48 = vpop.f32.mrb[39].mxu0  ;;  %5250 = vmatmul.mubr.msk.f32.gmra.mrb[144].mxu0 %vm205_vm0, %v5775_v3  ;;  %v3924_v1 = vadd.f32 -1.0, %v750_v18  ;;  %v752_v35 = vpop.f32.mrb[41].mxu1  ;;  %4310 = vmatmul.mubr.msk.f32.gmra.mrb[146].mxu1 %vm205_vm0, %v5694_v55 }
 0x21d   : > { %v3962_v4 = vadd.f32 -1.0, %v1089_v48  ;;  %5252 = vmatprep.mubr.msk.f32.mxu0 %vm205_vm0, %v5783_v5  ;;  %v3925_v6 = vadd.f32 -1.0, %v752_v35  ;;  %2285 = vmatprep.mubr.f32.mxu1 %v5488_v0  ;;  %v6461_v35 = vld [vmem:[%s7386_s0 + $0x88] sm:$0xff] }
 0x21e   : > { %1346 = vst.msk [vmem:[%s6169_s14 + $0x298] sm:$0xff] %vm1264_vm1, %v3965_v54  ;;  %1305 = vst [vmem:[%s6169_s14 + $0x150] sm:$0xff] %v3924_v1 }
 0x21f   : > { %1343 = vst.msk [vmem:[%s6169_s14 + $0x280] sm:$0xff] %vm1264_vm1, %v3962_v4  ;;  %v5144_v3 = vpop.f32.mrb[40].mxu0  ;;  %1306 = vst [vmem:[%s6169_s14 + $0x158] sm:$0xff] %v3925_v6  ;;  %v756_v7 = vpop.f32.mrb[42].mxu1 }
 0x220   : > { %v3971_v55 = vadd.f32 -1.0, %v5144_v3  ;;  %v1099_v8 = vpop.f32.mrb[41].mxu0  ;;  %5253 = vmatmul.mubr.msk.f32.gmra.mrb[146].mxu0 %vm205_vm0, %v5796_v9  ;;  %v3927_v5 = vadd.f32 -1.0, %v756_v7  ;;  %v758_v38 = vpop.f32.mrb[43].mxu1  ;;  %4311 = vmatmul.mubr.msk.f32.gmra.mrb[148].mxu1 %vm205_vm0, %v5705_v56 }
 0x221   : > { %v3968_v19 = vadd.f32 -1.0, %v1099_v8  ;;  %5255 = vmatprep.mubr.msk.f32.mxu0 %vm205_vm0, %v5802_v10  ;;  %v3928_v50 = vadd.f32 -1.0, %v758_v38  ;;  %2291 = vmatprep.mubr.f32.mxu1 %v5488_v0 }
 0x222   : > { %1352 = vst.msk [vmem:[%s6169_s14 + $0x2c8] sm:$0xff] %vm1264_vm1, %v3971_v55  ;;  %1308 = vst [vmem:[%s6169_s14 + $0x168] sm:$0xff] %v3927_v5  ;;  %v6477_v5 = vld [vmem:[%s7386_s0 + $0x90] sm:$0xff] }
 0x223   : > { %1349 = vst.msk [vmem:[%s6169_s14 + $0x2b0] sm:$0xff] %vm1264_vm1, %v3968_v19  ;;  %v5147_v9 = vpop.f32.mrb[42].mxu0  ;;  %1309 = vst [vmem:[%s6169_s14 + $0x170] sm:$0xff] %v3928_v50  ;;  %v762_v23 = vpop.f32.mrb[44].mxu1  ;;  %v6484_v19 = vld [vmem:[%s7386_s0 + $0x120] sm:$0xff] }
 0x224   : > { %v3977_v56 = vadd.f32 -1.0, %v5147_v9  ;;  %v1109_v25 = vpop.f32.mrb[43].mxu0  ;;  %5256 = vmatmul.mubr.msk.f32.gmra.mrb[148].mxu0 %vm205_vm0, %v5813_v11  ;;  %v3930_v10 = vadd.f32 -1.0, %v762_v23  ;;  %v764_v33 = vpop.f32.mrb[45].mxu1  ;;  %4312 = vmatmul.mubr.msk.f32.gmra.mrb[150].mxu1 %vm205_vm0, %v5711_v57 }
 0x225   : > { %v3974_v34 = vadd.f32 -1.0, %v1109_v25  ;;  %5258 = vmatprep.mubr.msk.f32.mxu0 %vm205_vm0, %v5819_v12  ;;  %v3931_v21 = vadd.f32 -1.0, %v764_v33  ;;  %2297 = vmatprep.mubr.f32.mxu1 %v5488_v0  ;;  %v6496_v25 = vld [vmem:[%s7386_s0 + $0x128] sm:$0x7] }
 0x226   : > { %1358 = vst.msk [vmem:[%s6169_s14 + $0x2f8] sm:$0xff] %vm1264_vm1, %v3977_v56  ;;  %1311 = vst [vmem:[%s6169_s14 + $0x180] sm:$0xff] %v3930_v10 }
 0x227   : > { %1355 = vst.msk [vmem:[%s6169_s14 + $0x2e0] sm:$0xff] %vm1264_vm1, %v3974_v34  ;;  %v5150_v11 = vpop.f32.mrb[44].mxu0  ;;  %1312 = vst [vmem:[%s6169_s14 + $0x188] sm:$0xff] %v3931_v21  ;;  %v768_v26 = vpop.f32.mrb[46].mxu1  ;;  %v6503_v34 = vld [vmem:[%s7386_s0 + $0x98] sm:$0xff] }
 0x228   : > { %v3983_v57 = vadd.f32 -1.0, %v5150_v11  ;;  %v1119_v29 = vpop.f32.mrb[45].mxu0  ;;  %5259 = vmatmul.mubr.msk.f32.gmra.mrb[150].mxu0 %vm205_vm0, %v5830_v13  ;;  %v3933_v12 = vadd.f32 -1.0, %v768_v26  ;;  %v770_v51 = vpop.f32.mrb[47].mxu1  ;;  %4313 = vmatmul.mubr.msk.f32.gmra.mrb[152].mxu1 %vm205_vm0, %v5722_v58 }
 0x229   : > { %v3980_v36 = vadd.f32 -1.0, %v1119_v29  ;;  %5261 = vmatprep.mubr.msk.f32.mxu0 %vm205_vm0, %v5836_v14  ;;  %v3934_v42 = vadd.f32 -1.0, %v770_v51  ;;  %2303 = vmatprep.mubr.f32.mxu1 %v5488_v0  ;;  %v6516_v51 = vld [vmem:[%s7386_s0] sm:$0xff] }
 0x22a   : > { %1364 = vst.msk [vmem:[%s6169_s14 + $0x328] sm:$0xff] %vm1264_vm1, %v3983_v57  ;;  %1314 = vst [vmem:[%s6169_s14 + $0x198] sm:$0xff] %v3933_v12 }
 0x22b   : > { %1361 = vst.msk [vmem:[%s6169_s14 + $0x310] sm:$0xff] %vm1264_vm1, %v3980_v36  ;;  %v5153_v13 = vpop.f32.mrb[46].mxu0  ;;  %1315 = vst [vmem:[%s6169_s14 + $0x1a0] sm:$0xff] %v3934_v42  ;;  %v774_v37 = vpop.f32.mrb[48].mxu1 }
 0x22c   : > { %v3989_v39 = vadd.f32 -1.0, %v5153_v13  ;;  %v1129_v58 = vpop.f32.mrb[47].mxu0  ;;  %5262 = vmatmul.mubr.msk.f32.gmra.mrb[152].mxu0 %vm205_vm0, %v5847_v15  ;;  %v3936_v14 = vadd.f32 -1.0, %v774_v37  ;;  %v776_v40 = vpop.f32.mrb[49].mxu1  ;;  %4314 = vmatmul.mubr.msk.f32.gmra.mrb[154].mxu1 %vm205_vm0, %v6409_v31  ;;  %v6523_v13 = vld [vmem:[%s7386_s0 + $0xa0] sm:$0xff] }
 0x22d   : > { %v3986_v41 = vadd.f32 -1.0, %v1129_v58  ;;  %5264 = vmatprep.mubr.msk.f32.mxu0 %vm205_vm0, %v5853_v16  ;;  %v3937_v52 = vadd.f32 -1.0, %v776_v40  ;;  %2309 = vmatprep.mubr.f32.mxu1 %v5488_v0 }
 0x22e   : > { %1370 = vst.msk [vmem:[%s6169_s14 + $0x358] sm:$0xff] %vm1264_vm1, %v3989_v39  ;;  %1317 = vst [vmem:[%s6169_s14 + $0x1b0] sm:$0xff] %v3936_v14 }
 0x22f   : > { %1367 = vst.msk [vmem:[%s6169_s14 + $0x340] sm:$0xff] %vm1264_vm1, %v3986_v41  ;;  %v5156_v15 = vpop.f32.mrb[48].mxu0  ;;  %1318 = vst [vmem:[%s6169_s14 + $0x1b8] sm:$0xff] %v3937_v52  ;;  %v780_v43 = vpop.f32.mrb[50].mxu1  ;;  %v6536_v52 = vld [vmem:[%s7386_s0 + $0x8] sm:$0xff] }
 0x230   : > { %v3995_v59 = vadd.f32 -1.0, %v5156_v15  ;;  %v1139_v44 = vpop.f32.mrb[49].mxu0  ;;  %5265 = vmatmul.mubr.msk.f32.gmra.mrb[154].mxu0 %vm205_vm0, %v5864_v17  ;;  %v3939_v16 = vadd.f32 -1.0, %v780_v43  ;;  %v782_v46 = vpop.f32.mrb[51].mxu1  ;;  %4315 = vmatmul.mubr.msk.f32.gmra.mrb[156].mxu1 %vm205_vm0, %v6427_v45 }
 0x231   : > { %v3992_v60 = vadd.f32 -1.0, %v1139_v44  ;;  %5267 = vmatprep.mubr.msk.f32.mxu0 %vm205_vm0, %v5870_v20  ;;  %v3940_v47 = vadd.f32 -1.0, %v782_v46  ;;  %2315 = vmatprep.mubr.f32.mxu1 %v5488_v0 }
 0x232   : > { %1377 = vst.msk [vmem:[%s6169_s14 + $0x388] sm:$0x7] %vm1376_vm2, %v3995_v59  ;;  %1320 = vst [vmem:[%s6169_s14 + $0x1c8] sm:$0xff] %v3939_v16  ;;  %v6543_v59 = vld [vmem:[%s7386_s0 + $0xa8] sm:$0xff] }
 0x233   : > { %1373 = vst.msk [vmem:[%s6169_s14 + $0x370] sm:$0xff] %vm1264_vm1, %v3992_v60  ;;  %v1444_v17 = vpop.f32.mrb[50].mxu0  ;;  %1321 = vst [vmem:[%s6169_s14 + $0x1d0] sm:$0xff] %v3940_v47  ;;  %v786_v53 = vpop.f32.mrb[52].mxu1 }
 0x234   : > { %v4072_v49 = vadd.f32 -1.0, %v1444_v17  ;;  %v1446_v61 = vpop.f32.mrb[51].mxu0  ;;  %5268 = vmatmul.mubr.msk.f32.gmra.mrb[156].mxu0 %vm205_vm0, %v5881_v22  ;;  %v3942_v20 = vadd.f32 -1.0, %v786_v53  ;;  %v788_v63 = vpop.f32.mrb[53].mxu1  ;;  %4316 = vmatmul.mubr.msk.f32.gmra.mrb[158].mxu1 %vm205_vm0, %v6445_v32  ;;  %v6556_v53 = vld [vmem:[%s7386_s0 + $0x10] sm:$0xff] }
 0x235   : > { %v4073_v2 = vadd.f32 -1.0, %v1446_v61  ;;  %5270 = vmatprep.mubr.msk.f32.mxu0 %vm205_vm0, %v5887_v24  ;;  %v3943_v62 = vadd.f32 -1.0, %v788_v63  ;;  %2321 = vmatprep.mubr.f32.mxu1 %v5488_v0 }
 0x236   : > { %4186 = vst [vmem:[%s6169_s14 + $0x390] sm:$0xff] %v4072_v49  ;;  %1323 = vst [vmem:[%s6169_s14 + $0x1e0] sm:$0xff] %v3942_v20  ;;  %v6563_v20 = vld [vmem:[%s7386_s0 + $0xb0] sm:$0xff] }
 0x237   : > { %4187 = vst [vmem:[%s6169_s14 + $0x398] sm:$0xff] %v4073_v2  ;;  %v1450_v22 = vpop.f32.mrb[52].mxu0  ;;  %1324 = vst [vmem:[%s6169_s14 + $0x1e8] sm:$0xff] %v3943_v62  ;;  %v792_v18 = vpop.f32.mrb[54].mxu1 }
 0x238   : > { %v4075_v54 = vadd.f32 -1.0, %v1450_v22  ;;  %v1452_v48 = vpop.f32.mrb[53].mxu0  ;;  %5271 = vmatmul.mubr.msk.f32.gmra.mrb[158].mxu0 %vm205_vm0, %v5898_v27  ;;  %v3945_v1 = vadd.f32 -1.0, %v792_v18  ;;  %v794_v24 = vpop.f32.mrb[55].mxu1  ;;  %4317 = vmatmul.mubr.msk.f32.gmra.mrb[160].mxu1 %vm205_vm0, %v6461_v35 }
 0x239   : > { %v4076_v4 = vadd.f32 -1.0, %v1452_v48  ;;  %5273 = vmatprep.mubr.msk.f32.mxu0 %vm205_vm0, %v5904_v28  ;;  %v3946_v6 = vadd.f32 -1.0, %v794_v24  ;;  %2327 = vmatprep.mubr.f32.mxu1 %v5488_v0  ;;  %v6576_v48 = vld [vmem:[%s7386_s0 + $0x18] sm:$0xff] }
 0x23a   : > { %4189 = vst [vmem:[%s6169_s14 + $0x3a8] sm:$0xff] %v4075_v54  ;;  %1326 = vst [vmem:[%s6169_s14 + $0x1f8] sm:$0xff] %v3945_v1 }
 0x23b   : > { %4190 = vst [vmem:[%s6169_s14 + $0x3b0] sm:$0xff] %v4076_v4  ;;  %v1456_v27 = vpop.f32.mrb[54].mxu0  ;;  %1327 = vst [vmem:[%s6169_s14 + $0x200] sm:$0xff] %v3946_v6  ;;  %v798_v3 = vpop.f32.mrb[56].mxu1  ;;  %v6583_v4 = vld [vmem:[%s7386_s0 + $0xb8] sm:$0xff] }
 0x23c   : > { %v4078_v7 = vadd.f32 -1.0, %v1456_v27  ;;  %v1458_v55 = vpop.f32.mrb[55].mxu0  ;;  %5274 = vmatmul.mubr.msk.f32.gmra.mrb[160].mxu0 %vm205_vm0, %v5915_v30  ;;  %v3948_v8 = vadd.f32 -1.0, %v798_v3  ;;  %v800_v28 = vpop.f32.mrb[57].mxu1  ;;  %4318 = vmatmul.mubr.msk.f32.gmra.mrb[162].mxu1 %vm205_vm0, %v6477_v5 }
 0x23d   : > { %v4079_v38 = vadd.f32 -1.0, %v1458_v55  ;;  %5276 = vmatprep.mubr.msk.f32.mxu0 %vm205_vm0, %v6484_v19  ;;  %v3949_v30 = vadd.f32 -1.0, %v800_v28  ;;  %2333 = vmatprep.mubr.f32.mxu1 %v5488_v0  ;;  %v6596_v28 = vld [vmem:[%s7386_s0 + $0x20] sm:$0xff] }
 0x23e   : > { %4192 = vst [vmem:[%s6169_s14 + $0x3c0] sm:$0xff] %v4078_v7  ;;  %1329 = vst [vmem:[%s6169_s14 + $0x210] sm:$0xff] %v3948_v8 }
 0x23f   : > { %4193 = vst [vmem:[%s6169_s14 + $0x3c8] sm:$0xff] %v4079_v38  ;;  %v1462_v50 = vpop.f32.mrb[56].mxu0  ;;  %1330 = vst [vmem:[%s6169_s14 + $0x218] sm:$0xff] %v3949_v30  ;;  %v804_v9 = vpop.f32.mrb[58].mxu1 }
 0x240   : > { %v4081_v23 = vadd.f32 -1.0, %v1462_v50  ;;  %v1464_v56 = vpop.f32.mrb[57].mxu0  ;;  %5277 = vmatmul.mubr.msk.f32.gmra.mrb[162].mxu0 %vm205_vm0, %v6496_v25  ;;  %v3951_v10 = vadd.f32 -1.0, %v804_v9  ;;  %v806_v33 = vpop.f32.mrb[59].mxu1  ;;  %4319 = vmatmul.mubr.msk.f32.gmra.mrb[164].mxu1 %vm205_vm0, %v6503_v34  ;;  %v6603_v50 = vld [vmem:[%s7386_s0 + $0xc0] sm:$0xff] }
 0x241   : > { %v4082_v21 = vadd.f32 -1.0, %v1464_v56  ;;  %2996 = vmatprep.mubr.f32.mxu0 %v5488_v0  ;;  %v3952_v11 = vadd.f32 -1.0, %v806_v33  ;;  %2339 = vmatprep.mubr.f32.mxu1 %v5488_v0 }
 0x242   : > { %4195 = vst [vmem:[%s6169_s14 + $0x3d8] sm:$0xff] %v4081_v23  ;;  %1332 = vst [vmem:[%s6169_s14 + $0x228] sm:$0xff] %v3951_v10 }
 0x243   : > { %4196 = vst [vmem:[%s6169_s14 + $0x3e0] sm:$0xff] %v4082_v21  ;;  %v1468_v26 = vpop.f32.mrb[58].mxu0  ;;  %1333 = vst [vmem:[%s6169_s14 + $0x230] sm:$0xff] %v3952_v11  ;;  %v810_v57 = vpop.f32.mrb[60].mxu1  ;;  %v6616_v11 = vld [vmem:[%s7386_s0 + $0x28] sm:$0xff] }
 0x244   : > { %v4084_v29 = vadd.f32 -1.0, %v1468_v26  ;;  %v1470_v12 = vpop.f32.mrb[59].mxu0  ;;  %4604 = vmatmul.mubr.msk.f32.vlgmr.msra.gmra.mrb[164].mxu0 %vm205_vm0, %v6516_v51  ;;  %v3954_v36 = vadd.f32 -1.0, %v810_v57  ;;  %v812_v42 = vpop.f32.mrb[61].mxu1  ;;  %4320 = vmatmul.mubr.msk.f32.gmra.mrb[166].mxu1 %vm205_vm0, %v6523_v13 }
 0x245   : > { %v4085_v37 = vadd.f32 -1.0, %v1470_v12  ;;  %3002 = vmatprep.mubr.f32.mxu0 %v5488_v0  ;;  %v3955_v39 = vadd.f32 -1.0, %v812_v42  ;;  %2345 = vmatprep.mubr.f32.mxu1 %v5488_v0 }
 0x246   : > { %4198 = vst [vmem:[%s6169_s14 + $0x3f0] sm:$0xff] %v4084_v29  ;;  %1335 = vst [vmem:[%s6169_s14 + $0x240] sm:$0xff] %v3954_v36  ;;  %v6623_v29 = vld [vmem:[%s7386_s0 + $0xc8] sm:$0xff] }
 0x247   : > { %4199 = vst [vmem:[%s6169_s14 + $0x3f8] sm:$0xff] %v4085_v37  ;;  %v1474_v58 = vpop.f32.mrb[60].mxu0  ;;  %1336 = vst [vmem:[%s6169_s14 + $0x248] sm:$0xff] %v3955_v39  ;;  %v816_v14 = vpop.f32.mrb[62].mxu1 }
 0x248   : > { %v4087_v40 = vadd.f32 -1.0, %v1474_v58  ;;  %v1476_v41 = vpop.f32.mrb[61].mxu0  ;;  %4605 = vmatmul.mubr.msk.f32.gmra.mrb[166].mxu0 %vm205_vm0, %v6536_v52  ;;  %v3957_v15 = vadd.f32 -1.0, %v816_v14  ;;  %v818_v43 = vpop.f32.mrb[63].mxu1  ;;  %4321 = vmatmul.mubr.msk.f32.gmra.mrb[168].mxu1 %vm205_vm0, %v6543_v59  ;;  %v6636_v14 = vld [vmem:[%s7386_s0 + $0x30] sm:$0xff] }
 0x249   : > { %v4088_v44 = vadd.f32 -1.0, %v1476_v41  ;;  %3008 = vmatprep.mubr.f32.mxu0 %v5488_v0  ;;  %v3958_v16 = vadd.f32 -1.0, %v818_v43  ;;  %2351 = vmatprep.mubr.f32.mxu1 %v5488_v0 }
 0x24a   : > { %4201 = vst [vmem:[%s6169_s14 + $0x408] sm:$0xff] %v4087_v40  ;;  %1338 = vst [vmem:[%s6169_s14 + $0x258] sm:$0xff] %v3957_v15  ;;  %v6643_v15 = vld [vmem:[%s7386_s0 + $0xd0] sm:$0xff] }
 0x24b   : > { %4202 = vst [vmem:[%s6169_s14 + $0x410] sm:$0xff] %v4088_v44  ;;  %v1480_v46 = vpop.f32.mrb[62].mxu0  ;;  %1339 = vst [vmem:[%s6169_s14 + $0x260] sm:$0xff] %v3958_v16  ;;  %v822_v60 = vpop.f32.mrb[64].mxu1 }
 0x24c   : > { %v4090_v47 = vadd.f32 -1.0, %v1480_v46  ;;  %v1482_v17 = vpop.f32.mrb[63].mxu0  ;;  %4606 = vmatmul.mubr.msk.f32.gmra.mrb[168].mxu0 %vm205_vm0, %v6556_v53  ;;  %v3960_v49 = vadd.f32 -1.0, %v822_v60  ;;  %v824_v61 = vpop.f32.mrb[65].mxu1  ;;  %4322 = vmatmul.mubr.msk.f32.gmra.mrb[170].mxu1 %vm205_vm0, %v6563_v20 }
 0x24d   : > { %v4091_v63 = vadd.f32 -1.0, %v1482_v17  ;;  %3014 = vmatprep.mubr.f32.mxu0 %v5488_v0  ;;  %v3961_v2 = vadd.f32 -1.0, %v824_v61  ;;  %2357 = vmatprep.mubr.f32.mxu1 %v5488_v0  ;;  %v6656_v17 = vld [vmem:[%s7386_s0 + $0x38] sm:$0xff] }
 0x24e   : > { %4204 = vst [vmem:[%s6169_s14 + $0x420] sm:$0xff] %v4090_v47  ;;  %1341 = vst [vmem:[%s6169_s14 + $0x270] sm:$0xff] %v3960_v49 }
 0x24f   : > { %4205 = vst [vmem:[%s6169_s14 + $0x428] sm:$0xff] %v4091_v63  ;;  %v1486_v62 = vpop.f32.mrb[64].mxu0  ;;  %1342 = vst [vmem:[%s6169_s14 + $0x278] sm:$0xff] %v3961_v2  ;;  %v828_v22 = vpop.f32.mrb[66].mxu1  ;;  %v6663_v63 = vld [vmem:[%s7386_s0 + $0xd8] sm:$0xff] }
 0x250   : > { %v4093_v18 = vadd.f32 -1.0, %v1486_v62  ;;  %v1488_v54 = vpop.f32.mrb[65].mxu0  ;;  %4607 = vmatmul.mubr.msk.f32.gmra.mrb[170].mxu0 %vm205_vm0, %v6576_v48  ;;  %v3963_v1 = vadd.f32 -1.0, %v828_v22  ;;  %v830_v24 = vpop.f32.mrb[67].mxu1  ;;  %4323 = vmatmul.mubr.msk.f32.gmra.mrb[172].mxu1 %vm205_vm0, %v6583_v4 }
 0x251   : > { %v4094_v6 = vadd.f32 -1.0, %v1488_v54  ;;  %3020 = vmatprep.mubr.f32.mxu0 %v5488_v0  ;;  %v3964_v27 = vadd.f32 -1.0, %v830_v24  ;;  %2363 = vmatprep.mubr.f32.mxu1 %v5488_v0  ;;  %v6676_v24 = vld [vmem:[%s7386_s0 + $0x40] sm:$0xff] }
 0x252   : > { %4207 = vst [vmem:[%s6169_s14 + $0x438] sm:$0xff] %v4093_v18  ;;  %1344 = vst [vmem:[%s6169_s14 + $0x288] sm:$0xff] %v3963_v1 }
 0x253   : > { %4208 = vst [vmem:[%s6169_s14 + $0x440] sm:$0xff] %v4094_v6  ;;  %v1492_v3 = vpop.f32.mrb[66].mxu0  ;;  %1345 = vst [vmem:[%s6169_s14 + $0x290] sm:$0xff] %v3964_v27  ;;  %v834_v7 = vpop.f32.mrb[68].mxu1 }
 0x254   : > { %v4096_v55 = vadd.f32 -1.0, %v1492_v3  ;;  %v1494_v8 = vpop.f32.mrb[67].mxu0  ;;  %4608 = vmatmul.mubr.msk.f32.gmra.mrb[172].mxu0 %vm205_vm0, %v6596_v28  ;;  %v3966_v38 = vadd.f32 -1.0, %v834_v7  ;;  %v836_v30 = vpop.f32.mrb[69].mxu1  ;;  %4324 = vmatmul.mubr.msk.f32.gmra.mrb[174].mxu1 %vm205_vm0, %v6603_v50  ;;  %v6683_v3 = vld [vmem:[%s7386_s0 + $0xe0] sm:$0xff] }
 0x255   : > { %v4097_v9 = vadd.f32 -1.0, %v1494_v8  ;;  %3026 = vmatprep.mubr.f32.mxu0 %v5488_v0  ;;  %v3967_v23 = vadd.f32 -1.0, %v836_v30  ;;  %2369 = vmatprep.mubr.f32.mxu1 %v5488_v0 }
 0x256   : > { %4210 = vst [vmem:[%s6169_s14 + $0x450] sm:$0xff] %v4096_v55  ;;  %1347 = vst [vmem:[%s6169_s14 + $0x2a0] sm:$0xff] %v3966_v38 }
 0x257   : > { %4211 = vst [vmem:[%s6169_s14 + $0x458] sm:$0xff] %v4097_v9  ;;  %v1498_v56 = vpop.f32.mrb[68].mxu0  ;;  %1348 = vst [vmem:[%s6169_s14 + $0x2a8] sm:$0xff] %v3967_v23  ;;  %v840_v10 = vpop.f32.mrb[70].mxu1  ;;  %v6696_v23 = vld [vmem:[%s7386_s0 + $0x48] sm:$0xff] }
 0x258   : > { %v4099_v33 = vadd.f32 -1.0, %v1498_v56  ;;  %v1500_v21 = vpop.f32.mrb[69].mxu0  ;;  %4609 = vmatmul.mubr.msk.f32.gmra.mrb[174].mxu0 %vm205_vm0, %v6616_v11  ;;  %v3969_v26 = vadd.f32 -1.0, %v840_v10  ;;  %v842_v57 = vpop.f32.mrb[71].mxu1  ;;  %4325 = vmatmul.mubr.msk.f32.gmra.mrb[176].mxu1 %vm205_vm0, %v6623_v29 }
 0x259   : > { %v4100_v12 = vadd.f32 -1.0, %v1500_v21  ;;  %3032 = vmatprep.mubr.f32.mxu0 %v5488_v0  ;;  %v3970_v36 = vadd.f32 -1.0, %v842_v57  ;;  %2375 = vmatprep.mubr.f32.mxu1 %v5488_v0 }
 0x25a   : > { %4213 = vst [vmem:[%s6169_s14 + $0x468] sm:$0xff] %v4099_v33  ;;  %1350 = vst [vmem:[%s6169_s14 + $0x2b8] sm:$0xff] %v3969_v26  ;;  %v6703_v33 = vld [vmem:[%s7386_s0 + $0xe8] sm:$0xff] }
 0x25b   : > { %4214 = vst [vmem:[%s6169_s14 + $0x470] sm:$0xff] %v4100_v12  ;;  %v1504_v42 = vpop.f32.mrb[70].mxu0  ;;  %1351 = vst [vmem:[%s6169_s14 + $0x2c0] sm:$0xff] %v3970_v36  ;;  %v846_v37 = vpop.f32.mrb[72].mxu1 }
 0x25c   : > { %v4102_v39 = vadd.f32 -1.0, %v1504_v42  ;;  %v1506_v58 = vpop.f32.mrb[71].mxu0  ;;  %4610 = vmatmul.mubr.msk.f32.gmra.mrb[176].mxu0 %vm205_vm0, %v6636_v14  ;;  %v3972_v40 = vadd.f32 -1.0, %v846_v37  ;;  %v848_v41 = vpop.f32.mrb[73].mxu1  ;;  %4326 = vmatmul.mubr.msk.f32.gmra.mrb[178].mxu1 %vm205_vm0, %v6643_v15  ;;  %v6716_v37 = vld [vmem:[%s7386_s0 + $0x50] sm:$0xff] }
 0x25d   : > { %v4103_v43 = vadd.f32 -1.0, %v1506_v58  ;;  %3038 = vmatprep.mubr.f32.mxu0 %v5488_v0  ;;  %v3973_v44 = vadd.f32 -1.0, %v848_v41  ;;  %2381 = vmatprep.mubr.f32.mxu1 %v5488_v0 }
 0x25e   : > { %4216 = vst [vmem:[%s6169_s14 + $0x480] sm:$0xff] %v4102_v39  ;;  %1353 = vst [vmem:[%s6169_s14 + $0x2d0] sm:$0xff] %v3972_v40  ;;  %v6723_v40 = vld [vmem:[%s7386_s0 + $0xf0] sm:$0xff] }
 0x25f   : > { %4217 = vst [vmem:[%s6169_s14 + $0x488] sm:$0xff] %v4103_v43  ;;  %v1510_v16 = vpop.f32.mrb[72].mxu0  ;;  %1354 = vst [vmem:[%s6169_s14 + $0x2d8] sm:$0xff] %v3973_v44  ;;  %v852_v46 = vpop.f32.mrb[74].mxu1 }
 0x260   : > { %v4105_v60 = vadd.f32 -1.0, %v1510_v16  ;;  %v1512_v47 = vpop.f32.mrb[73].mxu0  ;;  %4611 = vmatmul.mubr.msk.f32.gmra.mrb[178].mxu0 %vm205_vm0, %v6656_v17  ;;  %v3975_v49 = vadd.f32 -1.0, %v852_v46  ;;  %v854_v61 = vpop.f32.mrb[75].mxu1  ;;  %4327 = vmatmul.mubr.msk.f32.gmra.mrb[180].mxu1 %vm205_vm0, %v6663_v63 }
 0x261   : > { %v4106_v2 = vadd.f32 -1.0, %v1512_v47  ;;  %3044 = vmatprep.mubr.f32.mxu0 %v5488_v0  ;;  %v3976_v62 = vadd.f32 -1.0, %v854_v61  ;;  %2387 = vmatprep.mubr.f32.mxu1 %v5488_v0  ;;  %v6736_v47 = vld [vmem:[%s7386_s0 + $0x58] sm:$0xff] }
 0x262   : > { %4219 = vst [vmem:[%s6169_s14 + $0x498] sm:$0xff] %v4105_v60  ;;  %1356 = vst [vmem:[%s6169_s14 + $0x2e8] sm:$0xff] %v3975_v49 }
 0x263   : > { %4220 = vst [vmem:[%s6169_s14 + $0x4a0] sm:$0xff] %v4106_v2  ;;  %v1516_v22 = vpop.f32.mrb[74].mxu0  ;;  %1357 = vst [vmem:[%s6169_s14 + $0x2f0] sm:$0xff] %v3976_v62  ;;  %v858_v18 = vpop.f32.mrb[76].mxu1  ;;  %v6743_v2 = vld [vmem:[%s7386_s0 + $0xf8] sm:$0xff] }
 0x264   : > { %v4108_v54 = vadd.f32 -1.0, %v1516_v22  ;;  %v1518_v1 = vpop.f32.mrb[75].mxu0  ;;  %4612 = vmatmul.mubr.msk.f32.gmra.mrb[180].mxu0 %vm205_vm0, %v6676_v24  ;;  %v3978_v6 = vadd.f32 -1.0, %v858_v18  ;;  %v860_v27 = vpop.f32.mrb[77].mxu1  ;;  %4328 = vmatmul.mubr.msk.f32.gmra.mrb[182].mxu1 %vm205_vm0, %v6683_v3 }
 0x265   : > { %v4109_v7 = vadd.f32 -1.0, %v1518_v1  ;;  %3050 = vmatprep.mubr.f32.mxu0 %v5488_v0  ;;  %v3979_v55 = vadd.f32 -1.0, %v860_v27  ;;  %2393 = vmatprep.mubr.f32.mxu1 %v5488_v0  ;;  %v6756_v27 = vld [vmem:[%s7386_s0 + $0x60] sm:$0xff] }
 0x266   : > { %4222 = vst [vmem:[%s6169_s14 + $0x4b0] sm:$0xff] %v4108_v54  ;;  %1359 = vst [vmem:[%s6169_s14 + $0x300] sm:$0xff] %v3978_v6 }
 0x267   : > { %4223 = vst [vmem:[%s6169_s14 + $0x4b8] sm:$0xff] %v4109_v7  ;;  %v1522_v8 = vpop.f32.mrb[76].mxu0  ;;  %1360 = vst [vmem:[%s6169_s14 + $0x308] sm:$0xff] %v3979_v55  ;;  %v864_v38 = vpop.f32.mrb[78].mxu1 }
 0x268   : > { %v4111_v30 = vadd.f32 -1.0, %v1522_v8  ;;  %v1524_v9 = vpop.f32.mrb[77].mxu0  ;;  %4613 = vmatmul.mubr.msk.f32.gmra.mrb[182].mxu0 %vm205_vm0, %v6696_v23  ;;  %v3981_v56 = vadd.f32 -1.0, %v864_v38  ;;  %v866_v10 = vpop.f32.mrb[79].mxu1  ;;  %4329 = vmatmul.mubr.msk.f32.gmra.mrb[184].mxu1 %vm205_vm0, %v6703_v33  ;;  %v6763_v8 = vld [vmem:[%s7386_s0 + $0x100] sm:$0xff] }
 0x269   : > { %v4112_v21 = vadd.f32 -1.0, %v1524_v9  ;;  %3056 = vmatprep.mubr.f32.mxu0 %v5488_v0  ;;  %v3982_v26 = vadd.f32 -1.0, %v866_v10  ;;  %2399 = vmatprep.mubr.f32.mxu1 %v5488_v0 }
 0x26a   : > { %4225 = vst [vmem:[%s6169_s14 + $0x4c8] sm:$0xff] %v4111_v30  ;;  %1362 = vst [vmem:[%s6169_s14 + $0x318] sm:$0xff] %v3981_v56 }
 0x26b   : > { %4226 = vst [vmem:[%s6169_s14 + $0x4d0] sm:$0xff] %v4112_v21  ;;  %v1528_v57 = vpop.f32.mrb[78].mxu0  ;;  %1363 = vst [vmem:[%s6169_s14 + $0x320] sm:$0xff] %v3982_v26  ;;  %v870_v12 = vpop.f32.mrb[80].mxu1  ;;  %v6776_v26 = vld [vmem:[%s7386_s0 + $0x68] sm:$0xff] }
 0x26c   : > { %v4114_v36 = vadd.f32 -1.0, %v1528_v57  ;;  %v1530_v42 = vpop.f32.mrb[79].mxu0  ;;  %4614 = vmatmul.mubr.msk.f32.gmra.mrb[184].mxu0 %vm205_vm0, %v6716_v37  ;;  %v3984_v39 = vadd.f32 -1.0, %v870_v12  ;;  %v872_v58 = vpop.f32.mrb[81].mxu1  ;;  %4330 = vmatmul.mubr.msk.f32.gmra.mrb[186].mxu1 %vm205_vm0, %v6723_v40 }
 0x26d   : > { %v4115_v41 = vadd.f32 -1.0, %v1530_v42  ;;  %3062 = vmatprep.mubr.f32.mxu0 %v5488_v0  ;;  %v3985_v43 = vadd.f32 -1.0, %v872_v58  ;;  %2405 = vmatprep.mubr.f32.mxu1 %v5488_v0 }
 0x26e   : > { %4228 = vst [vmem:[%s6169_s14 + $0x4e0] sm:$0xff] %v4114_v36  ;;  %1365 = vst [vmem:[%s6169_s14 + $0x330] sm:$0xff] %v3984_v39  ;;  %v6783_v36 = vld [vmem:[%s7386_s0 + $0x108] sm:$0xff] }
 0x26f   : > { %4229 = vst [vmem:[%s6169_s14 + $0x4e8] sm:$0xff] %v4115_v41  ;;  %v1534_v44 = vpop.f32.mrb[80].mxu0  ;;  %1366 = vst [vmem:[%s6169_s14 + $0x338] sm:$0xff] %v3985_v43  ;;  %v876_v16 = vpop.f32.mrb[82].mxu1 }
 0x270   : > { %v4117_v46 = vadd.f32 -1.0, %v1534_v44  ;;  %v1536_v60 = vpop.f32.mrb[81].mxu0  ;;  %4615 = vmatmul.mubr.msk.f32.gmra.mrb[186].mxu0 %vm205_vm0, %v6736_v47  ;;  %v3987_v49 = vadd.f32 -1.0, %v876_v16  ;;  %v878_v61 = vpop.f32.mrb[83].mxu1  ;;  %4331 = vmatmul.mubr.msk.f32.gmra.mrb[188].mxu1 %vm205_vm0, %v6743_v2 }
 0x271   : > { %v4118_v62 = vadd.f32 -1.0, %v1536_v60  ;;  %3068 = vmatprep.mubr.f32.mxu0 %v5488_v0  ;;  %v3988_v22 = vadd.f32 -1.0, %v878_v61  ;;  %2411 = vmatprep.mubr.f32.mxu1 %v5488_v0  ;;  %v6798_v60 = vld [vmem:[%s7386_s0 + $0x110] sm:$0xff] }
 0x272   : > { %4231 = vst [vmem:[%s6169_s14 + $0x4f8] sm:$0xff] %v4117_v46  ;;  %1368 = vst [vmem:[%s6169_s14 + $0x348] sm:$0xff] %v3987_v49 }
 0x273   : > { %4232 = vst [vmem:[%s6169_s14 + $0x500] sm:$0xff] %v4118_v62  ;;  %v1540_v18 = vpop.f32.mrb[82].mxu0  ;;  %1369 = vst [vmem:[%s6169_s14 + $0x350] sm:$0xff] %v3988_v22  ;;  %v882_v54 = vpop.f32.mrb[84].mxu1 }
 0x274   : > { %v4120_v1 = vadd.f32 -1.0, %v1540_v18  ;;  %v1542_v6 = vpop.f32.mrb[83].mxu0  ;;  %4616 = vmatmul.mubr.msk.f32.gmra.mrb[188].mxu0 %vm205_vm0, %v6756_v27  ;;  %v3990_v7 = vadd.f32 -1.0, %v882_v54  ;;  %v884_v55 = vpop.f32.mrb[85].mxu1  ;;  %4332 = vmatmul.mubr.msk.f32.gmra.mrb[190].mxu1 %vm205_vm0, %v6763_v8 }
 0x275   : > { %v4121_v38 = vadd.f32 -1.0, %v1542_v6  ;;  %3074 = vmatprep.mubr.f32.mxu0 %v5488_v0  ;;  %v3991_v30 = vadd.f32 -1.0, %v884_v55  ;;  %2417 = vmatprep.mubr.f32.mxu1 %v5488_v0 }
 0x276   : > { %4234 = vst [vmem:[%s6169_s14 + $0x510] sm:$0xff] %v4120_v1  ;;  %1371 = vst [vmem:[%s6169_s14 + $0x360] sm:$0xff] %v3990_v7  ;;  %v6815_v7 = vld [vmem:[%s7386_s0 + $0x118] sm:$0xff] }
 0x277   : > { %4235 = vst [vmem:[%s6169_s14 + $0x518] sm:$0xff] %v4121_v38  ;;  %v1546_v9 = vpop.f32.mrb[84].mxu0  ;;  %1372 = vst [vmem:[%s6169_s14 + $0x368] sm:$0xff] %v3991_v30  ;;  %v888_v56 = vpop.f32.mrb[86].mxu1 }
 0x278   : > { %v4123_v10 = vadd.f32 -1.0, %v1546_v9  ;;  %v1548_v21 = vpop.f32.mrb[85].mxu0  ;;  %4617 = vmatmul.mubr.msk.f32.gmra.mrb[190].mxu0 %vm205_vm0, %v6776_v26  ;;  %v3993_v57 = vadd.f32 -1.0, %v888_v56  ;;  %v890_v12 = vpop.f32.mrb[87].mxu1  ;;  %4333 = vmatmul.mubr.msk.f32.gmra.mrb[192].mxu1 %vm205_vm0, %v6783_v36 }
 0x279   : > { %v4124_v42 = vadd.f32 -1.0, %v1548_v21  ;;  %3080 = vmatprep.mubr.f32.mxu0 %v5488_v0  ;;  %v3994_v39 = vadd.f32 -1.0, %v890_v12  ;;  %2423 = vmatprep.mubr.f32.mxu1 %v5488_v0 }
 0x27a   : > { %4237 = vst [vmem:[%s6169_s14 + $0x528] sm:$0xff] %v4123_v10  ;;  %1374 = vst [vmem:[%s6169_s14 + $0x378] sm:$0x7] %v3993_v57 }
 0x27b   : > { %4238 = vst [vmem:[%s6169_s14 + $0x530] sm:$0xff] %v4124_v42  ;;  %v1552_v58 = vpop.f32.mrb[86].mxu0  ;;  %1375 = vst [vmem:[%s6169_s14 + $0x380] sm:$0x7] %v3994_v39  ;;  %v5163_v41 = vpop.f32.mrb[88].mxu1 }
 0x27c   : > { %v4126_v43 = vadd.f32 -1.0, %v1552_v58  ;;  %v1554_v44 = vpop.f32.mrb[87].mxu0  ;;  %4618 = vmatmul.mubr.msk.f32.gmra.mrb[192].mxu0 %vm205_vm0, %v6409_v31  ;;  %v4077_v16 = vadd.f32 -1.0, %v5163_v41  ;;  %v1737_v46 = vpop.f32.mrb[89].mxu1  ;;  %4334 = vmatmul.mubr.msk.f32.gmra.mrb[194].mxu1 %vm205_vm0, %v6798_v60 }
 0x27d   : > { %v4127_v49 = vadd.f32 -1.0, %v1554_v44  ;;  %3086 = vmatprep.mubr.f32.mxu0 %v5488_v0  ;;  %v4074_v61 = vadd.f32 -1.0, %v1737_v46  ;;  %2429 = vmatprep.mubr.f32.mxu1 %v5488_v0 }
 0x27e   : > { %4240 = vst [vmem:[%s6169_s14 + $0x540] sm:$0xff] %v4126_v43  ;;  %4191 = vst.msk [vmem:[%s6169_s14 + $0x3b8] sm:$0xff] %vm1264_vm1, %v4077_v16 }
 0x27f   : > { %4241 = vst [vmem:[%s6169_s14 + $0x548] sm:$0xff] %v4127_v49  ;;  %v1558_v62 = vpop.f32.mrb[88].mxu0  ;;  %4188 = vst.msk [vmem:[%s6169_s14 + $0x3a0] sm:$0xff] %vm1264_vm1, %v4074_v61  ;;  %v5166_v22 = vpop.f32.mrb[90].mxu1 }
 0x280   : > { %v4129_v18 = vadd.f32 -1.0, %v1558_v62  ;;  %v1560_v54 = vpop.f32.mrb[89].mxu0  ;;  %4619 = vmatmul.mubr.msk.f32.gmra.mrb[194].mxu0 %vm205_vm0, %v6427_v45  ;;  %v4083_v1 = vadd.f32 -1.0, %v5166_v22  ;;  %v1747_v6 = vpop.f32.mrb[91].mxu1  ;;  %4335 = vmatmul.mubr.msk.f32.gmra.mrb[196].mxu1 %vm205_vm0, %v6815_v7 }
 0x281   : > { %v4130_v55 = vadd.f32 -1.0, %v1560_v54  ;;  %3092 = vmatprep.mubr.f32.mxu0 %v5488_v0  ;;  %v4080_v38 = vadd.f32 -1.0, %v1747_v6  ;;  %2435 = vmatprep.mubr.f32.mxu1 %v5488_v0 }
 0x282   : > { %4243 = vst [vmem:[%s6169_s14 + $0x558] sm:$0xff] %v4129_v18  ;;  %4197 = vst.msk [vmem:[%s6169_s14 + $0x3e8] sm:$0xff] %vm1264_vm1, %v4083_v1 }
 0x283   : > { %4244 = vst [vmem:[%s6169_s14 + $0x560] sm:$0xff] %v4130_v55  ;;  %v1564_v30 = vpop.f32.mrb[90].mxu0  ;;  %4194 = vst.msk [vmem:[%s6169_s14 + $0x3d0] sm:$0xff] %vm1264_vm1, %v4080_v38  ;;  %v5169_v9 = vpop.f32.mrb[92].mxu1 }
 0x284   : > { %v4132_v56 = vadd.f32 -1.0, %v1564_v30  ;;  %v1566_v10 = vpop.f32.mrb[91].mxu0  ;;  %4620 = vmatmul.mubr.msk.f32.gmra.mrb[196].mxu0 %vm205_vm0, %v6445_v32  ;;  %v4089_v21 = vadd.f32 -1.0, %v5169_v9  ;;  %v1757_v57 = vpop.f32.mrb[93].mxu1  ;;  %4336 = vmatmul.mubr.msk.f32.gmra.mrb[198].mxu1 %vm205_vm0, %v6484_v19 }
 0x285   : > { %v4133_v12 = vadd.f32 -1.0, %v1566_v10  ;;  %3098 = vmatprep.mubr.f32.mxu0 %v5488_v0  ;;  %v4086_v42 = vadd.f32 -1.0, %v1757_v57  ;;  %2441 = vmatprep.mubr.f32.mxu1 %v5488_v0 }
 0x286   : > { %4246 = vst [vmem:[%s6169_s14 + $0x570] sm:$0xff] %v4132_v56  ;;  %4203 = vst.msk [vmem:[%s6169_s14 + $0x418] sm:$0xff] %vm1264_vm1, %v4089_v21 }
 0x287   : > { %4247 = vst [vmem:[%s6169_s14 + $0x578] sm:$0xff] %v4133_v12  ;;  %v1570_v39 = vpop.f32.mrb[92].mxu0  ;;  %4200 = vst.msk [vmem:[%s6169_s14 + $0x400] sm:$0xff] %vm1264_vm1, %v4086_v42  ;;  %v5172_v58 = vpop.f32.mrb[94].mxu1 }
 0x288   : > { %v4135_v41 = vadd.f32 -1.0, %v1570_v39  ;;  %v1572_v19 = vpop.f32.mrb[93].mxu0  ;;  %4621 = vmatmul.mubr.msk.f32.gmra.mrb[198].mxu0 %vm205_vm0, %v6461_v35  ;;  %v4095_v43 = vadd.f32 -1.0, %v5172_v58  ;;  %v1767_v44 = vpop.f32.mrb[95].mxu1  ;;  %4337 = vmatmul.mubr.msk.f32.gmra.mrb[200].mxu1 %vm205_vm0, %v6496_v25 }
 0x289   : > { %v4136_v16 = vadd.f32 -1.0, %v1572_v19  ;;  %3104 = vmatprep.mubr.f32.mxu0 %v5488_v0  ;;  %v4092_v46 = vadd.f32 -1.0, %v1767_v44  ;;  %5283 = vmatprep.mubr.msk.f32.mxu1 %vm205_vm0, %v6516_v51 }
 0x28a   : > { %4249 = vst [vmem:[%s6169_s14 + $0x588] sm:$0xff] %v4135_v41  ;;  %4209 = vst.msk [vmem:[%s6169_s14 + $0x448] sm:$0xff] %vm1264_vm1, %v4095_v43 }
 0x28b   : > { %4250 = vst [vmem:[%s6169_s14 + $0x590] sm:$0xff] %v4136_v16  ;;  %v1576_v49 = vpop.f32.mrb[94].mxu0  ;;  %4206 = vst.msk [vmem:[%s6169_s14 + $0x430] sm:$0xff] %vm1264_vm1, %v4092_v46  ;;  %v5175_v61 = vpop.f32.mrb[96].mxu1 }
 0x28c   : > { %v4138_v25 = vadd.f32 -1.0, %v1576_v49  ;;  %v1578_v62 = vpop.f32.mrb[95].mxu0  ;;  %4622 = vmatmul.mubr.msk.f32.gmra.mrb[200].mxu0 %vm205_vm0, %v6477_v5  ;;  %v4101_v22 = vadd.f32 -1.0, %v5175_v61  ;;  %v1777_v18 = vpop.f32.mrb[97].mxu1  ;;  %5284 = vmatmul.mubr.msk.f32.vlgmr.msra.gmra.mrb[202].mxu1 %vm205_vm0, %v6536_v52 }
 0x28d   : > { %v4139_v51 = vadd.f32 -1.0, %v1578_v62  ;;  %3110 = vmatprep.mubr.f32.mxu0 %v5488_v0  ;;  %v4098_v54 = vadd.f32 -1.0, %v1777_v18  ;;  %5286 = vmatprep.mubr.msk.f32.mxu1 %vm205_vm0, %v6556_v53 }
 0x28e   : > { %4252 = vst [vmem:[%s6169_s14 + $0x5a0] sm:$0xff] %v4138_v25  ;;  %4215 = vst.msk [vmem:[%s6169_s14 + $0x478] sm:$0xff] %vm1264_vm1, %v4101_v22 }
 0x28f   : > { %4253 = vst [vmem:[%s6169_s14 + $0x5a8] sm:$0xff] %v4139_v51  ;;  %v1582_v1 = vpop.f32.mrb[96].mxu0  ;;  %4212 = vst.msk [vmem:[%s6169_s14 + $0x460] sm:$0xff] %vm1264_vm1, %v4098_v54  ;;  %v5178_v6 = vpop.f32.mrb[98].mxu1 }
 0x290   : > { %v4141_v52 = vadd.f32 -1.0, %v1582_v1  ;;  %v1584_v55 = vpop.f32.mrb[97].mxu0  ;;  %4623 = vmatmul.mubr.msk.f32.gmra.mrb[202].mxu0 %vm205_vm0, %v6503_v34  ;;  %v4107_v38 = vadd.f32 -1.0, %v5178_v6  ;;  %v1787_v30 = vpop.f32.mrb[99].mxu1  ;;  %5287 = vmatmul.mubr.msk.f32.gmra.mrb[204].mxu1 %vm205_vm0, %v6576_v48 }
 0x291   : > { %v4142_v53 = vadd.f32 -1.0, %v1584_v55  ;;  %3116 = vmatprep.mubr.f32.mxu0 %v5488_v0  ;;  %v4104_v9 = vadd.f32 -1.0, %v1787_v30  ;;  %5289 = vmatprep.mubr.msk.f32.mxu1 %vm205_vm0, %v6596_v28 }
 0x292   : > { %4255 = vst [vmem:[%s6169_s14 + $0x5b8] sm:$0xff] %v4141_v52  ;;  %4221 = vst.msk [vmem:[%s6169_s14 + $0x4a8] sm:$0xff] %vm1264_vm1, %v4107_v38 }
 0x293   : > { %4256 = vst [vmem:[%s6169_s14 + $0x5c0] sm:$0xff] %v4142_v53  ;;  %v1588_v56 = vpop.f32.mrb[98].mxu0  ;;  %4218 = vst.msk [vmem:[%s6169_s14 + $0x490] sm:$0xff] %vm1264_vm1, %v4104_v9  ;;  %v5181_v10 = vpop.f32.mrb[100].mxu1 }
 0x294   : > { %v4144_v48 = vadd.f32 -1.0, %v1588_v56  ;;  %v1590_v21 = vpop.f32.mrb[99].mxu0  ;;  %4624 = vmatmul.mubr.msk.f32.gmra.mrb[204].mxu0 %vm205_vm0, %v6523_v13  ;;  %v4113_v57 = vadd.f32 -1.0, %v5181_v10  ;;  %v1797_v12 = vpop.f32.mrb[101].mxu1  ;;  %5290 = vmatmul.mubr.msk.f32.gmra.mrb[206].mxu1 %vm205_vm0, %v6616_v11 }
 0x295   : > { %v4145_v28 = vadd.f32 -1.0, %v1590_v21  ;;  %3122 = vmatprep.mubr.f32.mxu0 %v5488_v0  ;;  %v4110_v42 = vadd.f32 -1.0, %v1797_v12  ;;  %5292 = vmatprep.mubr.msk.f32.mxu1 %vm205_vm0, %v6636_v14 }
 0x296   : > { %4258 = vst [vmem:[%s6169_s14 + $0x5d0] sm:$0xff] %v4144_v48  ;;  %4227 = vst.msk [vmem:[%s6169_s14 + $0x4d8] sm:$0xff] %vm1264_vm1, %v4113_v57 }
 0x297   : > { %4259 = vst [vmem:[%s6169_s14 + $0x5d8] sm:$0xff] %v4145_v28  ;;  %v1594_v39 = vpop.f32.mrb[100].mxu0  ;;  %4224 = vst.msk [vmem:[%s6169_s14 + $0x4c0] sm:$0xff] %vm1264_vm1, %v4110_v42  ;;  %v5184_v58 = vpop.f32.mrb[102].mxu1 }
 0x298   : > { %v4147_v11 = vadd.f32 -1.0, %v1594_v39  ;;  %v1596_v41 = vpop.f32.mrb[101].mxu0  ;;  %4625 = vmatmul.mubr.msk.f32.gmra.mrb[206].mxu0 %vm205_vm0, %v6543_v59  ;;  %v4119_v19 = vadd.f32 -1.0, %v5184_v58  ;;  %v1807_v43 = vpop.f32.mrb[103].mxu1  ;;  %5293 = vmatmul.mubr.msk.f32.gmra.mrb[208].mxu1 %vm205_vm0, %v6656_v17 }
 0x299   : > { %v4148_v14 = vadd.f32 -1.0, %v1596_v41  ;;  %3128 = vmatprep.mubr.f32.mxu0 %v5488_v0  ;;  %v4116_v44 = vadd.f32 -1.0, %v1807_v43  ;;  %5295 = vmatprep.mubr.msk.f32.mxu1 %vm205_vm0, %v6676_v24 }
 0x29a   : > { %4261 = vst [vmem:[%s6169_s14 + $0x5e8] sm:$0xff] %v4147_v11  ;;  %4233 = vst.msk [vmem:[%s6169_s14 + $0x508] sm:$0xff] %vm1264_vm1, %v4119_v19 }
 0x29b   : > { %4262 = vst [vmem:[%s6169_s14 + $0x5f0] sm:$0xff] %v4148_v14  ;;  %v1600_v16 = vpop.f32.mrb[102].mxu0  ;;  %4230 = vst.msk [vmem:[%s6169_s14 + $0x4f0] sm:$0xff] %vm1264_vm1, %v4116_v44  ;;  %v5187_v46 = vpop.f32.mrb[104].mxu1 }
 0x29c   : > { %v4150_v17 = vadd.f32 -1.0, %v1600_v16  ;;  %v1602_v49 = vpop.f32.mrb[103].mxu0  ;;  %4626 = vmatmul.mubr.msk.f32.gmra.mrb[208].mxu0 %vm205_vm0, %v6563_v20  ;;  %v4125_v61 = vadd.f32 -1.0, %v5187_v46  ;;  %v1817_v25 = vpop.f32.mrb[105].mxu1  ;;  %5296 = vmatmul.mubr.msk.f32.gmra.mrb[210].mxu1 %vm205_vm0, %v6696_v23 }
 0x29d   : > { %v4151_v24 = vadd.f32 -1.0, %v1602_v49  ;;  %3134 = vmatprep.mubr.f32.mxu0 %v5488_v0  ;;  %v4122_v62 = vadd.f32 -1.0, %v1817_v25  ;;  %5298 = vmatprep.mubr.msk.f32.mxu1 %vm205_vm0, %v6716_v37 }
 0x29e   : > { %4264 = vst [vmem:[%s6169_s14 + $0x600] sm:$0xff] %v4150_v17  ;;  %4239 = vst.msk [vmem:[%s6169_s14 + $0x538] sm:$0xff] %vm1264_vm1, %v4125_v61 }
 0x29f   : > { %4265 = vst [vmem:[%s6169_s14 + $0x608] sm:$0xff] %v4151_v24  ;;  %v1606_v22 = vpop.f32.mrb[104].mxu0  ;;  %4236 = vst.msk [vmem:[%s6169_s14 + $0x520] sm:$0xff] %vm1264_vm1, %v4122_v62  ;;  %v5190_v18 = vpop.f32.mrb[106].mxu1 }
 0x2a0   : > { %v4153_v23 = vadd.f32 -1.0, %v1606_v22  ;;  %v1608_v51 = vpop.f32.mrb[105].mxu0  ;;  %4627 = vmatmul.mubr.msk.f32.gmra.mrb[210].mxu0 %vm205_vm0, %v6583_v4  ;;  %v4131_v54 = vadd.f32 -1.0, %v5190_v18  ;;  %v1827_v1 = vpop.f32.mrb[107].mxu1  ;;  %5299 = vmatmul.mubr.msk.f32.gmra.mrb[212].mxu1 %vm205_vm0, %v6736_v47 }
 0x2a1   : > { %v4154_v37 = vadd.f32 -1.0, %v1608_v51  ;;  %3140 = vmatprep.mubr.f32.mxu0 %v5488_v0  ;;  %v4128_v6 = vadd.f32 -1.0, %v1827_v1  ;;  %5301 = vmatprep.mubr.msk.f32.mxu1 %vm205_vm0, %v6756_v27 }
 0x2a2   : > { %4267 = vst [vmem:[%s6169_s14 + $0x618] sm:$0xff] %v4153_v23  ;;  %4245 = vst.msk [vmem:[%s6169_s14 + $0x568] sm:$0xff] %vm1264_vm1, %v4131_v54 }
 0x2a3   : > { %4268 = vst [vmem:[%s6169_s14 + $0x620] sm:$0xff] %v4154_v37  ;;  %v1612_v52 = vpop.f32.mrb[106].mxu0  ;;  %4242 = vst.msk [vmem:[%s6169_s14 + $0x550] sm:$0xff] %vm1264_vm1, %v4128_v6  ;;  %v5193_v55 = vpop.f32.mrb[108].mxu1 }
 0x2a4   : > { %v4156_v47 = vadd.f32 -1.0, %v1612_v52  ;;  %v1614_v38 = vpop.f32.mrb[107].mxu0  ;;  %4628 = vmatmul.mubr.msk.f32.gmra.mrb[212].mxu0 %vm205_vm0, %v6603_v50  ;;  %v4137_v30 = vadd.f32 -1.0, %v5193_v55  ;;  %v1837_v53 = vpop.f32.mrb[109].mxu1  ;;  %5302 = vmatmul.mubr.msk.f32.gmra.mrb[214].mxu1 %vm205_vm0, %v6776_v26 }
 0x2a5   : > { %v4157_v27 = vadd.f32 -1.0, %v1614_v38  ;;  %3146 = vmatprep.mubr.f32.mxu0 %v5488_v0  ;;  %v4134_v9 = vadd.f32 -1.0, %v1837_v53  ;;  %5304 = vmatprep.mubr.msk.f32.mxu1 %vm205_vm0, %v6409_v31 }
 0x2a6   : > { %4270 = vst [vmem:[%s6169_s14 + $0x630] sm:$0xff] %v4156_v47  ;;  %4251 = vst.msk [vmem:[%s6169_s14 + $0x598] sm:$0xff] %vm1264_vm1, %v4137_v30 }
 0x2a7   : > { %4271 = vst [vmem:[%s6169_s14 + $0x638] sm:$0xff] %v4157_v27  ;;  %v1618_v56 = vpop.f32.mrb[108].mxu0  ;;  %4248 = vst.msk [vmem:[%s6169_s14 + $0x580] sm:$0xff] %vm1264_vm1, %v4134_v9  ;;  %v5196_v10 = vpop.f32.mrb[110].mxu1 }
 0x2a8   : > { %v4159_v26 = vadd.f32 -1.0, %v1618_v56  ;;  %v1620_v48 = vpop.f32.mrb[109].mxu0  ;;  %4629 = vmatmul.mubr.msk.f32.gmra.mrb[214].mxu0 %vm205_vm0, %v6623_v29  ;;  %v4143_v21 = vadd.f32 -1.0, %v5196_v10  ;;  %v1847_v57 = vpop.f32.mrb[111].mxu1  ;;  %5305 = vmatmul.mubr.msk.f32.gmra.mrb[216].mxu1 %vm205_vm0, %v6427_v45 }
 0x2a9   : > { %v4160_v31 = vadd.f32 -1.0, %v1620_v48  ;;  %3152 = vmatprep.mubr.f32.mxu0 %v5488_v0  ;;  %v4140_v12 = vadd.f32 -1.0, %v1847_v57  ;;  %5307 = vmatprep.mubr.msk.f32.mxu1 %vm205_vm0, %v6445_v32 }
 0x2aa   : > { %4273 = vst [vmem:[%s6169_s14 + $0x648] sm:$0xff] %v4159_v26  ;;  %4257 = vst.msk [vmem:[%s6169_s14 + $0x5c8] sm:$0xff] %vm1264_vm1, %v4143_v21 }
 0x2ab   : > { %4274 = vst [vmem:[%s6169_s14 + $0x650] sm:$0xff] %v4160_v31  ;;  %v1624_v28 = vpop.f32.mrb[110].mxu0  ;;  %4254 = vst.msk [vmem:[%s6169_s14 + $0x5b0] sm:$0xff] %vm1264_vm1, %v4140_v12  ;;  %v5199_v42 = vpop.f32.mrb[112].mxu1 }
 0x2ac   : > { %v4162_v45 = vadd.f32 -1.0, %v1624_v28  ;;  %v1626_v39 = vpop.f32.mrb[111].mxu0  ;;  %4630 = vmatmul.mubr.msk.f32.gmra.mrb[216].mxu0 %vm205_vm0, %v6643_v15  ;;  %v4149_v58 = vadd.f32 -1.0, %v5199_v42  ;;  %v1857_v11 = vpop.f32.mrb[113].mxu1  ;;  %5308 = vmatmul.mubr.msk.f32.gmra.mrb[218].mxu1 %vm205_vm0, %v6461_v35 }
 0x2ad   : > { %v4163_v32 = vadd.f32 -1.0, %v1626_v39  ;;  %3158 = vmatprep.mubr.f32.mxu0 %v5488_v0  ;;  %v4146_v41 = vadd.f32 -1.0, %v1857_v11  ;;  %5310 = vmatprep.mubr.msk.f32.mxu1 %vm205_vm0, %v6477_v5 }
 0x2ae   : > { %4276 = vst [vmem:[%s6169_s14 + $0x660] sm:$0xff] %v4162_v45  ;;  %4263 = vst.msk [vmem:[%s6169_s14 + $0x5f8] sm:$0xff] %vm1264_vm1, %v4149_v58 }
 0x2af   : > { %4277 = vst [vmem:[%s6169_s14 + $0x668] sm:$0xff] %v4163_v32  ;;  %v1630_v19 = vpop.f32.mrb[112].mxu0  ;;  %4260 = vst.msk [vmem:[%s6169_s14 + $0x5e0] sm:$0xff] %vm1264_vm1, %v4146_v41  ;;  %v5202_v43 = vpop.f32.mrb[114].mxu1 }
 0x2b0   : > { %v4165_v35 = vadd.f32 -1.0, %v1630_v19  ;;  %v1632_v14 = vpop.f32.mrb[113].mxu0  ;;  %4631 = vmatmul.mubr.msk.f32.gmra.mrb[218].mxu0 %vm205_vm0, %v6663_v63  ;;  %v4155_v44 = vadd.f32 -1.0, %v5202_v43  ;;  %v1867_v16 = vpop.f32.mrb[115].mxu1  ;;  %5311 = vmatmul.mubr.msk.f32.gmra.mrb[220].mxu1 %vm205_vm0, %v6503_v34 }
 0x2b1   : > { %v4166_v5 = vadd.f32 -1.0, %v1632_v14  ;;  %3164 = vmatprep.mubr.f32.mxu0 %v5488_v0  ;;  %v4152_v46 = vadd.f32 -1.0, %v1867_v16  ;;  %5313 = vmatprep.mubr.msk.f32.mxu1 %vm205_vm0, %v6523_v13 }
 0x2b2   : > { %4279 = vst [vmem:[%s6169_s14 + $0x678] sm:$0xff] %v4165_v35  ;;  %4269 = vst.msk [vmem:[%s6169_s14 + $0x628] sm:$0xff] %vm1264_vm1, %v4155_v44 }
 0x2b3   : > { %4280 = vst [vmem:[%s6169_s14 + $0x680] sm:$0xff] %v4166_v5  ;;  %v1636_v17 = vpop.f32.mrb[114].mxu0  ;;  %4266 = vst.msk [vmem:[%s6169_s14 + $0x610] sm:$0xff] %vm1264_vm1, %v4152_v46  ;;  %v5205_v49 = vpop.f32.mrb[116].mxu1 }
 0x2b4   : > { %v4168_v34 = vadd.f32 -1.0, %v1636_v17  ;;  %v1638_v61 = vpop.f32.mrb[115].mxu0  ;;  %4632 = vmatmul.mubr.msk.f32.gmra.mrb[220].mxu0 %vm205_vm0, %v6683_v3  ;;  %v4161_v25 = vadd.f32 -1.0, %v5205_v49  ;;  %v1877_v24 = vpop.f32.mrb[117].mxu1  ;;  %5314 = vmatmul.mubr.msk.f32.gmra.mrb[222].mxu1 %vm205_vm0, %v6543_v59 }
 0x2b5   : > { %v4169_v13 = vadd.f32 -1.0, %v1638_v61  ;;  %3170 = vmatprep.mubr.f32.mxu0 %v5488_v0  ;;  %v4158_v62 = vadd.f32 -1.0, %v1877_v24  ;;  %5316 = vmatprep.mubr.msk.f32.mxu1 %vm205_vm0, %v6563_v20 }
 0x2b6   : > { %4282 = vst [vmem:[%s6169_s14 + $0x690] sm:$0xff] %v4168_v34  ;;  %4275 = vst.msk [vmem:[%s6169_s14 + $0x658] sm:$0xff] %vm1264_vm1, %v4161_v25  ;;  %v5443_v34 = vld [vmem:[%s7386_s0 + $0x120] sm:$0xff] }
 0x2b7   : > { %4283 = vst [vmem:[%s6169_s14 + $0x698] sm:$0xff] %v4169_v13  ;;  %v1642_v22 = vpop.f32.mrb[116].mxu0  ;;  %4272 = vst.msk [vmem:[%s6169_s14 + $0x640] sm:$0xff] %vm1264_vm1, %v4158_v62  ;;  %v5208_v18 = vpop.f32.mrb[118].mxu1 }
 0x2b8   : > { %v4171_v59 = vadd.f32 -1.0, %v1642_v22  ;;  %v1644_v23 = vpop.f32.mrb[117].mxu0  ;;  %4633 = vmatmul.mubr.msk.f32.gmra.mrb[222].mxu0 %vm205_vm0, %v6703_v33  ;;  %v4167_v51 = vadd.f32 -1.0, %v5208_v18  ;;  %v1887_v54 = vpop.f32.mrb[119].mxu1  ;;  %5317 = vmatmul.mubr.msk.f32.gmra.mrb[224].mxu1 %vm205_vm0, %v6583_v4  ;;  %v5444_v22 = vld [vmem:[%s7386_s0 + $0x128] sm:$0x7] }
 0x2b9   : > { %v4172_v20 = vadd.f32 -1.0, %v1644_v23  ;;  %3176 = vmatprep.mubr.f32.mxu0 %v5488_v0  ;;  %v4164_v1 = vadd.f32 -1.0, %v1887_v54  ;;  %5319 = vmatprep.mubr.msk.f32.mxu1 %vm205_vm0, %v6603_v50 }
 0x2ba   : > { %4285 = vst [vmem:[%s6169_s14 + $0x6a8] sm:$0xff] %v4171_v59  ;;  %4281 = vst.msk [vmem:[%s6169_s14 + $0x688] sm:$0xff] %vm1264_vm1, %v4167_v51 }
 0x2bb   : > { %4286 = vst [vmem:[%s6169_s14 + $0x6b0] sm:$0xff] %v4172_v20  ;;  %v1648_v37 = vpop.f32.mrb[118].mxu0  ;;  %4278 = vst.msk [vmem:[%s6169_s14 + $0x670] sm:$0xff] %vm1264_vm1, %v4164_v1  ;;  %v5211_v6 = vpop.f32.mrb[120].mxu1 }
 0x2bc   : > { %v4174_v4 = vadd.f32 -1.0, %v1648_v37  ;;  %v1650_v52 = vpop.f32.mrb[119].mxu0  ;;  %4634 = vmatmul.mubr.msk.f32.gmra.mrb[224].mxu0 %vm205_vm0, %v6723_v40  ;;  %v4173_v55 = vadd.f32 -1.0, %v5211_v6  ;;  %v1897_v47 = vpop.f32.mrb[121].mxu1  ;;  %5320 = vmatmul.mubr.msk.f32.gmra.mrb[226].mxu1 %vm205_vm0, %v6623_v29 }
 0x2bd   : > { %v4175_v50 = vadd.f32 -1.0, %v1650_v52  ;;  %3182 = vmatprep.mubr.f32.mxu0 %v5488_v0  ;;  %v4170_v38 = vadd.f32 -1.0, %v1897_v47  ;;  %5322 = vmatprep.mubr.msk.f32.mxu1 %vm205_vm0, %v6643_v15 }
 0x2be   : > { %4288 = vst [vmem:[%s6169_s14 + $0x6c0] sm:$0xff] %v4174_v4  ;;  %4287 = vst.msk [vmem:[%s6169_s14 + $0x6b8] sm:$0xff] %vm1264_vm1, %v4173_v55 }
 0x2bf   : > { %4289 = vst [vmem:[%s6169_s14 + $0x6c8] sm:$0xff] %v4175_v50  ;;  %v1654_v30 = vpop.f32.mrb[120].mxu0  ;;  %4284 = vst.msk [vmem:[%s6169_s14 + $0x6a0] sm:$0xff] %vm1264_vm1, %v4170_v38  ;;  %v5214_v53 = vpop.f32.mrb[122].mxu1 }
 0x2c0   : > { %v4177_v29 = vadd.f32 -1.0, %v1654_v30  ;;  %v1656_v27 = vpop.f32.mrb[121].mxu0  ;;  %4635 = vmatmul.mubr.msk.f32.gmra.mrb[226].mxu0 %vm205_vm0, %v6743_v2  ;;  %v4179_v9 = vadd.f32 -1.0, %v5214_v53  ;;  %v1907_v56 = vpop.f32.mrb[123].mxu1  ;;  %5323 = vmatmul.mubr.msk.f32.gmra.mrb[228].mxu1 %vm205_vm0, %v6663_v63 }
 0x2c1   : > { %v4178_v15 = vadd.f32 -1.0, %v1656_v27  ;;  %3188 = vmatprep.mubr.f32.mxu0 %v5488_v0  ;;  %v4176_v10 = vadd.f32 -1.0, %v1907_v56  ;;  %5325 = vmatprep.mubr.msk.f32.mxu1 %vm205_vm0, %v6683_v3 }
 0x2c2   : > { %4291 = vst [vmem:[%s6169_s14 + $0x6d8] sm:$0xff] %v4177_v29  ;;  %4293 = vst.msk [vmem:[%s6169_s14 + $0x6e8] sm:$0xff] %vm1264_vm1, %v4179_v9 }
 0x2c3   : > { %4292 = vst [vmem:[%s6169_s14 + $0x6e0] sm:$0xff] %v4178_v15  ;;  %v1660_v26 = vpop.f32.mrb[122].mxu0  ;;  %4290 = vst.msk [vmem:[%s6169_s14 + $0x6d0] sm:$0xff] %vm1264_vm1, %v4176_v10  ;;  %v5217_v48 = vpop.f32.mrb[124].mxu1 }
 0x2c4   : > { %v4180_v63 = vadd.f32 -1.0, %v1660_v26  ;;  %v1662_v21 = vpop.f32.mrb[123].mxu0  ;;  %4636 = vmatmul.mubr.msk.f32.gmra.mrb[228].mxu0 %vm205_vm0, %v6763_v8  ;;  %v4185_v57 = vadd.f32 -1.0, %v5217_v48  ;;  %v1917_v31 = vpop.f32.mrb[125].mxu1  ;;  %5326 = vmatmul.mubr.msk.f32.gmra.mrb[230].mxu1 %vm205_vm0, %v6703_v33 }
 0x2c5   : > { %v4181_v3 = vadd.f32 -1.0, %v1662_v21  ;;  %3194 = vmatprep.mubr.f32.mxu0 %v5488_v0  ;;  %v4182_v12 = vadd.f32 -1.0, %v1917_v31  ;;  %5328 = vmatprep.mubr.msk.f32.mxu1 %vm205_vm0, %v6723_v40 }
 0x2c6   : > { %4294 = vst [vmem:[%s6169_s14 + $0x6f0] sm:$0xff] %v4180_v63  ;;  %4299 = vst.msk [vmem:[%s6169_s14 + $0x718] sm:$0x7] %vm1376_vm2, %v4185_v57 }
 0x2c7   : > { %4295 = vst [vmem:[%s6169_s14 + $0x6f8] sm:$0xff] %v4181_v3  ;;  %v1666_v28 = vpop.f32.mrb[124].mxu0  ;;  %4296 = vst.msk [vmem:[%s6169_s14 + $0x700] sm:$0xff] %vm1264_vm1, %v4182_v12  ;;  %v2221_v42 = vpop.f32.mrb[126].mxu1 }
 0x2c8   : > { %v4183_v33 = vadd.f32 -1.0, %v1666_v28  ;;  %v1668_v45 = vpop.f32.mrb[125].mxu0  ;;  %4637 = vmatmul.mubr.msk.f32.gmra.mrb[230].mxu0 %vm205_vm0, %v6783_v36  ;;  %v4376_v39 = vadd.f32 -1.0, %v2221_v42  ;;  %v2223_v58 = vpop.f32.mrb[127].mxu1  ;;  %5329 = vmatmul.mubr.msk.f32.gmra.mrb[232].mxu1 %vm205_vm0, %v6743_v2 }
 0x2c9   : > { %v4184_v40 = vadd.f32 -1.0, %v1668_v45  ;;  %3200 = vmatprep.mubr.f32.mxu0 %v5488_v0  ;;  %v4377_v11 = vadd.f32 -1.0, %v2223_v58  ;;  %5331 = vmatprep.mubr.msk.f32.mxu1 %vm205_vm0, %v6763_v8 }
 0x2ca   : > { %4297 = vst [vmem:[%s6169_s14 + $0x708] sm:$0x7] %v4183_v33  ;;  %4490 = vst [vmem:[%s6169_s14 + $0x720] sm:$0xff] %v4376_v39 }
 0x2cb   : > { %4298 = vst [vmem:[%s6169_s14 + $0x710] sm:$0x7] %v4184_v40  ;;  %v5224_v32 = vpop.f32.mrb[126].mxu0  ;;  %4491 = vst [vmem:[%s6169_s14 + $0x728] sm:$0xff] %v4377_v11  ;;  %v2227_v41 = vpop.f32.mrb[128].mxu1 }
 0x2cc   : > { %v4381_v19 = vadd.f32 -1.0, %v5224_v32  ;;  %v2514_v43 = vpop.f32.mrb[127].mxu0  ;;  %4638 = vmatmul.mubr.msk.f32.gmra.mrb[232].mxu0 %vm205_vm0, %v6798_v60  ;;  %v4379_v2 = vadd.f32 -1.0, %v2227_v41  ;;  %v2229_v35 = vpop.f32.mrb[129].mxu1  ;;  %5332 = vmatmul.mubr.msk.f32.gmra.mrb[234].mxu1 %vm205_vm0, %v6783_v36 }
 0x2cd   : > { %v4378_v8 = vadd.f32 -1.0, %v2514_v43  ;;  %3206 = vmatprep.mubr.f32.mxu0 %v5488_v0  ;;  %v4380_v14 = vadd.f32 -1.0, %v2229_v35  ;;  %5334 = vmatprep.mubr.msk.f32.mxu1 %vm205_vm0, %v6798_v60 }
 0x2ce   : > { %4495 = vst.msk [vmem:[%s6169_s14 + $0x748] sm:$0xff] %vm1264_vm1, %v4381_v19  ;;  %4493 = vst [vmem:[%s6169_s14 + $0x738] sm:$0xff] %v4379_v2 }
 0x2cf   : > { %4492 = vst.msk [vmem:[%s6169_s14 + $0x730] sm:$0xff] %vm1264_vm1, %v4378_v8  ;;  %v5227_v44 = vpop.f32.mrb[128].mxu0  ;;  %4494 = vst [vmem:[%s6169_s14 + $0x740] sm:$0xff] %v4380_v14  ;;  %v2233_v16 = vpop.f32.mrb[130].mxu1 }
 0x2d0   : > { %v4387_v36 = vadd.f32 -1.0, %v5227_v44  ;;  %v2524_v5 = vpop.f32.mrb[129].mxu0  ;;  %4639 = vmatmul.mubr.msk.f32.gmra.mrb[234].mxu0 %vm205_vm0, %v6815_v7  ;;  %v4382_v46 = vadd.f32 -1.0, %v2233_v16  ;;  %v2235_v17 = vpop.f32.mrb[131].mxu1  ;;  %5335 = vmatmul.mubr.msk.f32.gmra.mrb[236].mxu1 %vm205_vm0, %v6815_v7 }
 0x2d1   : > { %v4384_v60 = vadd.f32 -1.0, %v2524_v5  ;;  %3212 = vmatprep.mubr.f32.mxu0 %v5488_v0  ;;  %v4383_v49 = vadd.f32 -1.0, %v2235_v17  ;;  %5337 = vmatprep.mubr.msk.f32.mxu1 %vm205_vm0, %v5443_v34 }
 0x2d2   : > { %4501 = vst.msk [vmem:[%s6169_s14 + $0x778] sm:$0xff] %vm1264_vm1, %v4387_v36  ;;  %4496 = vst [vmem:[%s6169_s14 + $0x750] sm:$0xff] %v4382_v46 }
 0x2d3   : > { %4498 = vst.msk [vmem:[%s6169_s14 + $0x760] sm:$0xff] %vm1264_vm1, %v4384_v60  ;;  %v5230_v61 = vpop.f32.mrb[130].mxu0  ;;  %4497 = vst [vmem:[%s6169_s14 + $0x758] sm:$0xff] %v4383_v49  ;;  %v2239_v7 = vpop.f32.mrb[132].mxu1 }
 0x2d4   : > { %v4393_v25 = vadd.f32 -1.0, %v5230_v61  ;;  %v2534_v24 = vpop.f32.mrb[131].mxu0  ;;  %4640 = vmatmul.mubr.msk.f32.gmra.mrb[236].mxu0 %vm205_vm0, %v5443_v34  ;;  %v4385_v13 = vadd.f32 -1.0, %v2239_v7  ;;  %v2241_v62 = vpop.f32.mrb[133].mxu1  ;;  %5338 = vmatmul.mubr.msk.f32.gmra.mrb[238].mxu1 %vm205_vm0, %v5444_v22 }
 0x2d5   : > { %v4390_v18 = vadd.f32 -1.0, %v2534_v24  ;;  %3218 = vmatprep.mubr.f32.mxu0 %v5488_v0  ;;  %v4386_v59 = vadd.f32 -1.0, %v2241_v62 }
 0x2d6   : > { %4507 = vst.msk [vmem:[%s6169_s14 + $0x7a8] sm:$0xff] %vm1264_vm1, %v4393_v25  ;;  %4499 = vst [vmem:[%s6169_s14 + $0x768] sm:$0xff] %v4385_v13 }
 0x2d7   : > { %4504 = vst.msk [vmem:[%s6169_s14 + $0x790] sm:$0xff] %vm1264_vm1, %v4390_v18  ;;  %v5233_v23 = vpop.f32.mrb[132].mxu0  ;;  %4500 = vst [vmem:[%s6169_s14 + $0x770] sm:$0xff] %v4386_v59  ;;  %v2245_v51 = vpop.f32.mrb[134].mxu1 }
 0x2d8   : > { %v4399_v54 = vadd.f32 -1.0, %v5233_v23  ;;  %v2544_v20 = vpop.f32.mrb[133].mxu0  ;;  %4641 = vmatmul.mubr.msk.f32.gmra.mrb[238].mxu0 %vm205_vm0, %v5444_v22  ;;  %v4388_v1 = vadd.f32 -1.0, %v2245_v51  ;;  %v2247_v37 = vpop.f32.mrb[135].mxu1 }
 0x2d9   : > { %v4396_v0 = vadd.f32 -1.0, %v2544_v20  ;;  %v4389_v6 = vadd.f32 -1.0, %v2247_v37 }
 0x2da   : > { %4513 = vst.msk [vmem:[%s6169_s14 + $0x7d8] sm:$0xff] %vm1264_vm1, %v4399_v54  ;;  %4502 = vst [vmem:[%s6169_s14 + $0x780] sm:$0xff] %v4388_v1 }
 0x2db   : > { %4510 = vst.msk [vmem:[%s6169_s14 + $0x7c0] sm:$0xff] %vm1264_vm1, %v4396_v0  ;;  %v5236_v4 = vpop.f32.mrb[134].mxu0  ;;  %4503 = vst [vmem:[%s6169_s14 + $0x788] sm:$0xff] %v4389_v6  ;;  %v2251_v52 = vpop.f32.mrb[136].mxu1 }
 0x2dc   : > { %v4405_v55 = vadd.f32 -1.0, %v5236_v4  ;;  %v2554_v47 = vpop.f32.mrb[135].mxu0  ;;  %v4391_v50 = vadd.f32 -1.0, %v2251_v52  ;;  %v2253_v38 = vpop.f32.mrb[137].mxu1 }
 0x2dd   : > { %v4402_v30 = vadd.f32 -1.0, %v2554_v47  ;;  %v4392_v53 = vadd.f32 -1.0, %v2253_v38 }
 0x2de   : > { %4519 = vst.msk [vmem:[%s6169_s14 + $0x808] sm:$0xff] %vm1264_vm1, %v4405_v55  ;;  %4505 = vst [vmem:[%s6169_s14 + $0x798] sm:$0xff] %v4391_v50 }
 0x2df   : > { %4516 = vst.msk [vmem:[%s6169_s14 + $0x7f0] sm:$0xff] %vm1264_vm1, %v4402_v30  ;;  %v5239_v29 = vpop.f32.mrb[136].mxu0  ;;  %4506 = vst [vmem:[%s6169_s14 + $0x7a0] sm:$0xff] %v4392_v53  ;;  %v2257_v27 = vpop.f32.mrb[138].mxu1 }
 0x2e0   : > { %v4411_v9 = vadd.f32 -1.0, %v5239_v29  ;;  %v2564_v56 = vpop.f32.mrb[137].mxu0  ;;  %v4394_v15 = vadd.f32 -1.0, %v2257_v27  ;;  %v2259_v10 = vpop.f32.mrb[139].mxu1 }
 0x2e1   : > { %v4408_v26 = vadd.f32 -1.0, %v2564_v56  ;;  %v4395_v48 = vadd.f32 -1.0, %v2259_v10 }
 0x2e2   : > { %4525 = vst.msk [vmem:[%s6169_s14 + $0x838] sm:$0xff] %vm1264_vm1, %v4411_v9  ;;  %4508 = vst [vmem:[%s6169_s14 + $0x7b0] sm:$0xff] %v4394_v15 }
 0x2e3   : > { %4522 = vst.msk [vmem:[%s6169_s14 + $0x820] sm:$0xff] %vm1264_vm1, %v4408_v26  ;;  %v5242_v63 = vpop.f32.mrb[138].mxu0  ;;  %4509 = vst [vmem:[%s6169_s14 + $0x7b8] sm:$0xff] %v4395_v48  ;;  %v2263_v21 = vpop.f32.mrb[140].mxu1 }
 0x2e4   : > { %v4417_v57 = vadd.f32 -1.0, %v5242_v63  ;;  %v2574_v31 = vpop.f32.mrb[139].mxu0  ;;  %v4397_v3 = vadd.f32 -1.0, %v2263_v21  ;;  %v2265_v12 = vpop.f32.mrb[141].mxu1 }
 0x2e5   : > { %v4414_v28 = vadd.f32 -1.0, %v2574_v31  ;;  %v4398_v42 = vadd.f32 -1.0, %v2265_v12 }
 0x2e6   : > { %4531 = vst.msk [vmem:[%s6169_s14 + $0x868] sm:$0xff] %vm1264_vm1, %v4417_v57  ;;  %4511 = vst [vmem:[%s6169_s14 + $0x7c8] sm:$0xff] %v4397_v3 }
 0x2e7   : > { %4528 = vst.msk [vmem:[%s6169_s14 + $0x850] sm:$0xff] %vm1264_vm1, %v4414_v28  ;;  %v5245_v33 = vpop.f32.mrb[140].mxu0  ;;  %4512 = vst [vmem:[%s6169_s14 + $0x7d0] sm:$0xff] %v4398_v42  ;;  %v2269_v45 = vpop.f32.mrb[142].mxu1 }
 0x2e8   : > { %v4423_v39 = vadd.f32 -1.0, %v5245_v33  ;;  %v2584_v58 = vpop.f32.mrb[141].mxu0  ;;  %v4400_v40 = vadd.f32 -1.0, %v2269_v45  ;;  %v2271_v11 = vpop.f32.mrb[143].mxu1 }
 0x2e9   : > { %v4420_v32 = vadd.f32 -1.0, %v2584_v58  ;;  %v4401_v41 = vadd.f32 -1.0, %v2271_v11 }
 0x2ea   : > { %4537 = vst.msk [vmem:[%s6169_s14 + $0x898] sm:$0xff] %vm1264_vm1, %v4423_v39  ;;  %4514 = vst [vmem:[%s6169_s14 + $0x7e0] sm:$0xff] %v4400_v40 }
 0x2eb   : > { %4534 = vst.msk [vmem:[%s6169_s14 + $0x880] sm:$0xff] %vm1264_vm1, %v4420_v32  ;;  %v5248_v19 = vpop.f32.mrb[142].mxu0  ;;  %4515 = vst [vmem:[%s6169_s14 + $0x7e8] sm:$0xff] %v4401_v41  ;;  %v2275_v43 = vpop.f32.mrb[144].mxu1 }
 0x2ec   : > { %v4429_v2 = vadd.f32 -1.0, %v5248_v19  ;;  %v2594_v35 = vpop.f32.mrb[143].mxu0  ;;  %v4403_v8 = vadd.f32 -1.0, %v2275_v43  ;;  %v2277_v14 = vpop.f32.mrb[145].mxu1 }
 0x2ed   : > { %v4426_v44 = vadd.f32 -1.0, %v2594_v35  ;;  %v4404_v16 = vadd.f32 -1.0, %v2277_v14 }
 0x2ee   : > { %4543 = vst.msk [vmem:[%s6169_s14 + $0x8c8] sm:$0xff] %vm1264_vm1, %v4429_v2  ;;  %4517 = vst [vmem:[%s6169_s14 + $0x7f8] sm:$0xff] %v4403_v8 }
 0x2ef   : > { %4540 = vst.msk [vmem:[%s6169_s14 + $0x8b0] sm:$0xff] %vm1264_vm1, %v4426_v44  ;;  %v5251_v36 = vpop.f32.mrb[144].mxu0  ;;  %4518 = vst [vmem:[%s6169_s14 + $0x800] sm:$0xff] %v4404_v16  ;;  %v2281_v5 = vpop.f32.mrb[146].mxu1 }
 0x2f0   : > { %v4435_v46 = vadd.f32 -1.0, %v5251_v36  ;;  %v2604_v17 = vpop.f32.mrb[145].mxu0  ;;  %v4406_v60 = vadd.f32 -1.0, %v2281_v5  ;;  %v2283_v49 = vpop.f32.mrb[147].mxu1 }
 0x2f1   : > { %v4432_v34 = vadd.f32 -1.0, %v2604_v17  ;;  %v4407_v61 = vadd.f32 -1.0, %v2283_v49 }
 0x2f2   : > { %4549 = vst.msk [vmem:[%s6169_s14 + $0x8f8] sm:$0xff] %vm1264_vm1, %v4435_v46  ;;  %4520 = vst [vmem:[%s6169_s14 + $0x810] sm:$0xff] %v4406_v60 }
 0x2f3   : > { %4546 = vst.msk [vmem:[%s6169_s14 + $0x8e0] sm:$0xff] %vm1264_vm1, %v4432_v34  ;;  %v5254_v7 = vpop.f32.mrb[146].mxu0  ;;  %4521 = vst [vmem:[%s6169_s14 + $0x818] sm:$0xff] %v4407_v61  ;;  %v2287_v25 = vpop.f32.mrb[148].mxu1 }
 0x2f4   : > { %v4441_v24 = vadd.f32 -1.0, %v5254_v7  ;;  %v2614_v13 = vpop.f32.mrb[147].mxu0  ;;  %v4409_v62 = vadd.f32 -1.0, %v2287_v25  ;;  %v2289_v22 = vpop.f32.mrb[149].mxu1 }
 0x2f5   : > { %v4438_v18 = vadd.f32 -1.0, %v2614_v13  ;;  %v4410_v59 = vadd.f32 -1.0, %v2289_v22 }
 0x2f6   : > { %4555 = vst.msk [vmem:[%s6169_s14 + $0x928] sm:$0xff] %vm1264_vm1, %v4441_v24  ;;  %4523 = vst [vmem:[%s6169_s14 + $0x828] sm:$0xff] %v4409_v62 }
 0x2f7   : > { %4552 = vst.msk [vmem:[%s6169_s14 + $0x910] sm:$0xff] %vm1264_vm1, %v4438_v18  ;;  %v5257_v23 = vpop.f32.mrb[148].mxu0  ;;  %4524 = vst [vmem:[%s6169_s14 + $0x830] sm:$0xff] %v4410_v59  ;;  %v2293_v51 = vpop.f32.mrb[150].mxu1 }
 0x2f8   : > { %v4447_v54 = vadd.f32 -1.0, %v5257_v23  ;;  %v2624_v20 = vpop.f32.mrb[149].mxu0  ;;  %v4412_v1 = vadd.f32 -1.0, %v2293_v51  ;;  %v2295_v37 = vpop.f32.mrb[151].mxu1 }
 0x2f9   : > { %v4444_v0 = vadd.f32 -1.0, %v2624_v20  ;;  %v4413_v6 = vadd.f32 -1.0, %v2295_v37 }
 0x2fa   : > { %4561 = vst.msk [vmem:[%s6169_s14 + $0x958] sm:$0xff] %vm1264_vm1, %v4447_v54  ;;  %4526 = vst [vmem:[%s6169_s14 + $0x840] sm:$0xff] %v4412_v1 }
 0x2fb   : > { %4558 = vst.msk [vmem:[%s6169_s14 + $0x940] sm:$0xff] %vm1264_vm1, %v4444_v0  ;;  %v5260_v4 = vpop.f32.mrb[150].mxu0  ;;  %4527 = vst [vmem:[%s6169_s14 + $0x848] sm:$0xff] %v4413_v6  ;;  %v2299_v52 = vpop.f32.mrb[152].mxu1 }
 0x2fc   : > { %v4453_v55 = vadd.f32 -1.0, %v5260_v4  ;;  %v2634_v47 = vpop.f32.mrb[151].mxu0  ;;  %v4415_v50 = vadd.f32 -1.0, %v2299_v52  ;;  %v2301_v38 = vpop.f32.mrb[153].mxu1 }
 0x2fd   : > { %v4450_v30 = vadd.f32 -1.0, %v2634_v47  ;;  %v4416_v53 = vadd.f32 -1.0, %v2301_v38 }
 0x2fe   : > { %4567 = vst.msk [vmem:[%s6169_s14 + $0x988] sm:$0xff] %vm1264_vm1, %v4453_v55  ;;  %4529 = vst [vmem:[%s6169_s14 + $0x858] sm:$0xff] %v4415_v50 }
 0x2ff   : > { %4564 = vst.msk [vmem:[%s6169_s14 + $0x970] sm:$0xff] %vm1264_vm1, %v4450_v30  ;;  %v5263_v29 = vpop.f32.mrb[152].mxu0  ;;  %4530 = vst [vmem:[%s6169_s14 + $0x860] sm:$0xff] %v4416_v53  ;;  %v2305_v27 = vpop.f32.mrb[154].mxu1 }
 0x300   : > { %v4459_v9 = vadd.f32 -1.0, %v5263_v29  ;;  %v2644_v56 = vpop.f32.mrb[153].mxu0  ;;  %v4418_v15 = vadd.f32 -1.0, %v2305_v27  ;;  %v2307_v10 = vpop.f32.mrb[155].mxu1 }
 0x301   : > { %v4456_v26 = vadd.f32 -1.0, %v2644_v56  ;;  %v4419_v48 = vadd.f32 -1.0, %v2307_v10 }
 0x302   : > { %4573 = vst.msk [vmem:[%s6169_s14 + $0x9b8] sm:$0xff] %vm1264_vm1, %v4459_v9  ;;  %4532 = vst [vmem:[%s6169_s14 + $0x870] sm:$0xff] %v4418_v15 }
 0x303   : > { %4570 = vst.msk [vmem:[%s6169_s14 + $0x9a0] sm:$0xff] %vm1264_vm1, %v4456_v26  ;;  %v5266_v63 = vpop.f32.mrb[154].mxu0  ;;  %4533 = vst [vmem:[%s6169_s14 + $0x878] sm:$0xff] %v4419_v48  ;;  %v2311_v21 = vpop.f32.mrb[156].mxu1 }
 0x304   : > { %v4465_v57 = vadd.f32 -1.0, %v5266_v63  ;;  %v2654_v31 = vpop.f32.mrb[155].mxu0  ;;  %v4421_v3 = vadd.f32 -1.0, %v2311_v21  ;;  %v2313_v12 = vpop.f32.mrb[157].mxu1 }
 0x305   : > { %v4462_v28 = vadd.f32 -1.0, %v2654_v31  ;;  %v4422_v42 = vadd.f32 -1.0, %v2313_v12 }
 0x306   : > { %4579 = vst.msk [vmem:[%s6169_s14 + $0x9e8] sm:$0xff] %vm1264_vm1, %v4465_v57  ;;  %4535 = vst [vmem:[%s6169_s14 + $0x888] sm:$0xff] %v4421_v3 }
 0x307   : > { %4576 = vst.msk [vmem:[%s6169_s14 + $0x9d0] sm:$0xff] %vm1264_vm1, %v4462_v28  ;;  %v5269_v33 = vpop.f32.mrb[156].mxu0  ;;  %4536 = vst [vmem:[%s6169_s14 + $0x890] sm:$0xff] %v4422_v42  ;;  %v2317_v45 = vpop.f32.mrb[158].mxu1 }
 0x308   : > { %v4471_v39 = vadd.f32 -1.0, %v5269_v33  ;;  %v2664_v58 = vpop.f32.mrb[157].mxu0  ;;  %v4424_v40 = vadd.f32 -1.0, %v2317_v45  ;;  %v2319_v11 = vpop.f32.mrb[159].mxu1 }
 0x309   : > { %v4468_v32 = vadd.f32 -1.0, %v2664_v58  ;;  %v4425_v41 = vadd.f32 -1.0, %v2319_v11 }
 0x30a   : > { %4585 = vst.msk [vmem:[%s6169_s14 + $0xa18] sm:$0xff] %vm1264_vm1, %v4471_v39  ;;  %4538 = vst [vmem:[%s6169_s14 + $0x8a0] sm:$0xff] %v4424_v40 }
 0x30b   : > { %4582 = vst.msk [vmem:[%s6169_s14 + $0xa00] sm:$0xff] %vm1264_vm1, %v4468_v32  ;;  %v5272_v19 = vpop.f32.mrb[158].mxu0  ;;  %4539 = vst [vmem:[%s6169_s14 + $0x8a8] sm:$0xff] %v4425_v41  ;;  %v2323_v43 = vpop.f32.mrb[160].mxu1 }
 0x30c   : > { %v4477_v2 = vadd.f32 -1.0, %v5272_v19  ;;  %v2674_v35 = vpop.f32.mrb[159].mxu0  ;;  %v4427_v8 = vadd.f32 -1.0, %v2323_v43  ;;  %v2325_v14 = vpop.f32.mrb[161].mxu1 }
 0x30d   : > { %v4474_v44 = vadd.f32 -1.0, %v2674_v35  ;;  %v4428_v16 = vadd.f32 -1.0, %v2325_v14 }
 0x30e   : > { %4591 = vst.msk [vmem:[%s6169_s14 + $0xa48] sm:$0xff] %vm1264_vm1, %v4477_v2  ;;  %4541 = vst [vmem:[%s6169_s14 + $0x8b8] sm:$0xff] %v4427_v8 }
 0x30f   : > { %4588 = vst.msk [vmem:[%s6169_s14 + $0xa30] sm:$0xff] %vm1264_vm1, %v4474_v44  ;;  %v5275_v36 = vpop.f32.mrb[160].mxu0  ;;  %4542 = vst [vmem:[%s6169_s14 + $0x8c0] sm:$0xff] %v4428_v16  ;;  %v2329_v5 = vpop.f32.mrb[162].mxu1 }
 0x310   : > { %v4483_v46 = vadd.f32 -1.0, %v5275_v36  ;;  %v2684_v17 = vpop.f32.mrb[161].mxu0  ;;  %v4430_v60 = vadd.f32 -1.0, %v2329_v5  ;;  %v2331_v49 = vpop.f32.mrb[163].mxu1 }
 0x311   : > { %v4480_v34 = vadd.f32 -1.0, %v2684_v17  ;;  %v4431_v61 = vadd.f32 -1.0, %v2331_v49 }
 0x312   : > { %4597 = vst.msk [vmem:[%s6169_s14 + $0xa78] sm:$0xff] %vm1264_vm1, %v4483_v46  ;;  %4544 = vst [vmem:[%s6169_s14 + $0x8d0] sm:$0xff] %v4430_v60 }
 0x313   : > { %4594 = vst.msk [vmem:[%s6169_s14 + $0xa60] sm:$0xff] %vm1264_vm1, %v4480_v34  ;;  %v5278_v7 = vpop.f32.mrb[162].mxu0  ;;  %4545 = vst [vmem:[%s6169_s14 + $0x8d8] sm:$0xff] %v4431_v61  ;;  %v2335_v25 = vpop.f32.mrb[164].mxu1 }
 0x314   : > { %v4489_v24 = vadd.f32 -1.0, %v5278_v7  ;;  %v2694_v13 = vpop.f32.mrb[163].mxu0  ;;  %v4433_v62 = vadd.f32 -1.0, %v2335_v25  ;;  %v2337_v22 = vpop.f32.mrb[165].mxu1 }
 0x315   : > { %v4486_v18 = vadd.f32 -1.0, %v2694_v13  ;;  %v4434_v59 = vadd.f32 -1.0, %v2337_v22 }
 0x316   : > { %4603 = vst.msk [vmem:[%s6169_s14 + $0xaa8] sm:$0x7] %vm1376_vm2, %v4489_v24  ;;  %4547 = vst [vmem:[%s6169_s14 + $0x8e8] sm:$0xff] %v4433_v62 }
 0x317   : > { %4600 = vst.msk [vmem:[%s6169_s14 + $0xa90] sm:$0xff] %vm1264_vm1, %v4486_v18  ;;  %v2998_v23 = vpop.f32.mrb[164].mxu0  ;;  %4548 = vst [vmem:[%s6169_s14 + $0x8f0] sm:$0xff] %v4434_v59  ;;  %v2341_v51 = vpop.f32.mrb[166].mxu1 }
 0x318   : > { %v4680_v54 = vadd.f32 -1.0, %v2998_v23  ;;  %v3000_v20 = vpop.f32.mrb[165].mxu0  ;;  %v4436_v1 = vadd.f32 -1.0, %v2341_v51  ;;  %v2343_v37 = vpop.f32.mrb[167].mxu1 }
 0x319   : > { %v4681_v0 = vadd.f32 -1.0, %v3000_v20  ;;  %v4437_v6 = vadd.f32 -1.0, %v2343_v37 }
 0x31a   : > { %4794 = vst [vmem:[%s6169_s14 + $0xab0] sm:$0xff] %v4680_v54  ;;  %4550 = vst [vmem:[%s6169_s14 + $0x900] sm:$0xff] %v4436_v1 }
 0x31b   : > { %4795 = vst [vmem:[%s6169_s14 + $0xab8] sm:$0xff] %v4681_v0  ;;  %v3004_v4 = vpop.f32.mrb[166].mxu0  ;;  %4551 = vst [vmem:[%s6169_s14 + $0x908] sm:$0xff] %v4437_v6  ;;  %v2347_v52 = vpop.f32.mrb[168].mxu1 }
 0x31c   : > { %v4683_v55 = vadd.f32 -1.0, %v3004_v4  ;;  %v3006_v47 = vpop.f32.mrb[167].mxu0  ;;  %v4439_v50 = vadd.f32 -1.0, %v2347_v52  ;;  %v2349_v38 = vpop.f32.mrb[169].mxu1 }
 0x31d   : > { %v4684_v30 = vadd.f32 -1.0, %v3006_v47  ;;  %v4440_v53 = vadd.f32 -1.0, %v2349_v38 }
 0x31e   : > { %4797 = vst [vmem:[%s6169_s14 + $0xac8] sm:$0xff] %v4683_v55  ;;  %4553 = vst [vmem:[%s6169_s14 + $0x918] sm:$0xff] %v4439_v50 }
 0x31f   : > { %4798 = vst [vmem:[%s6169_s14 + $0xad0] sm:$0xff] %v4684_v30  ;;  %v3010_v29 = vpop.f32.mrb[168].mxu0  ;;  %4554 = vst [vmem:[%s6169_s14 + $0x920] sm:$0xff] %v4440_v53  ;;  %v2353_v27 = vpop.f32.mrb[170].mxu1 }
 0x320   : > { %v4686_v9 = vadd.f32 -1.0, %v3010_v29  ;;  %v3012_v56 = vpop.f32.mrb[169].mxu0  ;;  %v4442_v15 = vadd.f32 -1.0, %v2353_v27  ;;  %v2355_v10 = vpop.f32.mrb[171].mxu1 }
 0x321   : > { %v4687_v26 = vadd.f32 -1.0, %v3012_v56  ;;  %v4443_v48 = vadd.f32 -1.0, %v2355_v10 }
 0x322   : > { %4800 = vst [vmem:[%s6169_s14 + $0xae0] sm:$0xff] %v4686_v9  ;;  %4556 = vst [vmem:[%s6169_s14 + $0x930] sm:$0xff] %v4442_v15 }
 0x323   : > { %4801 = vst [vmem:[%s6169_s14 + $0xae8] sm:$0xff] %v4687_v26  ;;  %v3016_v63 = vpop.f32.mrb[170].mxu0  ;;  %4557 = vst [vmem:[%s6169_s14 + $0x938] sm:$0xff] %v4443_v48  ;;  %v2359_v21 = vpop.f32.mrb[172].mxu1 }
 0x324   : > { %v4689_v57 = vadd.f32 -1.0, %v3016_v63  ;;  %v3018_v31 = vpop.f32.mrb[171].mxu0  ;;  %v4445_v3 = vadd.f32 -1.0, %v2359_v21  ;;  %v2361_v12 = vpop.f32.mrb[173].mxu1 }
 0x325   : > { %v4690_v28 = vadd.f32 -1.0, %v3018_v31  ;;  %v4446_v42 = vadd.f32 -1.0, %v2361_v12 }
 0x326   : > { %4803 = vst [vmem:[%s6169_s14 + $0xaf8] sm:$0xff] %v4689_v57  ;;  %4559 = vst [vmem:[%s6169_s14 + $0x948] sm:$0xff] %v4445_v3 }
 0x327   : > { %4804 = vst [vmem:[%s6169_s14 + $0xb00] sm:$0xff] %v4690_v28  ;;  %v3022_v33 = vpop.f32.mrb[172].mxu0  ;;  %4560 = vst [vmem:[%s6169_s14 + $0x950] sm:$0xff] %v4446_v42  ;;  %v2365_v45 = vpop.f32.mrb[174].mxu1 }
 0x328   : > { %v4692_v39 = vadd.f32 -1.0, %v3022_v33  ;;  %v3024_v58 = vpop.f32.mrb[173].mxu0  ;;  %v4448_v40 = vadd.f32 -1.0, %v2365_v45  ;;  %v2367_v11 = vpop.f32.mrb[175].mxu1 }
 0x329   : > { %v4693_v32 = vadd.f32 -1.0, %v3024_v58  ;;  %v4449_v41 = vadd.f32 -1.0, %v2367_v11 }
 0x32a   : > { %4806 = vst [vmem:[%s6169_s14 + $0xb10] sm:$0xff] %v4692_v39  ;;  %4562 = vst [vmem:[%s6169_s14 + $0x960] sm:$0xff] %v4448_v40 }
 0x32b   : > { %4807 = vst [vmem:[%s6169_s14 + $0xb18] sm:$0xff] %v4693_v32  ;;  %v3028_v19 = vpop.f32.mrb[174].mxu0  ;;  %4563 = vst [vmem:[%s6169_s14 + $0x968] sm:$0xff] %v4449_v41  ;;  %v2371_v43 = vpop.f32.mrb[176].mxu1 }
 0x32c   : > { %v4695_v2 = vadd.f32 -1.0, %v3028_v19  ;;  %v3030_v35 = vpop.f32.mrb[175].mxu0  ;;  %v4451_v8 = vadd.f32 -1.0, %v2371_v43  ;;  %v2373_v14 = vpop.f32.mrb[177].mxu1 }
 0x32d   : > { %v4696_v44 = vadd.f32 -1.0, %v3030_v35  ;;  %v4452_v16 = vadd.f32 -1.0, %v2373_v14 }
 0x32e   : > { %4809 = vst [vmem:[%s6169_s14 + $0xb28] sm:$0xff] %v4695_v2  ;;  %4565 = vst [vmem:[%s6169_s14 + $0x978] sm:$0xff] %v4451_v8 }
 0x32f   : > { %4810 = vst [vmem:[%s6169_s14 + $0xb30] sm:$0xff] %v4696_v44  ;;  %v3034_v36 = vpop.f32.mrb[176].mxu0  ;;  %4566 = vst [vmem:[%s6169_s14 + $0x980] sm:$0xff] %v4452_v16  ;;  %v2377_v5 = vpop.f32.mrb[178].mxu1 }
 0x330   : > { %v4698_v46 = vadd.f32 -1.0, %v3034_v36  ;;  %v3036_v17 = vpop.f32.mrb[177].mxu0  ;;  %v4454_v60 = vadd.f32 -1.0, %v2377_v5  ;;  %v2379_v49 = vpop.f32.mrb[179].mxu1 }
 0x331   : > { %v4699_v34 = vadd.f32 -1.0, %v3036_v17  ;;  %v4455_v61 = vadd.f32 -1.0, %v2379_v49 }
 0x332   : > { %4812 = vst [vmem:[%s6169_s14 + $0xb40] sm:$0xff] %v4698_v46  ;;  %4568 = vst [vmem:[%s6169_s14 + $0x990] sm:$0xff] %v4454_v60 }
 0x333   : > { %4813 = vst [vmem:[%s6169_s14 + $0xb48] sm:$0xff] %v4699_v34  ;;  %v3040_v7 = vpop.f32.mrb[178].mxu0  ;;  %4569 = vst [vmem:[%s6169_s14 + $0x998] sm:$0xff] %v4455_v61  ;;  %v2383_v25 = vpop.f32.mrb[180].mxu1 }
 0x334   : > { %v4701_v24 = vadd.f32 -1.0, %v3040_v7  ;;  %v3042_v13 = vpop.f32.mrb[179].mxu0  ;;  %v4457_v62 = vadd.f32 -1.0, %v2383_v25  ;;  %v2385_v22 = vpop.f32.mrb[181].mxu1 }
 0x335   : > { %v4702_v18 = vadd.f32 -1.0, %v3042_v13  ;;  %v4458_v59 = vadd.f32 -1.0, %v2385_v22 }
 0x336   : > { %4815 = vst [vmem:[%s6169_s14 + $0xb58] sm:$0xff] %v4701_v24  ;;  %4571 = vst [vmem:[%s6169_s14 + $0x9a8] sm:$0xff] %v4457_v62 }
 0x337   : > { %4816 = vst [vmem:[%s6169_s14 + $0xb60] sm:$0xff] %v4702_v18  ;;  %v3046_v23 = vpop.f32.mrb[180].mxu0  ;;  %4572 = vst [vmem:[%s6169_s14 + $0x9b0] sm:$0xff] %v4458_v59  ;;  %v2389_v51 = vpop.f32.mrb[182].mxu1 }
 0x338   : > { %v4704_v54 = vadd.f32 -1.0, %v3046_v23  ;;  %v3048_v20 = vpop.f32.mrb[181].mxu0  ;;  %v4460_v1 = vadd.f32 -1.0, %v2389_v51  ;;  %v2391_v37 = vpop.f32.mrb[183].mxu1 }
 0x339   : > { %v4705_v0 = vadd.f32 -1.0, %v3048_v20  ;;  %v4461_v6 = vadd.f32 -1.0, %v2391_v37 }
 0x33a   : > { %4818 = vst [vmem:[%s6169_s14 + $0xb70] sm:$0xff] %v4704_v54  ;;  %4574 = vst [vmem:[%s6169_s14 + $0x9c0] sm:$0xff] %v4460_v1 }
 0x33b   : > { %4819 = vst [vmem:[%s6169_s14 + $0xb78] sm:$0xff] %v4705_v0  ;;  %v3052_v4 = vpop.f32.mrb[182].mxu0  ;;  %4575 = vst [vmem:[%s6169_s14 + $0x9c8] sm:$0xff] %v4461_v6  ;;  %v2395_v52 = vpop.f32.mrb[184].mxu1 }
 0x33c   : > { %v4707_v55 = vadd.f32 -1.0, %v3052_v4  ;;  %v3054_v47 = vpop.f32.mrb[183].mxu0  ;;  %v4463_v50 = vadd.f32 -1.0, %v2395_v52  ;;  %v2397_v38 = vpop.f32.mrb[185].mxu1 }
 0x33d   : > { %v4708_v30 = vadd.f32 -1.0, %v3054_v47  ;;  %v4464_v53 = vadd.f32 -1.0, %v2397_v38 }
 0x33e   : > { %4821 = vst [vmem:[%s6169_s14 + $0xb88] sm:$0xff] %v4707_v55  ;;  %4577 = vst [vmem:[%s6169_s14 + $0x9d8] sm:$0xff] %v4463_v50 }
 0x33f   : > { %4822 = vst [vmem:[%s6169_s14 + $0xb90] sm:$0xff] %v4708_v30  ;;  %v3058_v29 = vpop.f32.mrb[184].mxu0  ;;  %4578 = vst [vmem:[%s6169_s14 + $0x9e0] sm:$0xff] %v4464_v53  ;;  %v2401_v27 = vpop.f32.mrb[186].mxu1 }
 0x340   : > { %v4710_v9 = vadd.f32 -1.0, %v3058_v29  ;;  %v3060_v56 = vpop.f32.mrb[185].mxu0  ;;  %v4466_v15 = vadd.f32 -1.0, %v2401_v27  ;;  %v2403_v10 = vpop.f32.mrb[187].mxu1 }
 0x341   : > { %v4711_v26 = vadd.f32 -1.0, %v3060_v56  ;;  %v4467_v48 = vadd.f32 -1.0, %v2403_v10 }
 0x342   : > { %4824 = vst [vmem:[%s6169_s14 + $0xba0] sm:$0xff] %v4710_v9  ;;  %4580 = vst [vmem:[%s6169_s14 + $0x9f0] sm:$0xff] %v4466_v15 }
 0x343   : > { %4825 = vst [vmem:[%s6169_s14 + $0xba8] sm:$0xff] %v4711_v26  ;;  %v3064_v63 = vpop.f32.mrb[186].mxu0  ;;  %4581 = vst [vmem:[%s6169_s14 + $0x9f8] sm:$0xff] %v4467_v48  ;;  %v2407_v21 = vpop.f32.mrb[188].mxu1 }
 0x344   : > { %v4713_v57 = vadd.f32 -1.0, %v3064_v63  ;;  %v3066_v31 = vpop.f32.mrb[187].mxu0  ;;  %v4469_v3 = vadd.f32 -1.0, %v2407_v21  ;;  %v2409_v12 = vpop.f32.mrb[189].mxu1 }
 0x345   : > { %v4714_v28 = vadd.f32 -1.0, %v3066_v31  ;;  %v4470_v42 = vadd.f32 -1.0, %v2409_v12 }
 0x346   : > { %4827 = vst [vmem:[%s6169_s14 + $0xbb8] sm:$0xff] %v4713_v57  ;;  %4583 = vst [vmem:[%s6169_s14 + $0xa08] sm:$0xff] %v4469_v3 }
 0x347   : > { %4828 = vst [vmem:[%s6169_s14 + $0xbc0] sm:$0xff] %v4714_v28  ;;  %v3070_v33 = vpop.f32.mrb[188].mxu0  ;;  %4584 = vst [vmem:[%s6169_s14 + $0xa10] sm:$0xff] %v4470_v42  ;;  %v2413_v45 = vpop.f32.mrb[190].mxu1 }
 0x348   : > { %v4716_v39 = vadd.f32 -1.0, %v3070_v33  ;;  %v3072_v58 = vpop.f32.mrb[189].mxu0  ;;  %v4472_v40 = vadd.f32 -1.0, %v2413_v45  ;;  %v2415_v11 = vpop.f32.mrb[191].mxu1 }
 0x349   : > { %v4717_v32 = vadd.f32 -1.0, %v3072_v58  ;;  %v4473_v41 = vadd.f32 -1.0, %v2415_v11 }
 0x34a   : > { %4830 = vst [vmem:[%s6169_s14 + $0xbd0] sm:$0xff] %v4716_v39  ;;  %4586 = vst [vmem:[%s6169_s14 + $0xa20] sm:$0xff] %v4472_v40 }
 0x34b   : > { %4831 = vst [vmem:[%s6169_s14 + $0xbd8] sm:$0xff] %v4717_v32  ;;  %v3076_v19 = vpop.f32.mrb[190].mxu0  ;;  %4587 = vst [vmem:[%s6169_s14 + $0xa28] sm:$0xff] %v4473_v41  ;;  %v2419_v43 = vpop.f32.mrb[192].mxu1 }
 0x34c   : > { %v4719_v2 = vadd.f32 -1.0, %v3076_v19  ;;  %v3078_v35 = vpop.f32.mrb[191].mxu0  ;;  %v4475_v8 = vadd.f32 -1.0, %v2419_v43  ;;  %v2421_v14 = vpop.f32.mrb[193].mxu1 }
 0x34d   : > { %v4720_v44 = vadd.f32 -1.0, %v3078_v35  ;;  %v4476_v16 = vadd.f32 -1.0, %v2421_v14 }
 0x34e   : > { %4833 = vst [vmem:[%s6169_s14 + $0xbe8] sm:$0xff] %v4719_v2  ;;  %4589 = vst [vmem:[%s6169_s14 + $0xa38] sm:$0xff] %v4475_v8 }
 0x34f   : > { %4834 = vst [vmem:[%s6169_s14 + $0xbf0] sm:$0xff] %v4720_v44  ;;  %v3082_v36 = vpop.f32.mrb[192].mxu0  ;;  %4590 = vst [vmem:[%s6169_s14 + $0xa40] sm:$0xff] %v4476_v16  ;;  %v2425_v5 = vpop.f32.mrb[194].mxu1 }
 0x350   : > { %v4722_v46 = vadd.f32 -1.0, %v3082_v36  ;;  %v3084_v17 = vpop.f32.mrb[193].mxu0  ;;  %v4478_v60 = vadd.f32 -1.0, %v2425_v5  ;;  %v2427_v49 = vpop.f32.mrb[195].mxu1 }
 0x351   : > { %v4723_v34 = vadd.f32 -1.0, %v3084_v17  ;;  %v4479_v61 = vadd.f32 -1.0, %v2427_v49 }
 0x352   : > { %4836 = vst [vmem:[%s6169_s14 + $0xc00] sm:$0xff] %v4722_v46  ;;  %4592 = vst [vmem:[%s6169_s14 + $0xa50] sm:$0xff] %v4478_v60 }
 0x353   : > { %4837 = vst [vmem:[%s6169_s14 + $0xc08] sm:$0xff] %v4723_v34  ;;  %v3088_v7 = vpop.f32.mrb[194].mxu0  ;;  %4593 = vst [vmem:[%s6169_s14 + $0xa58] sm:$0xff] %v4479_v61  ;;  %v2431_v25 = vpop.f32.mrb[196].mxu1 }
 0x354   : > { %v4725_v24 = vadd.f32 -1.0, %v3088_v7  ;;  %v3090_v13 = vpop.f32.mrb[195].mxu0  ;;  %v4481_v62 = vadd.f32 -1.0, %v2431_v25  ;;  %v2433_v22 = vpop.f32.mrb[197].mxu1 }
 0x355   : > { %v4726_v18 = vadd.f32 -1.0, %v3090_v13  ;;  %v4482_v59 = vadd.f32 -1.0, %v2433_v22 }
 0x356   : > { %4839 = vst [vmem:[%s6169_s14 + $0xc18] sm:$0xff] %v4725_v24  ;;  %4595 = vst [vmem:[%s6169_s14 + $0xa68] sm:$0xff] %v4481_v62 }
 0x357   : > { %4840 = vst [vmem:[%s6169_s14 + $0xc20] sm:$0xff] %v4726_v18  ;;  %v3094_v23 = vpop.f32.mrb[196].mxu0  ;;  %4596 = vst [vmem:[%s6169_s14 + $0xa70] sm:$0xff] %v4482_v59  ;;  %v2437_v51 = vpop.f32.mrb[198].mxu1 }
 0x358   : > { %v4728_v54 = vadd.f32 -1.0, %v3094_v23  ;;  %v3096_v20 = vpop.f32.mrb[197].mxu0  ;;  %v4484_v1 = vadd.f32 -1.0, %v2437_v51  ;;  %v2439_v37 = vpop.f32.mrb[199].mxu1 }
 0x359   : > { %v4729_v0 = vadd.f32 -1.0, %v3096_v20  ;;  %v4485_v6 = vadd.f32 -1.0, %v2439_v37 }
 0x35a   : > { %4842 = vst [vmem:[%s6169_s14 + $0xc30] sm:$0xff] %v4728_v54  ;;  %4598 = vst [vmem:[%s6169_s14 + $0xa80] sm:$0xff] %v4484_v1 }
 0x35b   : > { %4843 = vst [vmem:[%s6169_s14 + $0xc38] sm:$0xff] %v4729_v0  ;;  %v3100_v4 = vpop.f32.mrb[198].mxu0  ;;  %4599 = vst [vmem:[%s6169_s14 + $0xa88] sm:$0xff] %v4485_v6  ;;  %v2443_v52 = vpop.f32.mrb[200].mxu1 }
 0x35c   : > { %v4731_v55 = vadd.f32 -1.0, %v3100_v4  ;;  %v3102_v47 = vpop.f32.mrb[199].mxu0  ;;  %v4487_v50 = vadd.f32 -1.0, %v2443_v52  ;;  %v2445_v38 = vpop.f32.mrb[201].mxu1 }
 0x35d   : > { %v4732_v30 = vadd.f32 -1.0, %v3102_v47  ;;  %v4488_v53 = vadd.f32 -1.0, %v2445_v38 }
 0x35e   : > { %4845 = vst [vmem:[%s6169_s14 + $0xc48] sm:$0xff] %v4731_v55  ;;  %4601 = vst [vmem:[%s6169_s14 + $0xa98] sm:$0x7] %v4487_v50 }
 0x35f   : > { %4846 = vst [vmem:[%s6169_s14 + $0xc50] sm:$0xff] %v4732_v30  ;;  %v3106_v29 = vpop.f32.mrb[200].mxu0  ;;  %4602 = vst [vmem:[%s6169_s14 + $0xaa0] sm:$0x7] %v4488_v53  ;;  %v5285_v27 = vpop.f32.mrb[202].mxu1 }
 0x360   : > { %v4734_v9 = vadd.f32 -1.0, %v3106_v29  ;;  %v3108_v56 = vpop.f32.mrb[201].mxu0  ;;  %v4685_v15 = vadd.f32 -1.0, %v5285_v27  ;;  %v3291_v10 = vpop.f32.mrb[203].mxu1 }
 0x361   : > { %v4735_v26 = vadd.f32 -1.0, %v3108_v56  ;;  %v4682_v48 = vadd.f32 -1.0, %v3291_v10 }
 0x362   : > { %4848 = vst [vmem:[%s6169_s14 + $0xc60] sm:$0xff] %v4734_v9  ;;  %4799 = vst.msk [vmem:[%s6169_s14 + $0xad8] sm:$0xff] %vm1264_vm1, %v4685_v15 }
 0x363   : > { %4849 = vst [vmem:[%s6169_s14 + $0xc68] sm:$0xff] %v4735_v26  ;;  %v3112_v63 = vpop.f32.mrb[202].mxu0  ;;  %4796 = vst.msk [vmem:[%s6169_s14 + $0xac0] sm:$0xff] %vm1264_vm1, %v4682_v48  ;;  %v5288_v21 = vpop.f32.mrb[204].mxu1 }
 0x364   : > { %v4737_v57 = vadd.f32 -1.0, %v3112_v63  ;;  %v3114_v31 = vpop.f32.mrb[203].mxu0  ;;  %v4691_v3 = vadd.f32 -1.0, %v5288_v21  ;;  %v3301_v12 = vpop.f32.mrb[205].mxu1 }
 0x365   : > { %v4738_v28 = vadd.f32 -1.0, %v3114_v31  ;;  %v4688_v42 = vadd.f32 -1.0, %v3301_v12 }
 0x366   : > { %4851 = vst [vmem:[%s6169_s14 + $0xc78] sm:$0xff] %v4737_v57  ;;  %4805 = vst.msk [vmem:[%s6169_s14 + $0xb08] sm:$0xff] %vm1264_vm1, %v4691_v3 }
 0x367   : > { %4852 = vst [vmem:[%s6169_s14 + $0xc80] sm:$0xff] %v4738_v28  ;;  %v3118_v33 = vpop.f32.mrb[204].mxu0  ;;  %4802 = vst.msk [vmem:[%s6169_s14 + $0xaf0] sm:$0xff] %vm1264_vm1, %v4688_v42  ;;  %v5291_v45 = vpop.f32.mrb[206].mxu1 }
 0x368   : > { %v4740_v39 = vadd.f32 -1.0, %v3118_v33  ;;  %v3120_v58 = vpop.f32.mrb[205].mxu0  ;;  %v4697_v40 = vadd.f32 -1.0, %v5291_v45  ;;  %v3311_v11 = vpop.f32.mrb[207].mxu1 }
 0x369   : > { %v4741_v32 = vadd.f32 -1.0, %v3120_v58  ;;  %v4694_v41 = vadd.f32 -1.0, %v3311_v11 }
 0x36a   : > { %4854 = vst [vmem:[%s6169_s14 + $0xc90] sm:$0xff] %v4740_v39  ;;  %4811 = vst.msk [vmem:[%s6169_s14 + $0xb38] sm:$0xff] %vm1264_vm1, %v4697_v40 }
 0x36b   : > { %4855 = vst [vmem:[%s6169_s14 + $0xc98] sm:$0xff] %v4741_v32  ;;  %v3124_v19 = vpop.f32.mrb[206].mxu0  ;;  %4808 = vst.msk [vmem:[%s6169_s14 + $0xb20] sm:$0xff] %vm1264_vm1, %v4694_v41  ;;  %v5294_v43 = vpop.f32.mrb[208].mxu1 }
 0x36c   : > { %v4743_v2 = vadd.f32 -1.0, %v3124_v19  ;;  %v3126_v35 = vpop.f32.mrb[207].mxu0  ;;  %v4703_v8 = vadd.f32 -1.0, %v5294_v43  ;;  %v3321_v14 = vpop.f32.mrb[209].mxu1 }
 0x36d   : > { %v4744_v44 = vadd.f32 -1.0, %v3126_v35  ;;  %v4700_v16 = vadd.f32 -1.0, %v3321_v14 }
 0x36e   : > { %4857 = vst [vmem:[%s6169_s14 + $0xca8] sm:$0xff] %v4743_v2  ;;  %4817 = vst.msk [vmem:[%s6169_s14 + $0xb68] sm:$0xff] %vm1264_vm1, %v4703_v8 }
 0x36f   : > { %4858 = vst [vmem:[%s6169_s14 + $0xcb0] sm:$0xff] %v4744_v44  ;;  %v3130_v36 = vpop.f32.mrb[208].mxu0  ;;  %4814 = vst.msk [vmem:[%s6169_s14 + $0xb50] sm:$0xff] %vm1264_vm1, %v4700_v16  ;;  %v5297_v5 = vpop.f32.mrb[210].mxu1 }
 0x370   : > { %v4746_v46 = vadd.f32 -1.0, %v3130_v36  ;;  %v3132_v17 = vpop.f32.mrb[209].mxu0  ;;  %v4709_v60 = vadd.f32 -1.0, %v5297_v5  ;;  %v3331_v49 = vpop.f32.mrb[211].mxu1 }
 0x371   : > { %v4747_v34 = vadd.f32 -1.0, %v3132_v17  ;;  %v4706_v61 = vadd.f32 -1.0, %v3331_v49 }
 0x372   : > { %4860 = vst [vmem:[%s6169_s14 + $0xcc0] sm:$0xff] %v4746_v46  ;;  %4823 = vst.msk [vmem:[%s6169_s14 + $0xb98] sm:$0xff] %vm1264_vm1, %v4709_v60 }
 0x373   : > { %4861 = vst [vmem:[%s6169_s14 + $0xcc8] sm:$0xff] %v4747_v34  ;;  %v3136_v7 = vpop.f32.mrb[210].mxu0  ;;  %4820 = vst.msk [vmem:[%s6169_s14 + $0xb80] sm:$0xff] %vm1264_vm1, %v4706_v61  ;;  %v5300_v25 = vpop.f32.mrb[212].mxu1 }
 0x374   : > { %v4749_v24 = vadd.f32 -1.0, %v3136_v7  ;;  %v3138_v13 = vpop.f32.mrb[211].mxu0  ;;  %v4715_v62 = vadd.f32 -1.0, %v5300_v25  ;;  %v3341_v22 = vpop.f32.mrb[213].mxu1 }
 0x375   : > { %v4750_v18 = vadd.f32 -1.0, %v3138_v13  ;;  %v4712_v59 = vadd.f32 -1.0, %v3341_v22 }
 0x376   : > { %4863 = vst [vmem:[%s6169_s14 + $0xcd8] sm:$0xff] %v4749_v24  ;;  %4829 = vst.msk [vmem:[%s6169_s14 + $0xbc8] sm:$0xff] %vm1264_vm1, %v4715_v62 }
 0x377   : > { %4864 = vst [vmem:[%s6169_s14 + $0xce0] sm:$0xff] %v4750_v18  ;;  %v3142_v23 = vpop.f32.mrb[212].mxu0  ;;  %4826 = vst.msk [vmem:[%s6169_s14 + $0xbb0] sm:$0xff] %vm1264_vm1, %v4712_v59  ;;  %v5303_v51 = vpop.f32.mrb[214].mxu1 }
 0x378   : > { %v4752_v54 = vadd.f32 -1.0, %v3142_v23  ;;  %v3144_v20 = vpop.f32.mrb[213].mxu0  ;;  %v4721_v1 = vadd.f32 -1.0, %v5303_v51  ;;  %v3351_v37 = vpop.f32.mrb[215].mxu1 }
 0x379   : > { %v4753_v0 = vadd.f32 -1.0, %v3144_v20  ;;  %v4718_v6 = vadd.f32 -1.0, %v3351_v37 }
 0x37a   : > { %4866 = vst [vmem:[%s6169_s14 + $0xcf0] sm:$0xff] %v4752_v54  ;;  %4835 = vst.msk [vmem:[%s6169_s14 + $0xbf8] sm:$0xff] %vm1264_vm1, %v4721_v1 }
 0x37b   : > { %4867 = vst [vmem:[%s6169_s14 + $0xcf8] sm:$0xff] %v4753_v0  ;;  %v3148_v4 = vpop.f32.mrb[214].mxu0  ;;  %4832 = vst.msk [vmem:[%s6169_s14 + $0xbe0] sm:$0xff] %vm1264_vm1, %v4718_v6  ;;  %v5306_v52 = vpop.f32.mrb[216].mxu1 }
 0x37c   : > { %v4755_v55 = vadd.f32 -1.0, %v3148_v4  ;;  %v3150_v47 = vpop.f32.mrb[215].mxu0  ;;  %v4727_v50 = vadd.f32 -1.0, %v5306_v52  ;;  %v3361_v38 = vpop.f32.mrb[217].mxu1 }
 0x37d   : > { %v4756_v30 = vadd.f32 -1.0, %v3150_v47  ;;  %v4724_v53 = vadd.f32 -1.0, %v3361_v38 }
 0x37e   : > { %4869 = vst [vmem:[%s6169_s14 + $0xd08] sm:$0xff] %v4755_v55  ;;  %4841 = vst.msk [vmem:[%s6169_s14 + $0xc28] sm:$0xff] %vm1264_vm1, %v4727_v50 }
 0x37f   : > { %4870 = vst [vmem:[%s6169_s14 + $0xd10] sm:$0xff] %v4756_v30  ;;  %v3154_v29 = vpop.f32.mrb[216].mxu0  ;;  %4838 = vst.msk [vmem:[%s6169_s14 + $0xc10] sm:$0xff] %vm1264_vm1, %v4724_v53  ;;  %v5309_v27 = vpop.f32.mrb[218].mxu1 }
 0x380   : > { %v4758_v9 = vadd.f32 -1.0, %v3154_v29  ;;  %v3156_v56 = vpop.f32.mrb[217].mxu0  ;;  %v4733_v15 = vadd.f32 -1.0, %v5309_v27  ;;  %v3371_v10 = vpop.f32.mrb[219].mxu1 }
 0x381   : > { %v4759_v26 = vadd.f32 -1.0, %v3156_v56  ;;  %v4730_v48 = vadd.f32 -1.0, %v3371_v10 }
 0x382   : > { %4872 = vst [vmem:[%s6169_s14 + $0xd20] sm:$0xff] %v4758_v9  ;;  %4847 = vst.msk [vmem:[%s6169_s14 + $0xc58] sm:$0xff] %vm1264_vm1, %v4733_v15 }
 0x383   : > { %4873 = vst [vmem:[%s6169_s14 + $0xd28] sm:$0xff] %v4759_v26  ;;  %v3160_v63 = vpop.f32.mrb[218].mxu0  ;;  %4844 = vst.msk [vmem:[%s6169_s14 + $0xc40] sm:$0xff] %vm1264_vm1, %v4730_v48  ;;  %v5312_v21 = vpop.f32.mrb[220].mxu1 }
 0x384   : > { %v4761_v57 = vadd.f32 -1.0, %v3160_v63  ;;  %v3162_v31 = vpop.f32.mrb[219].mxu0  ;;  %v4739_v3 = vadd.f32 -1.0, %v5312_v21  ;;  %v3381_v12 = vpop.f32.mrb[221].mxu1 }
 0x385   : > { %v4762_v28 = vadd.f32 -1.0, %v3162_v31  ;;  %v4736_v42 = vadd.f32 -1.0, %v3381_v12 }
 0x386   : > { %4875 = vst [vmem:[%s6169_s14 + $0xd38] sm:$0xff] %v4761_v57  ;;  %4853 = vst.msk [vmem:[%s6169_s14 + $0xc88] sm:$0xff] %vm1264_vm1, %v4739_v3 }
 0x387   : > { %4876 = vst [vmem:[%s6169_s14 + $0xd40] sm:$0xff] %v4762_v28  ;;  %v3166_v33 = vpop.f32.mrb[220].mxu0  ;;  %4850 = vst.msk [vmem:[%s6169_s14 + $0xc70] sm:$0xff] %vm1264_vm1, %v4736_v42  ;;  %v5315_v45 = vpop.f32.mrb[222].mxu1 }
 0x388   : > { %v4764_v39 = vadd.f32 -1.0, %v3166_v33  ;;  %v3168_v58 = vpop.f32.mrb[221].mxu0  ;;  %v4745_v40 = vadd.f32 -1.0, %v5315_v45  ;;  %v3391_v11 = vpop.f32.mrb[223].mxu1 }
 0x389   : > { %v4765_v32 = vadd.f32 -1.0, %v3168_v58  ;;  %v4742_v41 = vadd.f32 -1.0, %v3391_v11 }
 0x38a   : > { %4878 = vst [vmem:[%s6169_s14 + $0xd50] sm:$0xff] %v4764_v39  ;;  %4859 = vst.msk [vmem:[%s6169_s14 + $0xcb8] sm:$0xff] %vm1264_vm1, %v4745_v40 }
 0x38b   : > { %4879 = vst [vmem:[%s6169_s14 + $0xd58] sm:$0xff] %v4765_v32  ;;  %v3172_v19 = vpop.f32.mrb[222].mxu0  ;;  %4856 = vst.msk [vmem:[%s6169_s14 + $0xca0] sm:$0xff] %vm1264_vm1, %v4742_v41  ;;  %v5318_v43 = vpop.f32.mrb[224].mxu1 }
 0x38c   : > { %v4767_v2 = vadd.f32 -1.0, %v3172_v19  ;;  %v3174_v35 = vpop.f32.mrb[223].mxu0  ;;  %v4751_v8 = vadd.f32 -1.0, %v5318_v43  ;;  %v3401_v14 = vpop.f32.mrb[225].mxu1 }
 0x38d   : > { %v4768_v44 = vadd.f32 -1.0, %v3174_v35  ;;  %v4748_v16 = vadd.f32 -1.0, %v3401_v14 }
 0x38e   : > { %4881 = vst [vmem:[%s6169_s14 + $0xd68] sm:$0xff] %v4767_v2  ;;  %4865 = vst.msk [vmem:[%s6169_s14 + $0xce8] sm:$0xff] %vm1264_vm1, %v4751_v8 }
 0x38f   : > { %4882 = vst [vmem:[%s6169_s14 + $0xd70] sm:$0xff] %v4768_v44  ;;  %v3178_v36 = vpop.f32.mrb[224].mxu0  ;;  %4862 = vst.msk [vmem:[%s6169_s14 + $0xcd0] sm:$0xff] %vm1264_vm1, %v4748_v16  ;;  %v5321_v5 = vpop.f32.mrb[226].mxu1 }
 0x390   : > { %v4770_v46 = vadd.f32 -1.0, %v3178_v36  ;;  %v3180_v17 = vpop.f32.mrb[225].mxu0  ;;  %v4757_v60 = vadd.f32 -1.0, %v5321_v5  ;;  %v3411_v49 = vpop.f32.mrb[227].mxu1 }
 0x391   : > { %v4771_v34 = vadd.f32 -1.0, %v3180_v17  ;;  %v4754_v61 = vadd.f32 -1.0, %v3411_v49 }
 0x392   : > { %4884 = vst [vmem:[%s6169_s14 + $0xd80] sm:$0xff] %v4770_v46  ;;  %4871 = vst.msk [vmem:[%s6169_s14 + $0xd18] sm:$0xff] %vm1264_vm1, %v4757_v60 }
 0x393   : > { %4885 = vst [vmem:[%s6169_s14 + $0xd88] sm:$0xff] %v4771_v34  ;;  %v3184_v7 = vpop.f32.mrb[226].mxu0  ;;  %4868 = vst.msk [vmem:[%s6169_s14 + $0xd00] sm:$0xff] %vm1264_vm1, %v4754_v61  ;;  %v5324_v25 = vpop.f32.mrb[228].mxu1 }
 0x394   : > { %v4773_v24 = vadd.f32 -1.0, %v3184_v7  ;;  %v3186_v13 = vpop.f32.mrb[227].mxu0  ;;  %v4763_v62 = vadd.f32 -1.0, %v5324_v25  ;;  %v3421_v22 = vpop.f32.mrb[229].mxu1 }
 0x395   : > { %v4774_v18 = vadd.f32 -1.0, %v3186_v13  ;;  %v4760_v59 = vadd.f32 -1.0, %v3421_v22 }
 0x396   : > { %4887 = vst [vmem:[%s6169_s14 + $0xd98] sm:$0xff] %v4773_v24  ;;  %4877 = vst.msk [vmem:[%s6169_s14 + $0xd48] sm:$0xff] %vm1264_vm1, %v4763_v62 }
 0x397   : > { %4888 = vst [vmem:[%s6169_s14 + $0xda0] sm:$0xff] %v4774_v18  ;;  %v3190_v23 = vpop.f32.mrb[228].mxu0  ;;  %4874 = vst.msk [vmem:[%s6169_s14 + $0xd30] sm:$0xff] %vm1264_vm1, %v4760_v59  ;;  %v5327_v51 = vpop.f32.mrb[230].mxu1 }
 0x398   : > { %v4776_v54 = vadd.f32 -1.0, %v3190_v23  ;;  %v3192_v20 = vpop.f32.mrb[229].mxu0  ;;  %v4769_v1 = vadd.f32 -1.0, %v5327_v51  ;;  %v3431_v37 = vpop.f32.mrb[231].mxu1 }
 0x399   : > { %v4777_v0 = vadd.f32 -1.0, %v3192_v20  ;;  %v4766_v6 = vadd.f32 -1.0, %v3431_v37 }
 0x39a   : > { %4890 = vst [vmem:[%s6169_s14 + $0xdb0] sm:$0xff] %v4776_v54  ;;  %4883 = vst.msk [vmem:[%s6169_s14 + $0xd78] sm:$0xff] %vm1264_vm1, %v4769_v1 }
 0x39b   : > { %4891 = vst [vmem:[%s6169_s14 + $0xdb8] sm:$0xff] %v4777_v0  ;;  %v3196_v4 = vpop.f32.mrb[230].mxu0  ;;  %4880 = vst.msk [vmem:[%s6169_s14 + $0xd60] sm:$0xff] %vm1264_vm1, %v4766_v6  ;;  %v5330_v52 = vpop.f32.mrb[232].mxu1 }
 0x39c   : > { %v4779_v55 = vadd.f32 -1.0, %v3196_v4  ;;  %v3198_v47 = vpop.f32.mrb[231].mxu0  ;;  %v4775_v50 = vadd.f32 -1.0, %v5330_v52  ;;  %v3441_v38 = vpop.f32.mrb[233].mxu1 }
 0x39d   : > { %v4780_v30 = vadd.f32 -1.0, %v3198_v47  ;;  %v4772_v53 = vadd.f32 -1.0, %v3441_v38 }
 0x39e   : > { %4893 = vst [vmem:[%s6169_s14 + $0xdc8] sm:$0xff] %v4779_v55  ;;  %4889 = vst.msk [vmem:[%s6169_s14 + $0xda8] sm:$0xff] %vm1264_vm1, %v4775_v50 }
 0x39f   : > { %4894 = vst [vmem:[%s6169_s14 + $0xdd0] sm:$0xff] %v4780_v30  ;;  %v3202_v29 = vpop.f32.mrb[232].mxu0  ;;  %4886 = vst.msk [vmem:[%s6169_s14 + $0xd90] sm:$0xff] %vm1264_vm1, %v4772_v53  ;;  %v5333_v27 = vpop.f32.mrb[234].mxu1 }
 0x3a0   : > { %v4782_v9 = vadd.f32 -1.0, %v3202_v29  ;;  %v3204_v56 = vpop.f32.mrb[233].mxu0  ;;  %v4781_v15 = vadd.f32 -1.0, %v5333_v27  ;;  %v3451_v10 = vpop.f32.mrb[235].mxu1 }
 0x3a1   : > { %v4783_v26 = vadd.f32 -1.0, %v3204_v56  ;;  %v4778_v48 = vadd.f32 -1.0, %v3451_v10 }
 0x3a2   : > { %4896 = vst [vmem:[%s6169_s14 + $0xde0] sm:$0xff] %v4782_v9  ;;  %4895 = vst.msk [vmem:[%s6169_s14 + $0xdd8] sm:$0xff] %vm1264_vm1, %v4781_v15 }
 0x3a3   : > { %4897 = vst [vmem:[%s6169_s14 + $0xde8] sm:$0xff] %v4783_v26  ;;  %v3208_v63 = vpop.f32.mrb[234].mxu0  ;;  %4892 = vst.msk [vmem:[%s6169_s14 + $0xdc0] sm:$0xff] %vm1264_vm1, %v4778_v48  ;;  %v5336_v21 = vpop.f32.mrb[236].mxu1 }
 0x3a4   : > { %v4785_v57 = vadd.f32 -1.0, %v3208_v63  ;;  %v3210_v31 = vpop.f32.mrb[235].mxu0  ;;  %v4787_v3 = vadd.f32 -1.0, %v5336_v21  ;;  %v3461_v12 = vpop.f32.mrb[237].mxu1 }
 0x3a5   : > { %v4786_v28 = vadd.f32 -1.0, %v3210_v31  ;;  %v4784_v42 = vadd.f32 -1.0, %v3461_v12 }
 0x3a6   : > { %4899 = vst [vmem:[%s6169_s14 + $0xdf8] sm:$0xff] %v4785_v57  ;;  %4901 = vst.msk [vmem:[%s6169_s14 + $0xe08] sm:$0xff] %vm1264_vm1, %v4787_v3 }
 0x3a7   : > { %4900 = vst [vmem:[%s6169_s14 + $0xe00] sm:$0xff] %v4786_v28  ;;  %v3214_v33 = vpop.f32.mrb[236].mxu0  ;;  %4898 = vst.msk [vmem:[%s6169_s14 + $0xdf0] sm:$0xff] %vm1264_vm1, %v4784_v42  ;;  %v5339_v45 = vpop.f32.mrb[238].mxu1 }
 0x3a8   : > { %v4788_v39 = vadd.f32 -1.0, %v3214_v33  ;;  %v3216_v58 = vpop.f32.mrb[237].mxu0  ;;  %v4793_v40 = vadd.f32 -1.0, %v5339_v45  ;;  %v3471_v11 = vpop.f32.mrb[239].mxu1 }
 0x3a9   : > { %v4789_v32 = vadd.f32 -1.0, %v3216_v58  ;;  %v4790_v41 = vadd.f32 -1.0, %v3471_v11 }
 0x3aa   : > { %4902 = vst [vmem:[%s6169_s14 + $0xe10] sm:$0xff] %v4788_v39  ;;  %4907 = vst.msk [vmem:[%s6169_s14 + $0xe38] sm:$0x7] %vm1376_vm2, %v4793_v40 }
 0x3ab   : > { %4903 = vst [vmem:[%s6169_s14 + $0xe18] sm:$0xff] %v4789_v32  ;;  %v3220_v19 = vpop.f32.mrb[238].mxu0  ;;  %4904 = vst.msk [vmem:[%s6169_s14 + $0xe20] sm:$0xff] %vm1264_vm1, %v4790_v41 }
 0x3ac   : > { %v4791_v43 = vadd.f32 -1.0, %v3220_v19  ;;  %v3222_v2 = vpop.f32.mrb[239].mxu0 }
 0x3ad   : > { %v4792_v35 = vadd.f32 -1.0, %v3222_v2 }
 0x3ae   : > { %4905 = vst [vmem:[%s6169_s14 + $0xe28] sm:$0x7] %v4791_v43 }
 0x3af   : > { %4906 = vst [vmem:[%s6169_s14 + $0xe30] sm:$0x7] %v4792_v35 }
 0x3b0 PF: > { %s14_s12 = sadd.s32 1, %s5483_s12  }
 0x3b1   : > { %p11_p5 = scmp.ge.s32.totalorder %s14_s12, 4  }
 0x3b3   :  { %13 = sbr.rel (!%p11_p5) target bundleno = 1 (0x1), region = 70 }
 0x3ba   :  { %3733 = vsyncpa [#allocation3], 1 }
 0x3bb   :  { %3735 = vsyncpa [#allocation3 + $0x1], 1 }

</bundles_post_ra>
